<compile_context>
chip_gen: v5e
topology: v5e:2x2
jax: 0.10.0
libtpu: 0.0.40
codegen_flags: <defaults>
</compile_context>

<pallas_src>
import functools

import numpy as np
import jax
import jax.numpy as jnp
from jax.experimental import pallas as pl
from jax.experimental.pallas import tpu as pltpu

CMAX = 8             # all channel dims padded to the network max (8)
K_ROWS = 80          # 9 taps * 8 channels + bias row (72) + pad to 80
BIAS_ROW = 72
LEAKY_SLOPE = 0.2    # nn.LeakyReLU(negative_slope=0.2)


# ---------------------------------------------------------------------------
# Flattened, spatially padded activation layout
# ---------------------------------------------------------------------------
class _Geom:
    """Layout of one conv layer's input buffer / output columns.

    Buffer row (one per channel):
        [ G guard cols | image 0: (H+2)x(W+2) padded pixels (row-major)
          | image 1 ... | G guard cols ]
    A 3x3 conv tap (dy, dx) is then a static lane shift of
    (dy-1)*(W+2) + (dx-1); the guard keeps every shifted slice in bounds.
    Each image's own pad ring is exactly zero (conv padding=1 semantics);
    guard / cross-image columns only ever feed conv outputs at pad-ring
    positions, which the next per-image transition matrix (zero rows) or the
    wrapper's interior slice drops — they just have to stay finite.
    """

    def __init__(self, n, h, w):
        self.n, self.h, self.w = n, h, w
        self.hp, self.wp = h + 2, w + 2
        self.img = self.hp * self.wp          # padded pixels per image
        self.l = n * self.img                 # conv-output columns
        self.g = self.wp + 1                  # guard width
        self.lg = self.l + 2 * self.g         # conv-input buffer columns


# ---------------------------------------------------------------------------
# Per-image transition matrices (built once on host, stored as bf16)
# ---------------------------------------------------------------------------
def _pool_matrix(hs, ws, hd, wd, pad):
    """AvgPool2d(2, stride=2, padding=pad, count_include_pad=True) + re-pad.

    Maps one padded source image (HPs*WPs cols) to one padded dest image
    (HPd*WPd cols).  Source pad-ring rows and dest pad-ring columns are zero.
    """
    hps, wps = hs + 2, ws + 2
    hpd, wpd = hd + 2, wd + 2
    t = np.zeros((hps * wps, hpd * wpd), np.float32)
    for yo in range(hd):
        for xo in range(wd):
            dst = (yo + 1) * wpd + (xo + 1)
            for a in (0, 1):
                for c in (0, 1):
                    ys, xs = 2 * yo + a - pad, 2 * xo + c - pad
                    if 0 <= ys < hs and 0 <= xs < ws:
                        t[(ys + 1) * wps + (xs + 1), dst] += 0.25
    return t


def _up_matrix(hs, ws, hd, wd):
    """F.interpolate(scale_factor=2, mode='nearest') + re-pad (per image)."""
    hps, wps = hs + 2, ws + 2
    hpd, wpd = hd + 2, wd + 2
    t = np.zeros((hps * wps, hpd * wpd), np.float32)
    for yo in range(hd):
        for xo in range(wd):
            t[(yo // 2 + 1) * wps + (xo // 2 + 1),
              (yo + 1) * wpd + (xo + 1)] = 1.0
    return t


def _pack_weights(params, names):
    """OIHW conv weights -> (L, 8, 80): column 8*k + c = tap k, in-channel c;
    column 72 = bias (the im2col buffer's row 72 is a constant 1)."""
    wt = np.zeros((len(names), CMAX, K_ROWS), np.float32)
    for i, name in enumerate(names):
        w_, b_ = params[name]
        w_ = np.asarray(w_, np.float32)
        b_ = np.asarray(b_, np.float32)
        cout, cin = w_.shape[0], w_.shape[1]
        for dy in range(3):
            for dx in range(3):
                k = dy * 3 + dx
                wt[i, :cout, 8 * k:8 * k + cin] = w_[:, :, dy, dx]
        wt[i, :cout, BIAS_ROW] = b_
    return wt


# ---------------------------------------------------------------------------
# The single fused Pallas kernel
# ---------------------------------------------------------------------------
def _fused_ae_kernel(*refs, geoms, leaky, batch, n_layers, final_pool):
    n_trans = (n_layers - 1) + (1 if final_pool else 0)
    x_ref, w_ref = refs[0], refs[1]
    t_refs = refs[2:2 + n_trans]
    o_ref = refs[2 + n_trans]
    buf_ref = refs[3 + n_trans]        # shared conv-input buffer (layers >= 2)
    col_ref = refs[4 + n_trans]        # shared (80, Lmax) im2col buffer

    # One-time scratch init: keep everything finite (garbage columns are only
    # ever multiplied by exact-zero matrix entries, and 0 * NaN != 0) and set
    # the constant-1 bias row of the im2col buffer.
    col_ref[...] = jnp.zeros_like(col_ref)
    col_ref[BIAS_ROW:BIAS_ROW + 1, :] = jnp.ones(
        (1, col_ref.shape[1]), col_ref.dtype)
    buf_ref[...] = jnp.zeros_like(buf_ref)

    def conv(src_ref, layer):
        """3x3 conv + bias (+ LeakyReLU) as ONE K=80 MXU matmul."""
        g = geoms[layer]
        # Hoist the 9 statically lane-shifted taps once into the im2col rows.
        for k in range(9):
            dy, dx = divmod(k, 3)
            start = g.g + (dy - 1) * g.wp + (dx - 1)
            col_ref[8 * k:8 * (k + 1), :g.l] = src_ref[:, start:start + g.l]
        z = jnp.dot(w_ref[layer],                               # (8, 80) bf16
                    col_ref[:, :g.l].astype(jnp.bfloat16),      # (80, L) bf16
                    preferred_element_type=jnp.float32)         # f32 accum
        if leaky[layer]:
            z = jnp.where(z >= 0.0, z, LEAKY_SLOPE * z)
        return z                                                # (8, L) f32

    def transition(h, g_src, t_ref, dst_ref, dst_off):
        """AvgPool / nearest-2x-upsample + re-pad as one bf16 matmul per image."""
        hb = h.astype(jnp.bfloat16)
        src, dst = g_src.img, t_ref.shape[1]
        for b in range(batch):
            chunk = jnp.dot(hb[:, b * src:(b + 1) * src], t_ref[...],
                            preferred_element_type=jnp.float32)
            dst_ref[:, dst_off + b * dst:dst_off + (b + 1) * dst] = (
                chunk.astype(dst_ref.dtype))

    h = conv(x_ref, 0)
    for l in range(1, n_layers):
        transition(h, geoms[l - 1], t_refs[l - 1], buf_ref, geoms[l].g)
        h = conv(buf_ref, l)

    if final_pool:
        # features=True: final AvgPool written straight into the lane-padded output.
        transition(h, geoms[-1], t_refs[-1], o_ref, 0)
        used = batch * t_refs[-1].shape[1]
        if used < o_ref.shape[1]:
            o_ref[:, used:] = jnp.zeros(
                (o_ref.shape[0], o_ref.shape[1] - used), o_ref.dtype)
    else:
        # Raw last-layer activation; the wrapper extracts the interior pixels.
        o_ref[...] = h


# ---------------------------------------------------------------------------
# Builder: precompute constants, wire up the (no-grid, VMEM-resident) call
# ---------------------------------------------------------------------------
def build_autoencoder_forward(params, batch, height, width, features=False):
    # Spatial sizes along the network.
    h2, w2 = height // 2 + 1, width // 2 + 1           # AvgPool2d(2,2,pad=1)
    h3, w3 = (h2 - 2) // 2 + 1, (w2 - 2) // 2 + 1       # AvgPool2d(2,2,pad=0)
    h4, w4 = 2 * h3, 2 * w3                             # nearest 2x
    h5, w5 = 2 * h4, 2 * w4                             # nearest 2x

    g1, g2 = _Geom(batch, height, width), _Geom(batch, h2, w2)
    g3, g4, g5 = _Geom(batch, h3, w3), _Geom(batch, h4, w4), _Geom(batch, h5, w5)

    if features:
        names = ["enc1", "enc2"]
        geoms = [g1, g2]
        leaky = (True, True)
        trans_np = [_pool_matrix(height, width, h2, w2, pad=1),
                    _pool_matrix(h2, w2, h3, w3, pad=0)]          # -> output
        out_cols = -(-(batch * (h3 + 2) * (w3 + 2)) // 128) * 128  # lane-dense
        out_shape = (CMAX, out_cols)
    else:
        names = ["enc1", "enc2", "dec1", "dec2", "dec3"]
        geoms = [g1, g2, g3, g4, g5]
        leaky = (True, True, True, True, False)
        trans_np = [_pool_matrix(height, width, h2, w2, pad=1),
                    _pool_matrix(h2, w2, h3, w3, pad=0),
                    _up_matrix(h3, w3, h4, w4),
                    _up_matrix(h4, w4, h5, w5)]
        out_shape = (CMAX, g5.l)

    n_layers = len(geoms)
    buf_lg = max(g.lg for g in geoms[1:])
    col_w = max(g.l for g in geoms)

    # Constants (built once): bf16 weights/bias (exactly representable values
    # in the transitions; activations/weights tolerate bf16 per tolerance).
    w_all = jnp.asarray(_pack_weights(params, names), jnp.bfloat16)
    t_consts = [jnp.asarray(t, jnp.bfloat16) for t in trans_np]

    fused = pl.pallas_call(
        functools.partial(_fused_ae_kernel, geoms=tuple(geoms), leaky=leaky,
                          batch=batch, n_layers=n_layers, final_pool=features),
        # No grid: whole arrays live in VMEM once, no useless double-buffering.
        in_specs=[pl.BlockSpec(memory_space=pltpu.MemorySpace.VMEM)]
                 * (2 + len(t_consts)),
        out_specs=pl.BlockSpec(memory_space=pltpu.MemorySpace.VMEM),
        out_shape=jax.ShapeDtypeStruct(out_shape, jnp.float32),
        scratch_shapes=[pltpu.VMEM((CMAX, buf_lg), jnp.float32),
                        pltpu.VMEM((K_ROWS, col_w), jnp.float32)],
    )

    def forward(x_nchw):
        x = x_nchw.astype(jnp.float32)
        # Build the first conv's padded/flattened buffer in plain XLA
        # (replaces the old T0 one-hot permutation matmul + its HBM constant).
        xp = jnp.pad(x[:, 0], ((0, 0), (1, 1), (1, 1)))           # (N, H+2, W+2)
        row0 = jnp.concatenate([jnp.zeros((g1.g,), jnp.float32),
                                xp.reshape(batch * g1.img),
                                jnp.zeros((g1.g,), jnp.float32)])
        x_in = jnp.zeros((CMAX, g1.lg), jnp.float32).at[0].set(row0)
        out = fused(x_in, w_all, *t_consts)
        if features:
            hp3, wp3 = h3 + 2, w3 + 2
            o = out[:, :batch * hp3 * wp3].reshape(CMAX, batch, hp3, wp3)
            return o[:, :, 1:1 + h3, 1:1 + w3].transpose(1, 0, 2, 3)
        # Interior extraction replaces the old T5 output-gather matmul.
        o = out[0].reshape(batch, g5.hp, g5.wp)
        return o[:, 1:1 + h5, 1:1 + w5].reshape(batch, 1, h5, w5)

    return forward


# ---------------------------------------------------------------------------
# Deterministic parameters (PyTorch Conv2d default-init style)
# ---------------------------------------------------------------------------
def init_params(key):
    def conv_init(k, cout, cin):
        k1, k2 = jax.random.split(k)
        bound = 1.0 / ((cin * 9) ** 0.5)
        w = jax.random.uniform(k1, (cout, cin, 3, 3), jnp.float32, -bound, bound)
        b = jax.random.uniform(k2, (cout,), jnp.float32, -bound, bound)
        return w, b

    keys = jax.random.split(key, 5)
    return {
        "enc1": conv_init(keys[0], 4, 1),
        "enc2": conv_init(keys[1], 8, 4),
        "dec1": conv_init(keys[2], 8, 8),
        "dec2": conv_init(keys[3], 4, 8),
        "dec3": conv_init(keys[4], 1, 4),
    }


# ---------------------------------------------------------------------------
# Plain-JAX reference (loose self-check only)
# ---------------------------------------------------------------------------
def _ref_conv(x, w, b):
    y = jax.lax.conv_general_dilated(
        x, w, window_strides=(1, 1), padding=((1, 1), (1, 1)),
        dimension_numbers=("NCHW", "OIHW", "NCHW"),
        precision=jax.lax.Precision.HIGHEST)
    return y + b.reshape(1, -1, 1, 1)


def _ref_leaky(x):
    return jnp.where(x >= 0, x, LEAKY_SLOPE * x)


def _ref_avgpool(x, pad):
    x = jnp.pad(x, ((0, 0), (0, 0), (pad, pad), (pad, pad)))
    n, c, h, w = x.shape
    ho, wo = (h - 2) // 2 + 1, (w - 2) // 2 + 1
    x = x[:, :, :2 * ho, :2 * wo].reshape(n, c, ho, 2, wo, 2)
    return x.mean(axis=(3, 5))


def _ref_up2(x):
    return jnp.repeat(jnp.repeat(x, 2, axis=2), 2, axis=3)


def _reference_encoder(params, x):
    w, b = params["enc1"]; x = _ref_avgpool(_ref_leaky(_ref_conv(x, w, b)), 1)
    w, b = params["enc2"]; x = _ref_avgpool(_ref_leaky(_ref_conv(x, w, b)), 0)
    return x


def _reference_forward(params, x):
    x = _reference_encoder(params, x)
    w, b = params["dec1"]; x = _ref_up2(_ref_leaky(_ref_conv(x, w, b)))
    w, b = params["dec2"]; x = _ref_up2(_ref_leaky(_ref_conv(x, w, b)))
    w, b = params["dec3"]; x = _ref_conv(x, w, b)
    return x


if __name__ == "__main__":
    key = jax.random.PRNGKey(0)
    pkey, xkey = jax.random.split(key)
    params = init_params(pkey)
    # NCHW input, single channel (the first conv expects 1 input channel).
    x = jax.random.normal(xkey, (2, 1, 16, 16), jnp.float32)

    # Full autoencoder path.
    forward = jax.jit(build_autoencoder_forward(params, batch=2, height=16,
                                                width=16, features=False))
    out = forward(x)
    jax.block_until_ready(out)
    assert out.shape == (2, 1, 16, 16), out.shape
    assert bool(jnp.all(jnp.isfinite(out)))
    ref = _reference_forward(params, x)
    max_err = float(jnp.max(jnp.abs(out - ref)))
    assert max_err < 5e-2, f"mismatch vs reference: {max_err}"

    # Encoder-features path (forward(x, features=True) in the PyTorch module).
    feat_fwd = jax.jit(build_autoencoder_forward(params, batch=2, height=16,
                                                 width=16, features=True))
    feats = feat_fwd(x)
    jax.block_until_ready(feats)
    assert feats.shape == (2, 8, 4, 4), feats.shape
    ref_f = _reference_encoder(params, x)
    max_err_f = float(jnp.max(jnp.abs(feats - ref_f)))
    assert max_err_f < 5e-2, f"features mismatch vs reference: {max_err_f}"

    print("KERNEL_OK")
</pallas_src>

<mosaic_0001>
module attributes {stable_mosaic.version = 11 : i64} {
  func.func @_fused_ae_kernel(%arg0: memref<8x686xf32, #tpu.memory_space<vmem>>, %arg1: memref<5x8x80xbf16, #tpu.memory_space<vmem>>, %arg2: memref<324x121xbf16, #tpu.memory_space<vmem>>, %arg3: memref<121x36xbf16, #tpu.memory_space<vmem>>, %arg4: memref<36x100xbf16, #tpu.memory_space<vmem>>, %arg5: memref<100x324xbf16, #tpu.memory_space<vmem>>, %arg6: memref<8x648xf32, #tpu.memory_space<vmem>>, %arg7: memref<8x686xf32, #tpu.memory_space<vmem>>, %arg8: memref<80x648xf32, #tpu.memory_space<vmem>>) attributes {dimension_semantics = [], scalar_prefetch = 0 : i64, scratch_operands = 2 : i64, tpu.core_type = #tpu.core_type<tc>} {
    %cst = arith.constant 0.000000e+00 : f32
    %0 = vector.broadcast %cst : f32 to vector<80x648xf32>
    %c0 = arith.constant 0 : index
    %c0_0 = arith.constant 0 : index
    %1 = vector.load %arg8[%c0, %c0_0] : memref<80x648xf32, #tpu.memory_space<vmem>>, vector<80x648xf32>
    tpu.vector_store %arg8[%c0, %c0_0], %0 {strides = array<i32>} : memref<80x648xf32, #tpu.memory_space<vmem>>, vector<80x648xf32>,
    %cst_1 = arith.constant 1.000000e+00 : f32
    %2 = vector.broadcast %cst_1 : f32 to vector<1x648xf32>
    %c72 = arith.constant 72 : index
    %c0_2 = arith.constant 0 : index
    %3 = vector.load %arg8[%c72, %c0_2] : memref<80x648xf32, #tpu.memory_space<vmem>>, vector<1x648xf32>
    tpu.vector_store %arg8[%c72, %c0_2], %2 {strides = array<i32>} : memref<80x648xf32, #tpu.memory_space<vmem>>, vector<1x648xf32>,
    %cst_3 = arith.constant 0.000000e+00 : f32
    %4 = vector.broadcast %cst_3 : f32 to vector<8x686xf32>
    %c0_4 = arith.constant 0 : index
    %c0_5 = arith.constant 0 : index
    %5 = vector.load %arg7[%c0_4, %c0_5] : memref<8x686xf32, #tpu.memory_space<vmem>>, vector<8x686xf32>
    tpu.vector_store %arg7[%c0_4, %c0_5], %4 {strides = array<i32>} : memref<8x686xf32, #tpu.memory_space<vmem>>, vector<8x686xf32>,
    %c0_6 = arith.constant 0 : index
    %c0_7 = arith.constant 0 : index
    %6 = vector.load %arg0[%c0_6, %c0_7] : memref<8x686xf32, #tpu.memory_space<vmem>>, vector<8x648xf32>
    %c0_8 = arith.constant 0 : index
    %c0_9 = arith.constant 0 : index
    %7 = vector.load %arg8[%c0_8, %c0_9] : memref<80x648xf32, #tpu.memory_space<vmem>>, vector<8x648xf32>
    tpu.vector_store %arg8[%c0_8, %c0_9], %6 {strides = array<i32>} : memref<80x648xf32, #tpu.memory_space<vmem>>, vector<8x648xf32>,
    %c0_10 = arith.constant 0 : index
    %c1 = arith.constant 1 : index
    %8 = vector.load %arg0[%c0_10, %c1] : memref<8x686xf32, #tpu.memory_space<vmem>>, vector<8x648xf32>
    %c8 = arith.constant 8 : index
    %c0_11 = arith.constant 0 : index
    %9 = vector.load %arg8[%c8, %c0_11] : memref<80x648xf32, #tpu.memory_space<vmem>>, vector<8x648xf32>
    tpu.vector_store %arg8[%c8, %c0_11], %8 {strides = array<i32>} : memref<80x648xf32, #tpu.memory_space<vmem>>, vector<8x648xf32>,
    %c0_12 = arith.constant 0 : index
    %c2 = arith.constant 2 : index
    %10 = vector.load %arg0[%c0_12, %c2] : memref<8x686xf32, #tpu.memory_space<vmem>>, vector<8x648xf32>
    %c16 = arith.constant 16 : index
    %c0_13 = arith.constant 0 : index
    %11 = vector.load %arg8[%c16, %c0_13] : memref<80x648xf32, #tpu.memory_space<vmem>>, vector<8x648xf32>
    tpu.vector_store %arg8[%c16, %c0_13], %10 {strides = array<i32>} : memref<80x648xf32, #tpu.memory_space<vmem>>, vector<8x648xf32>,
    %c0_14 = arith.constant 0 : index
    %c18 = arith.constant 18 : index
    %12 = vector.load %arg0[%c0_14, %c18] : memref<8x686xf32, #tpu.memory_space<vmem>>, vector<8x648xf32>
    %c24 = arith.constant 24 : index
    %c0_15 = arith.constant 0 : index
    %13 = vector.load %arg8[%c24, %c0_15] : memref<80x648xf32, #tpu.memory_space<vmem>>, vector<8x648xf32>
    tpu.vector_store %arg8[%c24, %c0_15], %12 {strides = array<i32>} : memref<80x648xf32, #tpu.memory_space<vmem>>, vector<8x648xf32>,
    %c0_16 = arith.constant 0 : index
    %c19 = arith.constant 19 : index
    %14 = vector.load %arg0[%c0_16, %c19] : memref<8x686xf32, #tpu.memory_space<vmem>>, vector<8x648xf32>
    %c32 = arith.constant 32 : index
    %c0_17 = arith.constant 0 : index
    %15 = vector.load %arg8[%c32, %c0_17] : memref<80x648xf32, #tpu.memory_space<vmem>>, vector<8x648xf32>
    tpu.vector_store %arg8[%c32, %c0_17], %14 {strides = array<i32>} : memref<80x648xf32, #tpu.memory_space<vmem>>, vector<8x648xf32>,
    %c0_18 = arith.constant 0 : index
    %c20 = arith.constant 20 : index
    %16 = vector.load %arg0[%c0_18, %c20] : memref<8x686xf32, #tpu.memory_space<vmem>>, vector<8x648xf32>
    %c40 = arith.constant 40 : index
    %c0_19 = arith.constant 0 : index
    %17 = vector.load %arg8[%c40, %c0_19] : memref<80x648xf32, #tpu.memory_space<vmem>>, vector<8x648xf32>
    tpu.vector_store %arg8[%c40, %c0_19], %16 {strides = array<i32>} : memref<80x648xf32, #tpu.memory_space<vmem>>, vector<8x648xf32>,
    %c0_20 = arith.constant 0 : index
    %c36 = arith.constant 36 : index
    %18 = vector.load %arg0[%c0_20, %c36] : memref<8x686xf32, #tpu.memory_space<vmem>>, vector<8x648xf32>
    %c48 = arith.constant 48 : index
    %c0_21 = arith.constant 0 : index
    %19 = vector.load %arg8[%c48, %c0_21] : memref<80x648xf32, #tpu.memory_space<vmem>>, vector<8x648xf32>
    tpu.vector_store %arg8[%c48, %c0_21], %18 {strides = array<i32>} : memref<80x648xf32, #tpu.memory_space<vmem>>, vector<8x648xf32>,
    %c0_22 = arith.constant 0 : index
    %c37 = arith.constant 37 : index
    %20 = vector.load %arg0[%c0_22, %c37] : memref<8x686xf32, #tpu.memory_space<vmem>>, vector<8x648xf32>
    %c56 = arith.constant 56 : index
    %c0_23 = arith.constant 0 : index
    %21 = vector.load %arg8[%c56, %c0_23] : memref<80x648xf32, #tpu.memory_space<vmem>>, vector<8x648xf32>
    tpu.vector_store %arg8[%c56, %c0_23], %20 {strides = array<i32>} : memref<80x648xf32, #tpu.memory_space<vmem>>, vector<8x648xf32>,
    %c0_24 = arith.constant 0 : index
    %c38 = arith.constant 38 : index
    %22 = vector.load %arg0[%c0_24, %c38] : memref<8x686xf32, #tpu.memory_space<vmem>>, vector<8x648xf32>
    %c64 = arith.constant 64 : index
    %c0_25 = arith.constant 0 : index
    %23 = vector.load %arg8[%c64, %c0_25] : memref<80x648xf32, #tpu.memory_space<vmem>>, vector<8x648xf32>
    tpu.vector_store %arg8[%c64, %c0_25], %22 {strides = array<i32>} : memref<80x648xf32, #tpu.memory_space<vmem>>, vector<8x648xf32>,
    %c0_26 = arith.constant 0 : index
    %c0_27 = arith.constant 0 : index
    %c0_28 = arith.constant 0 : index
    %24 = vector.load %arg1[%c0_26, %c0_27, %c0_28] : memref<5x8x80xbf16, #tpu.memory_space<vmem>>, vector<1x8x80xbf16>
    %25 = vector.shape_cast %24 : vector<1x8x80xbf16> to vector<8x80xbf16>
    %c0_29 = arith.constant 0 : index
    %c0_30 = arith.constant 0 : index
    %26 = vector.load %arg8[%c0_29, %c0_30] : memref<80x648xf32, #tpu.memory_space<vmem>>, vector<80x648xf32>
    %27 = arith.truncf %26 : vector<80x648xf32> to vector<80x648xbf16>
    %cst_31 = arith.constant dense<0.000000e+00> : vector<8x648xf32>
    %28 = tpu.matmul %25, %27, %cst_31 {dimension_numbers = #tpu.dot_dimension_numbers<[1], [0], [0], [1], [0, 0, 1, 1], [], []>} : vector<8x80xbf16>, vector<80x648xbf16>, vector<8x648xf32> -> vector<8x648xf32>
    %cst_32 = arith.constant 0.000000e+00 : f32
    %29 = vector.broadcast %cst_32 : f32 to vector<8x648xf32>
    %30 = arith.cmpf oge, %28, %29 : vector<8x648xf32>
    %cst_33 = arith.constant 2.000000e-01 : f32
    %31 = vector.broadcast %cst_33 : f32 to vector<8x648xf32>
    %32 = arith.mulf %31, %28 : vector<8x648xf32>
    %33 = arith.select %30, %28, %32 : vector<8x648xi1>, vector<8x648xf32>
    %34 = arith.truncf %33 : vector<8x648xf32> to vector<8x648xbf16>
    %35 = vector.extract_strided_slice %34 {offsets = [0, 0], sizes = [8, 324], strides = [1, 1]} : vector<8x648xbf16> to vector<8x324xbf16>
    %c0_34 = arith.constant 0 : index
    %c0_35 = arith.constant 0 : index
    %36 = vector.load %arg2[%c0_34, %c0_35] : memref<324x121xbf16, #tpu.memory_space<vmem>>, vector<324x121xbf16>
    %cst_36 = arith.constant dense<0.000000e+00> : vector<8x121xf32>
    %37 = tpu.matmul %35, %36, %cst_36 {dimension_numbers = #tpu.dot_dimension_numbers<[1], [0], [0], [1], [0, 0, 1, 1], [], []>} : vector<8x324xbf16>, vector<324x121xbf16>, vector<8x121xf32> -> vector<8x121xf32>
    %c0_37 = arith.constant 0 : index
    %c12 = arith.constant 12 : index
    %38 = vector.load %arg7[%c0_37, %c12] : memref<8x686xf32, #tpu.memory_space<vmem>>, vector<8x121xf32>
    tpu.vector_store %arg7[%c0_37, %c12], %37 {strides = array<i32>} : memref<8x686xf32, #tpu.memory_space<vmem>>, vector<8x121xf32>,
    %39 = vector.extract_strided_slice %34 {offsets = [0, 324], sizes = [8, 324], strides = [1, 1]} : vector<8x648xbf16> to vector<8x324xbf16>
    %c0_38 = arith.constant 0 : index
    %c0_39 = arith.constant 0 : index
    %40 = vector.load %arg2[%c0_38, %c0_39] : memref<324x121xbf16, #tpu.memory_space<vmem>>, vector<324x121xbf16>
    %cst_40 = arith.constant dense<0.000000e+00> : vector<8x121xf32>
    %41 = tpu.matmul %39, %40, %cst_40 {dimension_numbers = #tpu.dot_dimension_numbers<[1], [0], [0], [1], [0, 0, 1, 1], [], []>} : vector<8x324xbf16>, vector<324x121xbf16>, vector<8x121xf32> -> vector<8x121xf32>
    %c0_41 = arith.constant 0 : index
    %c133 = arith.constant 133 : index
    %42 = vector.load %arg7[%c0_41, %c133] : memref<8x686xf32, #tpu.memory_space<vmem>>, vector<8x121xf32>
    tpu.vector_store %arg7[%c0_41, %c133], %41 {strides = array<i32>} : memref<8x686xf32, #tpu.memory_space<vmem>>, vector<8x121xf32>,
    %c0_42 = arith.constant 0 : index
    %c0_43 = arith.constant 0 : index
    %43 = vector.load %arg7[%c0_42, %c0_43] : memref<8x686xf32, #tpu.memory_space<vmem>>, vector<8x242xf32>
    %c0_44 = arith.constant 0 : index
    %c0_45 = arith.constant 0 : index
    %44 = vector.load %arg8[%c0_44, %c0_45] : memref<80x648xf32, #tpu.memory_space<vmem>>, vector<8x242xf32>
    tpu.vector_store %arg8[%c0_44, %c0_45], %43 {strides = array<i32>} : memref<80x648xf32, #tpu.memory_space<vmem>>, vector<8x242xf32>,
    %c0_46 = arith.constant 0 : index
    %c1_47 = arith.constant 1 : index
    %45 = vector.load %arg7[%c0_46, %c1_47] : memref<8x686xf32, #tpu.memory_space<vmem>>, vector<8x242xf32>
    %c8_48 = arith.constant 8 : index
    %c0_49 = arith.constant 0 : index
    %46 = vector.load %arg8[%c8_48, %c0_49] : memref<80x648xf32, #tpu.memory_space<vmem>>, vector<8x242xf32>
    tpu.vector_store %arg8[%c8_48, %c0_49], %45 {strides = array<i32>} : memref<80x648xf32, #tpu.memory_space<vmem>>, vector<8x242xf32>,
    %c0_50 = arith.constant 0 : index
    %c2_51 = arith.constant 2 : index
    %47 = vector.load %arg7[%c0_50, %c2_51] : memref<8x686xf32, #tpu.memory_space<vmem>>, vector<8x242xf32>
    %c16_52 = arith.constant 16 : index
    %c0_53 = arith.constant 0 : index
    %48 = vector.load %arg8[%c16_52, %c0_53] : memref<80x648xf32, #tpu.memory_space<vmem>>, vector<8x242xf32>
    tpu.vector_store %arg8[%c16_52, %c0_53], %47 {strides = array<i32>} : memref<80x648xf32, #tpu.memory_space<vmem>>, vector<8x242xf32>,
    %c0_54 = arith.constant 0 : index
    %c11 = arith.constant 11 : index
    %49 = vector.load %arg7[%c0_54, %c11] : memref<8x686xf32, #tpu.memory_space<vmem>>, vector<8x242xf32>
    %c24_55 = arith.constant 24 : index
    %c0_56 = arith.constant 0 : index
    %50 = vector.load %arg8[%c24_55, %c0_56] : memref<80x648xf32, #tpu.memory_space<vmem>>, vector<8x242xf32>
    tpu.vector_store %arg8[%c24_55, %c0_56], %49 {strides = array<i32>} : memref<80x648xf32, #tpu.memory_space<vmem>>, vector<8x242xf32>,
    %c0_57 = arith.constant 0 : index
    %c12_58 = arith.constant 12 : index
    %51 = vector.load %arg7[%c0_57, %c12_58] : memref<8x686xf32, #tpu.memory_space<vmem>>, vector<8x242xf32>
    %c32_59 = arith.constant 32 : index
    %c0_60 = arith.constant 0 : index
    %52 = vector.load %arg8[%c32_59, %c0_60] : memref<80x648xf32, #tpu.memory_space<vmem>>, vector<8x242xf32>
    tpu.vector_store %arg8[%c32_59, %c0_60], %51 {strides = array<i32>} : memref<80x648xf32, #tpu.memory_space<vmem>>, vector<8x242xf32>,
    %c0_61 = arith.constant 0 : index
    %c13 = arith.constant 13 : index
    %53 = vector.load %arg7[%c0_61, %c13] : memref<8x686xf32, #tpu.memory_space<vmem>>, vector<8x242xf32>
    %c40_62 = arith.constant 40 : index
    %c0_63 = arith.constant 0 : index
    %54 = vector.load %arg8[%c40_62, %c0_63] : memref<80x648xf32, #tpu.memory_space<vmem>>, vector<8x242xf32>
    tpu.vector_store %arg8[%c40_62, %c0_63], %53 {strides = array<i32>} : memref<80x648xf32, #tpu.memory_space<vmem>>, vector<8x242xf32>,
    %c0_64 = arith.constant 0 : index
    %c22 = arith.constant 22 : index
    %55 = vector.load %arg7[%c0_64, %c22] : memref<8x686xf32, #tpu.memory_space<vmem>>, vector<8x242xf32>
    %c48_65 = arith.constant 48 : index
    %c0_66 = arith.constant 0 : index
    %56 = vector.load %arg8[%c48_65, %c0_66] : memref<80x648xf32, #tpu.memory_space<vmem>>, vector<8x242xf32>
    tpu.vector_store %arg8[%c48_65, %c0_66], %55 {strides = array<i32>} : memref<80x648xf32, #tpu.memory_space<vmem>>, vector<8x242xf32>,
    %c0_67 = arith.constant 0 : index
    %c23 = arith.constant 23 : index
    %57 = vector.load %arg7[%c0_67, %c23] : memref<8x686xf32, #tpu.memory_space<vmem>>, vector<8x242xf32>
    %c56_68 = arith.constant 56 : index
    %c0_69 = arith.constant 0 : index
    %58 = vector.load %arg8[%c56_68, %c0_69] : memref<80x648xf32, #tpu.memory_space<vmem>>, vector<8x242xf32>
    tpu.vector_store %arg8[%c56_68, %c0_69], %57 {strides = array<i32>} : memref<80x648xf32, #tpu.memory_space<vmem>>, vector<8x242xf32>,
    %c0_70 = arith.constant 0 : index
    %c24_71 = arith.constant 24 : index
    %59 = vector.load %arg7[%c0_70, %c24_71] : memref<8x686xf32, #tpu.memory_space<vmem>>, vector<8x242xf32>
    %c64_72 = arith.constant 64 : index
    %c0_73 = arith.constant 0 : index
    %60 = vector.load %arg8[%c64_72, %c0_73] : memref<80x648xf32, #tpu.memory_space<vmem>>, vector<8x242xf32>
    tpu.vector_store %arg8[%c64_72, %c0_73], %59 {strides = array<i32>} : memref<80x648xf32, #tpu.memory_space<vmem>>, vector<8x242xf32>,
    %c1_74 = arith.constant 1 : index
    %c0_75 = arith.constant 0 : index
    %c0_76 = arith.constant 0 : index
    %61 = vector.load %arg1[%c1_74, %c0_75, %c0_76] : memref<5x8x80xbf16, #tpu.memory_space<vmem>>, vector<1x8x80xbf16>
    %62 = vector.shape_cast %61 : vector<1x8x80xbf16> to vector<8x80xbf16>
    %c0_77 = arith.constant 0 : index
    %c0_78 = arith.constant 0 : index
    %63 = vector.load %arg8[%c0_77, %c0_78] : memref<80x648xf32, #tpu.memory_space<vmem>>, vector<80x242xf32>
    %64 = arith.truncf %63 : vector<80x242xf32> to vector<80x242xbf16>
    %cst_79 = arith.constant dense<0.000000e+00> : vector<8x242xf32>
    %65 = tpu.matmul %62, %64, %cst_79 {dimension_numbers = #tpu.dot_dimension_numbers<[1], [0], [0], [1], [0, 0, 1, 1], [], []>} : vector<8x80xbf16>, vector<80x242xbf16>, vector<8x242xf32> -> vector<8x242xf32>
    %cst_80 = arith.constant 0.000000e+00 : f32
    %66 = vector.broadcast %cst_80 : f32 to vector<8x242xf32>
    %67 = arith.cmpf oge, %65, %66 : vector<8x242xf32>
    %cst_81 = arith.constant 2.000000e-01 : f32
    %68 = vector.broadcast %cst_81 : f32 to vector<8x242xf32>
    %69 = arith.mulf %68, %65 : vector<8x242xf32>
    %70 = arith.select %67, %65, %69 : vector<8x242xi1>, vector<8x242xf32>
    %71 = arith.truncf %70 : vector<8x242xf32> to vector<8x242xbf16>
    %72 = vector.extract_strided_slice %71 {offsets = [0, 0], sizes = [8, 121], strides = [1, 1]} : vector<8x242xbf16> to vector<8x121xbf16>
    %c0_82 = arith.constant 0 : index
    %c0_83 = arith.constant 0 : index
    %73 = vector.load %arg3[%c0_82, %c0_83] : memref<121x36xbf16, #tpu.memory_space<vmem>>, vector<121x36xbf16>
    %cst_84 = arith.constant dense<0.000000e+00> : vector<8x36xf32>
    %74 = tpu.matmul %72, %73, %cst_84 {dimension_numbers = #tpu.dot_dimension_numbers<[1], [0], [0], [1], [0, 0, 1, 1], [], []>} : vector<8x121xbf16>, vector<121x36xbf16>, vector<8x36xf32> -> vector<8x36xf32>
    %c0_85 = arith.constant 0 : index
    %c7 = arith.constant 7 : index
    %75 = vector.load %arg7[%c0_85, %c7] : memref<8x686xf32, #tpu.memory_space<vmem>>, vector<8x36xf32>
    tpu.vector_store %arg7[%c0_85, %c7], %74 {strides = array<i32>} : memref<8x686xf32, #tpu.memory_space<vmem>>, vector<8x36xf32>,
    %76 = vector.extract_strided_slice %71 {offsets = [0, 121], sizes = [8, 121], strides = [1, 1]} : vector<8x242xbf16> to vector<8x121xbf16>
    %c0_86 = arith.constant 0 : index
    %c0_87 = arith.constant 0 : index
    %77 = vector.load %arg3[%c0_86, %c0_87] : memref<121x36xbf16, #tpu.memory_space<vmem>>, vector<121x36xbf16>
    %cst_88 = arith.constant dense<0.000000e+00> : vector<8x36xf32>
    %78 = tpu.matmul %76, %77, %cst_88 {dimension_numbers = #tpu.dot_dimension_numbers<[1], [0], [0], [1], [0, 0, 1, 1], [], []>} : vector<8x121xbf16>, vector<121x36xbf16>, vector<8x36xf32> -> vector<8x36xf32>
    %c0_89 = arith.constant 0 : index
    %c43 = arith.constant 43 : index
    %79 = vector.load %arg7[%c0_89, %c43] : memref<8x686xf32, #tpu.memory_space<vmem>>, vector<8x36xf32>
    tpu.vector_store %arg7[%c0_89, %c43], %78 {strides = array<i32>} : memref<8x686xf32, #tpu.memory_space<vmem>>, vector<8x36xf32>,
    %c0_90 = arith.constant 0 : index
    %c0_91 = arith.constant 0 : index
    %80 = vector.load %arg7[%c0_90, %c0_91] : memref<8x686xf32, #tpu.memory_space<vmem>>, vector<8x72xf32>
    %c0_92 = arith.constant 0 : index
    %c0_93 = arith.constant 0 : index
    %81 = vector.load %arg8[%c0_92, %c0_93] : memref<80x648xf32, #tpu.memory_space<vmem>>, vector<8x72xf32>
    tpu.vector_store %arg8[%c0_92, %c0_93], %80 {strides = array<i32>} : memref<80x648xf32, #tpu.memory_space<vmem>>, vector<8x72xf32>,
    %c0_94 = arith.constant 0 : index
    %c1_95 = arith.constant 1 : index
    %82 = vector.load %arg7[%c0_94, %c1_95] : memref<8x686xf32, #tpu.memory_space<vmem>>, vector<8x72xf32>
    %c8_96 = arith.constant 8 : index
    %c0_97 = arith.constant 0 : index
    %83 = vector.load %arg8[%c8_96, %c0_97] : memref<80x648xf32, #tpu.memory_space<vmem>>, vector<8x72xf32>
    tpu.vector_store %arg8[%c8_96, %c0_97], %82 {strides = array<i32>} : memref<80x648xf32, #tpu.memory_space<vmem>>, vector<8x72xf32>,
    %c0_98 = arith.constant 0 : index
    %c2_99 = arith.constant 2 : index
    %84 = vector.load %arg7[%c0_98, %c2_99] : memref<8x686xf32, #tpu.memory_space<vmem>>, vector<8x72xf32>
    %c16_100 = arith.constant 16 : index
    %c0_101 = arith.constant 0 : index
    %85 = vector.load %arg8[%c16_100, %c0_101] : memref<80x648xf32, #tpu.memory_space<vmem>>, vector<8x72xf32>
    tpu.vector_store %arg8[%c16_100, %c0_101], %84 {strides = array<i32>} : memref<80x648xf32, #tpu.memory_space<vmem>>, vector<8x72xf32>,
    %c0_102 = arith.constant 0 : index
    %c6 = arith.constant 6 : index
    %86 = vector.load %arg7[%c0_102, %c6] : memref<8x686xf32, #tpu.memory_space<vmem>>, vector<8x72xf32>
    %c24_103 = arith.constant 24 : index
    %c0_104 = arith.constant 0 : index
    %87 = vector.load %arg8[%c24_103, %c0_104] : memref<80x648xf32, #tpu.memory_space<vmem>>, vector<8x72xf32>
    tpu.vector_store %arg8[%c24_103, %c0_104], %86 {strides = array<i32>} : memref<80x648xf32, #tpu.memory_space<vmem>>, vector<8x72xf32>,
    %c0_105 = arith.constant 0 : index
    %c7_106 = arith.constant 7 : index
    %88 = vector.load %arg7[%c0_105, %c7_106] : memref<8x686xf32, #tpu.memory_space<vmem>>, vector<8x72xf32>
    %c32_107 = arith.constant 32 : index
    %c0_108 = arith.constant 0 : index
    %89 = vector.load %arg8[%c32_107, %c0_108] : memref<80x648xf32, #tpu.memory_space<vmem>>, vector<8x72xf32>
    tpu.vector_store %arg8[%c32_107, %c0_108], %88 {strides = array<i32>} : memref<80x648xf32, #tpu.memory_space<vmem>>, vector<8x72xf32>,
    %c0_109 = arith.constant 0 : index
    %c8_110 = arith.constant 8 : index
    %90 = vector.load %arg7[%c0_109, %c8_110] : memref<8x686xf32, #tpu.memory_space<vmem>>, vector<8x72xf32>
    %c40_111 = arith.constant 40 : index
    %c0_112 = arith.constant 0 : index
    %91 = vector.load %arg8[%c40_111, %c0_112] : memref<80x648xf32, #tpu.memory_space<vmem>>, vector<8x72xf32>
    tpu.vector_store %arg8[%c40_111, %c0_112], %90 {strides = array<i32>} : memref<80x648xf32, #tpu.memory_space<vmem>>, vector<8x72xf32>,
    %c0_113 = arith.constant 0 : index
    %c12_114 = arith.constant 12 : index
    %92 = vector.load %arg7[%c0_113, %c12_114] : memref<8x686xf32, #tpu.memory_space<vmem>>, vector<8x72xf32>
    %c48_115 = arith.constant 48 : index
    %c0_116 = arith.constant 0 : index
    %93 = vector.load %arg8[%c48_115, %c0_116] : memref<80x648xf32, #tpu.memory_space<vmem>>, vector<8x72xf32>
    tpu.vector_store %arg8[%c48_115, %c0_116], %92 {strides = array<i32>} : memref<80x648xf32, #tpu.memory_space<vmem>>, vector<8x72xf32>,
    %c0_117 = arith.constant 0 : index
    %c13_118 = arith.constant 13 : index
    %94 = vector.load %arg7[%c0_117, %c13_118] : memref<8x686xf32, #tpu.memory_space<vmem>>, vector<8x72xf32>
    %c56_119 = arith.constant 56 : index
    %c0_120 = arith.constant 0 : index
    %95 = vector.load %arg8[%c56_119, %c0_120] : memref<80x648xf32, #tpu.memory_space<vmem>>, vector<8x72xf32>
    tpu.vector_store %arg8[%c56_119, %c0_120], %94 {strides = array<i32>} : memref<80x648xf32, #tpu.memory_space<vmem>>, vector<8x72xf32>,
    %c0_121 = arith.constant 0 : index
    %c14 = arith.constant 14 : index
    %96 = vector.load %arg7[%c0_121, %c14] : memref<8x686xf32, #tpu.memory_space<vmem>>, vector<8x72xf32>
    %c64_122 = arith.constant 64 : index
    %c0_123 = arith.constant 0 : index
    %97 = vector.load %arg8[%c64_122, %c0_123] : memref<80x648xf32, #tpu.memory_space<vmem>>, vector<8x72xf32>
    tpu.vector_store %arg8[%c64_122, %c0_123], %96 {strides = array<i32>} : memref<80x648xf32, #tpu.memory_space<vmem>>, vector<8x72xf32>,
    %c2_124 = arith.constant 2 : index
    %c0_125 = arith.constant 0 : index
    %c0_126 = arith.constant 0 : index
    %98 = vector.load %arg1[%c2_124, %c0_125, %c0_126] : memref<5x8x80xbf16, #tpu.memory_space<vmem>>, vector<1x8x80xbf16>
    %99 = vector.shape_cast %98 : vector<1x8x80xbf16> to vector<8x80xbf16>
    %c0_127 = arith.constant 0 : index
    %c0_128 = arith.constant 0 : index
    %100 = vector.load %arg8[%c0_127, %c0_128] : memref<80x648xf32, #tpu.memory_space<vmem>>, vector<80x72xf32>
    %101 = arith.truncf %100 : vector<80x72xf32> to vector<80x72xbf16>
    %cst_129 = arith.constant dense<0.000000e+00> : vector<8x72xf32>
    %102 = tpu.matmul %99, %101, %cst_129 {dimension_numbers = #tpu.dot_dimension_numbers<[1], [0], [0], [1], [0, 0, 1, 1], [], []>} : vector<8x80xbf16>, vector<80x72xbf16>, vector<8x72xf32> -> vector<8x72xf32>
    %cst_130 = arith.constant 0.000000e+00 : f32
    %103 = vector.broadcast %cst_130 : f32 to vector<8x72xf32>
    %104 = arith.cmpf oge, %102, %103 : vector<8x72xf32>
    %cst_131 = arith.constant 2.000000e-01 : f32
    %105 = vector.broadcast %cst_131 : f32 to vector<8x72xf32>
    %106 = arith.mulf %105, %102 : vector<8x72xf32>
    %107 = arith.select %104, %102, %106 : vector<8x72xi1>, vector<8x72xf32>
    %108 = arith.truncf %107 : vector<8x72xf32> to vector<8x72xbf16>
    %109 = vector.extract_strided_slice %108 {offsets = [0, 0], sizes = [8, 36], strides = [1, 1]} : vector<8x72xbf16> to vector<8x36xbf16>
    %c0_132 = arith.constant 0 : index
    %c0_133 = arith.constant 0 : index
    %110 = vector.load %arg4[%c0_132, %c0_133] : memref<36x100xbf16, #tpu.memory_space<vmem>>, vector<36x100xbf16>
    %cst_134 = arith.constant dense<0.000000e+00> : vector<8x100xf32>
    %111 = tpu.matmul %109, %110, %cst_134 {dimension_numbers = #tpu.dot_dimension_numbers<[1], [0], [0], [1], [0, 0, 1, 1], [], []>} : vector<8x36xbf16>, vector<36x100xbf16>, vector<8x100xf32> -> vector<8x100xf32>
    %c0_135 = arith.constant 0 : index
    %c11_136 = arith.constant 11 : index
    %112 = vector.load %arg7[%c0_135, %c11_136] : memref<8x686xf32, #tpu.memory_space<vmem>>, vector<8x100xf32>
    tpu.vector_store %arg7[%c0_135, %c11_136], %111 {strides = array<i32>} : memref<8x686xf32, #tpu.memory_space<vmem>>, vector<8x100xf32>,
    %113 = vector.extract_strided_slice %108 {offsets = [0, 36], sizes = [8, 36], strides = [1, 1]} : vector<8x72xbf16> to vector<8x36xbf16>
    %c0_137 = arith.constant 0 : index
    %c0_138 = arith.constant 0 : index
    %114 = vector.load %arg4[%c0_137, %c0_138] : memref<36x100xbf16, #tpu.memory_space<vmem>>, vector<36x100xbf16>
    %cst_139 = arith.constant dense<0.000000e+00> : vector<8x100xf32>
    %115 = tpu.matmul %113, %114, %cst_139 {dimension_numbers = #tpu.dot_dimension_numbers<[1], [0], [0], [1], [0, 0, 1, 1], [], []>} : vector<8x36xbf16>, vector<36x100xbf16>, vector<8x100xf32> -> vector<8x100xf32>
    %c0_140 = arith.constant 0 : index
    %c111 = arith.constant 111 : index
    %116 = vector.load %arg7[%c0_140, %c111] : memref<8x686xf32, #tpu.memory_space<vmem>>, vector<8x100xf32>
    tpu.vector_store %arg7[%c0_140, %c111], %115 {strides = array<i32>} : memref<8x686xf32, #tpu.memory_space<vmem>>, vector<8x100xf32>,
    %c0_141 = arith.constant 0 : index
    %c0_142 = arith.constant 0 : index
    %117 = vector.load %arg7[%c0_141, %c0_142] : memref<8x686xf32, #tpu.memory_space<vmem>>, vector<8x200xf32>
    %c0_143 = arith.constant 0 : index
    %c0_144 = arith.constant 0 : index
    %118 = vector.load %arg8[%c0_143, %c0_144] : memref<80x648xf32, #tpu.memory_space<vmem>>, vector<8x200xf32>
    tpu.vector_store %arg8[%c0_143, %c0_144], %117 {strides = array<i32>} : memref<80x648xf32, #tpu.memory_space<vmem>>, vector<8x200xf32>,
    %c0_145 = arith.constant 0 : index
    %c1_146 = arith.constant 1 : index
    %119 = vector.load %arg7[%c0_145, %c1_146] : memref<8x686xf32, #tpu.memory_space<vmem>>, vector<8x200xf32>
    %c8_147 = arith.constant 8 : index
    %c0_148 = arith.constant 0 : index
    %120 = vector.load %arg8[%c8_147, %c0_148] : memref<80x648xf32, #tpu.memory_space<vmem>>, vector<8x200xf32>
    tpu.vector_store %arg8[%c8_147, %c0_148], %119 {strides = array<i32>} : memref<80x648xf32, #tpu.memory_space<vmem>>, vector<8x200xf32>,
    %c0_149 = arith.constant 0 : index
    %c2_150 = arith.constant 2 : index
    %121 = vector.load %arg7[%c0_149, %c2_150] : memref<8x686xf32, #tpu.memory_space<vmem>>, vector<8x200xf32>
    %c16_151 = arith.constant 16 : index
    %c0_152 = arith.constant 0 : index
    %122 = vector.load %arg8[%c16_151, %c0_152] : memref<80x648xf32, #tpu.memory_space<vmem>>, vector<8x200xf32>
    tpu.vector_store %arg8[%c16_151, %c0_152], %121 {strides = array<i32>} : memref<80x648xf32, #tpu.memory_space<vmem>>, vector<8x200xf32>,
    %c0_153 = arith.constant 0 : index
    %c10 = arith.constant 10 : index
    %123 = vector.load %arg7[%c0_153, %c10] : memref<8x686xf32, #tpu.memory_space<vmem>>, vector<8x200xf32>
    %c24_154 = arith.constant 24 : index
    %c0_155 = arith.constant 0 : index
    %124 = vector.load %arg8[%c24_154, %c0_155] : memref<80x648xf32, #tpu.memory_space<vmem>>, vector<8x200xf32>
    tpu.vector_store %arg8[%c24_154, %c0_155], %123 {strides = array<i32>} : memref<80x648xf32, #tpu.memory_space<vmem>>, vector<8x200xf32>,
    %c0_156 = arith.constant 0 : index
    %c11_157 = arith.constant 11 : index
    %125 = vector.load %arg7[%c0_156, %c11_157] : memref<8x686xf32, #tpu.memory_space<vmem>>, vector<8x200xf32>
    %c32_158 = arith.constant 32 : index
    %c0_159 = arith.constant 0 : index
    %126 = vector.load %arg8[%c32_158, %c0_159] : memref<80x648xf32, #tpu.memory_space<vmem>>, vector<8x200xf32>
    tpu.vector_store %arg8[%c32_158, %c0_159], %125 {strides = array<i32>} : memref<80x648xf32, #tpu.memory_space<vmem>>, vector<8x200xf32>,
    %c0_160 = arith.constant 0 : index
    %c12_161 = arith.constant 12 : index
    %127 = vector.load %arg7[%c0_160, %c12_161] : memref<8x686xf32, #tpu.memory_space<vmem>>, vector<8x200xf32>
    %c40_162 = arith.constant 40 : index
    %c0_163 = arith.constant 0 : index
    %128 = vector.load %arg8[%c40_162, %c0_163] : memref<80x648xf32, #tpu.memory_space<vmem>>, vector<8x200xf32>
    tpu.vector_store %arg8[%c40_162, %c0_163], %127 {strides = array<i32>} : memref<80x648xf32, #tpu.memory_space<vmem>>, vector<8x200xf32>,
    %c0_164 = arith.constant 0 : index
    %c20_165 = arith.constant 20 : index
    %129 = vector.load %arg7[%c0_164, %c20_165] : memref<8x686xf32, #tpu.memory_space<vmem>>, vector<8x200xf32>
    %c48_166 = arith.constant 48 : index
    %c0_167 = arith.constant 0 : index
    %130 = vector.load %arg8[%c48_166, %c0_167] : memref<80x648xf32, #tpu.memory_space<vmem>>, vector<8x200xf32>
    tpu.vector_store %arg8[%c48_166, %c0_167], %129 {strides = array<i32>} : memref<80x648xf32, #tpu.memory_space<vmem>>, vector<8x200xf32>,
    %c0_168 = arith.constant 0 : index
    %c21 = arith.constant 21 : index
    %131 = vector.load %arg7[%c0_168, %c21] : memref<8x686xf32, #tpu.memory_space<vmem>>, vector<8x200xf32>
    %c56_169 = arith.constant 56 : index
    %c0_170 = arith.constant 0 : index
    %132 = vector.load %arg8[%c56_169, %c0_170] : memref<80x648xf32, #tpu.memory_space<vmem>>, vector<8x200xf32>
    tpu.vector_store %arg8[%c56_169, %c0_170], %131 {strides = array<i32>} : memref<80x648xf32, #tpu.memory_space<vmem>>, vector<8x200xf32>,
    %c0_171 = arith.constant 0 : index
    %c22_172 = arith.constant 22 : index
    %133 = vector.load %arg7[%c0_171, %c22_172] : memref<8x686xf32, #tpu.memory_space<vmem>>, vector<8x200xf32>
    %c64_173 = arith.constant 64 : index
    %c0_174 = arith.constant 0 : index
    %134 = vector.load %arg8[%c64_173, %c0_174] : memref<80x648xf32, #tpu.memory_space<vmem>>, vector<8x200xf32>
    tpu.vector_store %arg8[%c64_173, %c0_174], %133 {strides = array<i32>} : memref<80x648xf32, #tpu.memory_space<vmem>>, vector<8x200xf32>,
    %c3 = arith.constant 3 : index
    %c0_175 = arith.constant 0 : index
    %c0_176 = arith.constant 0 : index
    %135 = vector.load %arg1[%c3, %c0_175, %c0_176] : memref<5x8x80xbf16, #tpu.memory_space<vmem>>, vector<1x8x80xbf16>
    %136 = vector.shape_cast %135 : vector<1x8x80xbf16> to vector<8x80xbf16>
    %c0_177 = arith.constant 0 : index
    %c0_178 = arith.constant 0 : index
    %137 = vector.load %arg8[%c0_177, %c0_178] : memref<80x648xf32, #tpu.memory_space<vmem>>, vector<80x200xf32>
    %138 = arith.truncf %137 : vector<80x200xf32> to vector<80x200xbf16>
    %cst_179 = arith.constant dense<0.000000e+00> : vector<8x200xf32>
    %139 = tpu.matmul %136, %138, %cst_179 {dimension_numbers = #tpu.dot_dimension_numbers<[1], [0], [0], [1], [0, 0, 1, 1], [], []>} : vector<8x80xbf16>, vector<80x200xbf16>, vector<8x200xf32> -> vector<8x200xf32>
    %cst_180 = arith.constant 0.000000e+00 : f32
    %140 = vector.broadcast %cst_180 : f32 to vector<8x200xf32>
    %141 = arith.cmpf oge, %139, %140 : vector<8x200xf32>
    %cst_181 = arith.constant 2.000000e-01 : f32
    %142 = vector.broadcast %cst_181 : f32 to vector<8x200xf32>
    %143 = arith.mulf %142, %139 : vector<8x200xf32>
    %144 = arith.select %141, %139, %143 : vector<8x200xi1>, vector<8x200xf32>
    %145 = arith.truncf %144 : vector<8x200xf32> to vector<8x200xbf16>
    %146 = vector.extract_strided_slice %145 {offsets = [0, 0], sizes = [8, 100], strides = [1, 1]} : vector<8x200xbf16> to vector<8x100xbf16>
    %c0_182 = arith.constant 0 : index
    %c0_183 = arith.constant 0 : index
    %147 = vector.load %arg5[%c0_182, %c0_183] : memref<100x324xbf16, #tpu.memory_space<vmem>>, vector<100x324xbf16>
    %cst_184 = arith.constant dense<0.000000e+00> : vector<8x324xf32>
    %148 = tpu.matmul %146, %147, %cst_184 {dimension_numbers = #tpu.dot_dimension_numbers<[1], [0], [0], [1], [0, 0, 1, 1], [], []>} : vector<8x100xbf16>, vector<100x324xbf16>, vector<8x324xf32> -> vector<8x324xf32>
    %c0_185 = arith.constant 0 : index
    %c19_186 = arith.constant 19 : index
    %149 = vector.load %arg7[%c0_185, %c19_186] : memref<8x686xf32, #tpu.memory_space<vmem>>, vector<8x324xf32>
    tpu.vector_store %arg7[%c0_185, %c19_186], %148 {strides = array<i32>} : memref<8x686xf32, #tpu.memory_space<vmem>>, vector<8x324xf32>,
    %150 = vector.extract_strided_slice %145 {offsets = [0, 100], sizes = [8, 100], strides = [1, 1]} : vector<8x200xbf16> to vector<8x100xbf16>
    %c0_187 = arith.constant 0 : index
    %c0_188 = arith.constant 0 : index
    %151 = vector.load %arg5[%c0_187, %c0_188] : memref<100x324xbf16, #tpu.memory_space<vmem>>, vector<100x324xbf16>
    %cst_189 = arith.constant dense<0.000000e+00> : vector<8x324xf32>
    %152 = tpu.matmul %150, %151, %cst_189 {dimension_numbers = #tpu.dot_dimension_numbers<[1], [0], [0], [1], [0, 0, 1, 1], [], []>} : vector<8x100xbf16>, vector<100x324xbf16>, vector<8x324xf32> -> vector<8x324xf32>
    %c0_190 = arith.constant 0 : index
    %c343 = arith.constant 343 : index
    %153 = vector.load %arg7[%c0_190, %c343] : memref<8x686xf32, #tpu.memory_space<vmem>>, vector<8x324xf32>
    tpu.vector_store %arg7[%c0_190, %c343], %152 {strides = array<i32>} : memref<8x686xf32, #tpu.memory_space<vmem>>, vector<8x324xf32>,
    %c0_191 = arith.constant 0 : index
    %c0_192 = arith.constant 0 : index
    %154 = vector.load %arg7[%c0_191, %c0_192] : memref<8x686xf32, #tpu.memory_space<vmem>>, vector<8x648xf32>
    %c0_193 = arith.constant 0 : index
    %c0_194 = arith.constant 0 : index
    %155 = vector.load %arg8[%c0_193, %c0_194] : memref<80x648xf32, #tpu.memory_space<vmem>>, vector<8x648xf32>
    tpu.vector_store %arg8[%c0_193, %c0_194], %154 {strides = array<i32>} : memref<80x648xf32, #tpu.memory_space<vmem>>, vector<8x648xf32>,
    %c0_195 = arith.constant 0 : index
    %c1_196 = arith.constant 1 : index
    %156 = vector.load %arg7[%c0_195, %c1_196] : memref<8x686xf32, #tpu.memory_space<vmem>>, vector<8x648xf32>
    %c8_197 = arith.constant 8 : index
    %c0_198 = arith.constant 0 : index
    %157 = vector.load %arg8[%c8_197, %c0_198] : memref<80x648xf32, #tpu.memory_space<vmem>>, vector<8x648xf32>
    tpu.vector_store %arg8[%c8_197, %c0_198], %156 {strides = array<i32>} : memref<80x648xf32, #tpu.memory_space<vmem>>, vector<8x648xf32>,
    %c0_199 = arith.constant 0 : index
    %c2_200 = arith.constant 2 : index
    %158 = vector.load %arg7[%c0_199, %c2_200] : memref<8x686xf32, #tpu.memory_space<vmem>>, vector<8x648xf32>
    %c16_201 = arith.constant 16 : index
    %c0_202 = arith.constant 0 : index
    %159 = vector.load %arg8[%c16_201, %c0_202] : memref<80x648xf32, #tpu.memory_space<vmem>>, vector<8x648xf32>
    tpu.vector_store %arg8[%c16_201, %c0_202], %158 {strides = array<i32>} : memref<80x648xf32, #tpu.memory_space<vmem>>, vector<8x648xf32>,
    %c0_203 = arith.constant 0 : index
    %c18_204 = arith.constant 18 : index
    %160 = vector.load %arg7[%c0_203, %c18_204] : memref<8x686xf32, #tpu.memory_space<vmem>>, vector<8x648xf32>
    %c24_205 = arith.constant 24 : index
    %c0_206 = arith.constant 0 : index
    %161 = vector.load %arg8[%c24_205, %c0_206] : memref<80x648xf32, #tpu.memory_space<vmem>>, vector<8x648xf32>
    tpu.vector_store %arg8[%c24_205, %c0_206], %160 {strides = array<i32>} : memref<80x648xf32, #tpu.memory_space<vmem>>, vector<8x648xf32>,
    %c0_207 = arith.constant 0 : index
    %c19_208 = arith.constant 19 : index
    %162 = vector.load %arg7[%c0_207, %c19_208] : memref<8x686xf32, #tpu.memory_space<vmem>>, vector<8x648xf32>
    %c32_209 = arith.constant 32 : index
    %c0_210 = arith.constant 0 : index
    %163 = vector.load %arg8[%c32_209, %c0_210] : memref<80x648xf32, #tpu.memory_space<vmem>>, vector<8x648xf32>
    tpu.vector_store %arg8[%c32_209, %c0_210], %162 {strides = array<i32>} : memref<80x648xf32, #tpu.memory_space<vmem>>, vector<8x648xf32>,
    %c0_211 = arith.constant 0 : index
    %c20_212 = arith.constant 20 : index
    %164 = vector.load %arg7[%c0_211, %c20_212] : memref<8x686xf32, #tpu.memory_space<vmem>>, vector<8x648xf32>
    %c40_213 = arith.constant 40 : index
    %c0_214 = arith.constant 0 : index
    %165 = vector.load %arg8[%c40_213, %c0_214] : memref<80x648xf32, #tpu.memory_space<vmem>>, vector<8x648xf32>
    tpu.vector_store %arg8[%c40_213, %c0_214], %164 {strides = array<i32>} : memref<80x648xf32, #tpu.memory_space<vmem>>, vector<8x648xf32>,
    %c0_215 = arith.constant 0 : index
    %c36_216 = arith.constant 36 : index
    %166 = vector.load %arg7[%c0_215, %c36_216] : memref<8x686xf32, #tpu.memory_space<vmem>>, vector<8x648xf32>
    %c48_217 = arith.constant 48 : index
    %c0_218 = arith.constant 0 : index
    %167 = vector.load %arg8[%c48_217, %c0_218] : memref<80x648xf32, #tpu.memory_space<vmem>>, vector<8x648xf32>
    tpu.vector_store %arg8[%c48_217, %c0_218], %166 {strides = array<i32>} : memref<80x648xf32, #tpu.memory_space<vmem>>, vector<8x648xf32>,
    %c0_219 = arith.constant 0 : index
    %c37_220 = arith.constant 37 : index
    %168 = vector.load %arg7[%c0_219, %c37_220] : memref<8x686xf32, #tpu.memory_space<vmem>>, vector<8x648xf32>
    %c56_221 = arith.constant 56 : index
    %c0_222 = arith.constant 0 : index
    %169 = vector.load %arg8[%c56_221, %c0_222] : memref<80x648xf32, #tpu.memory_space<vmem>>, vector<8x648xf32>
    tpu.vector_store %arg8[%c56_221, %c0_222], %168 {strides = array<i32>} : memref<80x648xf32, #tpu.memory_space<vmem>>, vector<8x648xf32>,
    %c0_223 = arith.constant 0 : index
    %c38_224 = arith.constant 38 : index
    %170 = vector.load %arg7[%c0_223, %c38_224] : memref<8x686xf32, #tpu.memory_space<vmem>>, vector<8x648xf32>
    %c64_225 = arith.constant 64 : index
    %c0_226 = arith.constant 0 : index
    %171 = vector.load %arg8[%c64_225, %c0_226] : memref<80x648xf32, #tpu.memory_space<vmem>>, vector<8x648xf32>
    tpu.vector_store %arg8[%c64_225, %c0_226], %170 {strides = array<i32>} : memref<80x648xf32, #tpu.memory_space<vmem>>, vector<8x648xf32>,
    %c4 = arith.constant 4 : index
    %c0_227 = arith.constant 0 : index
    %c0_228 = arith.constant 0 : index
    %172 = vector.load %arg1[%c4, %c0_227, %c0_228] : memref<5x8x80xbf16, #tpu.memory_space<vmem>>, vector<1x8x80xbf16>
    %173 = vector.shape_cast %172 : vector<1x8x80xbf16> to vector<8x80xbf16>
    %c0_229 = arith.constant 0 : index
    %c0_230 = arith.constant 0 : index
    %174 = vector.load %arg8[%c0_229, %c0_230] : memref<80x648xf32, #tpu.memory_space<vmem>>, vector<80x648xf32>
    %175 = arith.truncf %174 : vector<80x648xf32> to vector<80x648xbf16>
    %cst_231 = arith.constant dense<0.000000e+00> : vector<8x648xf32>
    %176 = tpu.matmul %173, %175, %cst_231 {dimension_numbers = #tpu.dot_dimension_numbers<[1], [0], [0], [1], [0, 0, 1, 1], [], []>} : vector<8x80xbf16>, vector<80x648xbf16>, vector<8x648xf32> -> vector<8x648xf32>
    %c0_232 = arith.constant 0 : index
    %c0_233 = arith.constant 0 : index
    %177 = vector.load %arg6[%c0_232, %c0_233] : memref<8x648xf32, #tpu.memory_space<vmem>>, vector<8x648xf32>
    tpu.vector_store %arg6[%c0_232, %c0_233], %176 {strides = array<i32>} : memref<8x648xf32, #tpu.memory_space<vmem>>, vector<8x648xf32>,
    return
  }
}

</mosaic_0001>

<bundles_post_ra>
// kernel: squeeze.3
= control target key start
LH: loop header
LB: loop body
LE: loop exit
PB: predicated region body
PF: predicated region fallthrough
CT: control target
= control target key end

     0   :  { %s386_s10 = smov 114   ;;  %s387_s11 = smov 118   ;;  %vm213_vm0 = vcmask 965632   ;;  %vm227_vm1 = vcmask 982016   ;;  %vm255_vm2 = vcmask 1014784   ;;  %vm241_vm3 = vcmask 998400   ;;  %s708_s0 = inlined_call_operand.vmem [shape: f32[648], index: 0, kind: input, shape index: {}]   ;;  %s709_s1 = inlined_call_operand.vmem [shape: f32[2,18,18], index: 1, kind: output, shape index: {}]  }
   0x1   :  { %v282_v0 = vld [vmem:[%s708_s0 + $0x2] sm:$0x1]   ;;  %v278_v1 = vld [vmem:[%s708_s0 + $0x4] sm:$0x1]   ;;  %v33_v2 = vld [vmem:[%s708_s0] sm:$0x1]  }
   0x2   :  { %21 = vrot.lane.b32.xlu1 %v282_v0, %s386_s10  ;;  %7 = vrot.lane.b32.xlu0 %v278_v1, %s387_s11  ;;  %s388_s14 = smov 110   ;;  %v284_v3 = vld [vmem:[%s708_s0 + $0x1] sm:$0x1]   ;;  %v280_v4 = vld [vmem:[%s708_s0 + $0x3] sm:$0x1]   ;;  %s389_s19 = smov 112  }
   0x3   :  { %34 = vrot.lane.b32.xlu2 %v33_v2, %s388_s14  ;;  %s390_s20 = smov 116   ;;  %v287_v5 = vld [vmem:[%s708_s0 + $0x4] sm:$0x1]   ;;  %s391_s23 = smov 100   ;;  %v291_v6 = vld [vmem:[%s708_s0 + $0x2] sm:$0x1]  }
   0x4   :  { %v289_v7 = vld [vmem:[%s708_s0 + $0x3] sm:$0x1]   ;;  %s392_s28 = smov 96   ;;  %s393_s29 = smov 98   ;;  %v293_v8 = vld [vmem:[%s708_s0 + $0x1] sm:$0x1]  }
   0x5   :  { %s394_s3 = smov 94   ;;  %v296_v9 = vld [vmem:[%s708_s0 + $0x4] sm:$0x1]   ;;  %v67_v10 = vld [vmem:[%s708_s0] sm:$0x1]   ;;  %s395_s8 = smov 82  }
   0x6   :  { %s396_s9 = smov 92   ;;  %v298_v11 = vld [vmem:[%s708_s0 + $0x3] sm:$0x1]   ;;  %s397_s12 = smov 80   ;;  %v302_v12 = vld [vmem:[%s708_s0 + $0x1] sm:$0x1]  }
   0x7   :  { %v300_v13 = vld [vmem:[%s708_s0 + $0x2] sm:$0x1]   ;;  %s398_s17 = smov 76   ;;  %s399_s18 = smov 78   ;;  %v101_v14 = vld [vmem:[%s708_s0] sm:$0x1]  }
   0x8   :  { %s400_s21 = smov 74   ;;  %v307_v15 = vld [vmem:[%s708_s0 + $0x3] sm:$0x1]   ;;  %v305_v16 = vld [vmem:[%s708_s0 + $0x4] sm:$0x1]   ;;  %s401_s26 = smov 62  }
   0x9   :  { %s402_s27 = smov 64   ;;  %v309_v17 = vld [vmem:[%s708_s0 + $0x2] sm:$0x1]   ;;  %s403_s30 = smov 60   ;;  %v135_v18 = vld [vmem:[%s708_s0] sm:$0x1]  }
   0xa   :  { %28 = vrot.lane.b32.xlu1 %v284_v3, %s389_s19  ;;  %14 = vrot.lane.b32.xlu0 %v280_v4, %s390_s20  ;;  %v311_v19 = vld [vmem:[%s708_s0 + $0x1] sm:$0x1]   ;;  %s404_s6 = smov 56   ;;  %s405_s7 = smov 58   ;;  %v314_v20 = vld [vmem:[%s708_s0 + $0x4] sm:$0x1]  }
   0xb   :  { %41 = vrot.lane.b32.xlu2 %v287_v5, %s391_s23  ;;  %v332_v21 = vld [vmem:[%s708_s0 + $0x4] sm:$0x1]   ;;  %v333_v22 = vld [vmem:[%s708_s0 + $0x5] sm:$0x1]   ;;  %s406_s14 = smov 46   ;;  %s408_s22 = smov 44  }
   0xc   :  { %v214_v23 = vsel %vm213_vm0, %v333_v22, %v332_v21  ;;  %v316_v24 = vld [vmem:[%s708_s0 + $0x3] sm:$0x1]   ;;  %v337_v26 = vld [vmem:[%s708_s0 + $0x4] sm:$0x1]   ;;  %v344_v27 = vld [vmem:[%s708_s0 + $0x1] sm:$0x1]  }
   0xd   :  { %v336_v25 = vld [vmem:[%s708_s0 + $0x3] sm:$0x1]   ;;  %v345_v28 = vld [vmem:[%s708_s0 + $0x2] sm:$0x1]   ;;  %s409_s2 = smov 8   ;;  %vm268_vm4 = vcmask 1031168  }
   0xe   :  { %v228_v29 = vsel %vm227_vm1, %v337_v26, %v336_v25  ;;  %v340_v30 = vld [vmem:[%s708_s0 + $0x2] sm:$0x1]   ;;  %v341_v31 = vld [vmem:[%s708_s0 + $0x3] sm:$0x1]   ;;  %v256_v32 = vsel %vm255_vm2, %v345_v28, %v344_v27  ;;  %v265_v34 = vld [vmem:[%s708_s0] sm:$0x1]  }
   0xf   :  { %v242_v33 = vsel %vm241_vm3, %v341_v31, %v340_v30  ;;  %v348_v35 = vld [vmem:[%s708_s0 + $0x1] sm:$0x1]   ;;  %v318_v38 = vld [vmem:[%s708_s0 + $0x2] sm:$0x1]   ;;  %s414_s15 = smov 42   ;;  %s416_s23 = smov 26  }
  0x10   :  { %v269_v36 = vsel %vm268_vm4, %v348_v35, %v265_v34  ;;  %v320_v37 = vld [vmem:[%s708_s0 + $0x1] sm:$0x1]   ;;  %v169_v39 = vld [vmem:[%s708_s0] sm:$0x1]   ;;  %v325_v40 = vld [vmem:[%s708_s0 + $0x3] sm:$0x1]  }
  0x11   :  { %v323_v41 = vld [vmem:[%s708_s0 + $0x4] sm:$0x1]   ;;  %s417_s24 = smov 28   ;;  %v327_v42 = vld [vmem:[%s708_s0 + $0x2] sm:$0x1]   ;;  %s420_s4 = smov 22  }
  0x12   :  { %55 = vrot.lane.b32.xlu1 %v291_v6, %s392_s28  ;;  %48 = vrot.lane.b32.xlu0 %v289_v7, %s393_s29  ;;  %v203_v43 = vld [vmem:[%s708_s0] sm:$0x1]   ;;  %v329_v44 = vld [vmem:[%s708_s0 + $0x1] sm:$0x1]   ;;  %vm3_vm5 = vcmask 146432   ;;  %vm231_vm6 = vcmask 64512  }
  0x13   :  { %62 = vrot.lane.b32.xlu2 %v293_v8, %s394_s3  ;;  %s419_s3 = smov 20   ;;  %vm234_vm7 = vcmask 146496   ;;  %vm272_vm8 = vcmask 15360   ;;  %vm275_vm9 = vcmask 146448   ;;  %vm217_vm10 = vcmask 80896  }
  0x14   :  { %vm220_vm11 = vcmask 146512   ;;  %v2_v7 = vld [vmem:[%s708_s0] sm:$0x1]   ;;  %vm259_vm12 = vcmask 31744   ;;  %vm262_vm13 = vcmask 146464   ;;  %vm245_vm14 = vcmask 48128  }
  0x15   :  { %4 = vst.msk [vmem:[%s709_s1] sm:$0x1] %vm3_vm5, %v2_v7   ;;  %vm248_vm15 = vcmask 146480  }
  0x1a   :  { %75 = vrot.lane.b32.xlu1 %v296_v9, %s395_s8  ;;  %68 = vrot.lane.b32.xlu0 %v67_v10, %s396_s9  ;;  %s411_s8 = smov 6   ;;  %s412_s9 = smov 2  }
  0x1b   :  { %82 = vrot.lane.b32.xlu2 %v298_v11, %s397_s12 }
  0x22   :  { %96 = vrot.lane.b32.xlu1 %v302_v12, %s398_s17  ;;  %89 = vrot.lane.b32.xlu0 %v300_v13, %s399_s18  ;;  %s415_s18 = smov 38  }
  0x23   :  { %102 = vrot.lane.b32.xlu2 %v101_v14, %s400_s21  ;;  %s407_s21 = smov 10  }
  0x2a   :  { %116 = vrot.lane.b32.xlu1 %v307_v15, %s401_s26  ;;  %109 = vrot.lane.b32.xlu0 %v305_v16, %s402_s27  ;;  %s418_s27 = smov 24  }
  0x2b   :  { %123 = vrot.lane.b32.xlu2 %v309_v17, %s403_s30 }
  0x32   :  { %136 = vrot.lane.b32.xlu1 %v135_v18, %s404_s6  ;;  %130 = vrot.lane.b32.xlu0 %v311_v19, %s405_s7  ;;  %s410_s7 = smov 4  }
  0x33   :  { %143 = vrot.lane.b32.xlu2 %v314_v20, %s406_s14  ;;  %s413_s14 = smov 40  }
  0x3a   :  { %215 = vrot.lane.b32.xlu1 %v214_v23, %s407_s21  ;;  %150 = vrot.lane.b32.xlu0 %v316_v24, %s408_s22 }
  0x3b   :  { %229 = vrot.lane.b32.xlu2 %v228_v29, %s409_s2 }
  0x42   :  { %257 = vrot.lane.b32.xlu1 %v256_v32, %s410_s7  ;;  %243 = vrot.lane.b32.xlu0 %v242_v33, %s411_s8 }
  0x43   :  { %270 = vrot.lane.b32.xlu2 %v269_v36, %s412_s9 }
  0x4a   :  { %164 = vrot.lane.b32.xlu1 %v320_v37, %s413_s14  ;;  %157 = vrot.lane.b32.xlu0 %v318_v38, %s414_s15 }
  0x4b   :  { %170 = vrot.lane.b32.xlu2 %v169_v39, %s415_s18 }
  0x52   :  { %184 = vrot.lane.b32.xlu1 %v325_v40, %s416_s23  ;;  %177 = vrot.lane.b32.xlu0 %v323_v41, %s417_s24 }
  0x53   :  { %191 = vrot.lane.b32.xlu2 %v327_v42, %s418_s27 }
  0x5a   :  { %204 = vrot.lane.b32.xlu1 %v203_v43, %s419_s3  ;;  %198 = vrot.lane.b32.xlu0 %v329_v44, %s420_s4 }
  0x5d   :  { %v35_v45 = vpop.permute.xlu2 %34  }
  0x5e   :  { %286 = vst.msk [vmem:[%s709_s1 + $0x1] sm:$0x1] %vm3_vm5, %v35_v45  }
  0x65   :  { %v42_v46 = vpop.permute.xlu2 %41  }
  0x66   :  { %288 = vst.msk [vmem:[%s709_s1 + $0x24] sm:$0x1] %vm3_vm5, %v42_v46  }
  0x6d   :  { %v63_v47 = vpop.permute.xlu2 %62  }
  0x6e   :  { %294 = vst.msk [vmem:[%s709_s1 + $0x9] sm:$0x1] %vm3_vm5, %v63_v47  }
  0x74   :  { %v22_v48 = vpop.permute.xlu1 %21   ;;  %v8_v49 = vpop.permute.xlu0 %7  }
  0x75   :  { %283 = vst.msk [vmem:[%s709_s1 + $0xf] sm:$0x1] %vm3_vm5, %v22_v48   ;;  %v83_v50 = vpop.permute.xlu2 %82  }
  0x76   :  { %279 = vst.msk [vmem:[%s709_s1 + $0x23] sm:$0x1] %vm3_vm5, %v8_v49  }
  0x77   :  { %299 = vst.msk [vmem:[%s709_s1 + $0x1e] sm:$0x1] %vm3_vm5, %v83_v50  }
  0x7c   :  { %v29_v51 = vpop.permute.xlu1 %28   ;;  %v15_v52 = vpop.permute.xlu0 %14  }
  0x7d   :  { %285 = vst.msk [vmem:[%s709_s1 + $0x8] sm:$0x1] %vm3_vm5, %v29_v51   ;;  %v103_v53 = vpop.permute.xlu2 %102  }
  0x7e   :  { %281 = vst.msk [vmem:[%s709_s1 + $0x1c] sm:$0x1] %vm3_vm5, %v15_v52  }
  0x7f   :  { %304 = vst.msk [vmem:[%s709_s1 + $0x3] sm:$0x1] %vm3_vm5, %v103_v53  }
  0x84   :  { %v56_v54 = vpop.permute.xlu1 %55   ;;  %v49_v55 = vpop.permute.xlu0 %48  }
  0x85   :  { %292 = vst.msk [vmem:[%s709_s1 + $0x10] sm:$0x1] %vm3_vm5, %v56_v54   ;;  %v124_v56 = vpop.permute.xlu2 %123  }
  0x86   :  { %290 = vst.msk [vmem:[%s709_s1 + $0x1d] sm:$0x1] %vm3_vm5, %v49_v55  }
  0x87   :  { %310 = vst.msk [vmem:[%s709_s1 + $0x18] sm:$0x1] %vm3_vm5, %v124_v56  }
  0x8c   :  { %v76_v57 = vpop.permute.xlu1 %75   ;;  %v69_v58 = vpop.permute.xlu0 %68  }
  0x8d   :  { %297 = vst.msk [vmem:[%s709_s1 + $0x25] sm:$0x1] %vm3_vm5, %v76_v57   ;;  %v144_v59 = vpop.permute.xlu2 %143  }
  0x8e   :  { %295 = vst.msk [vmem:[%s709_s1 + $0x2] sm:$0x1] %vm3_vm5, %v69_v58  }
  0x8f   :  { %315 = vst.msk [vmem:[%s709_s1 + $0x27] sm:$0x1] %vm3_vm5, %v144_v59  }
  0x94   :  { %v97_v60 = vpop.permute.xlu1 %96   ;;  %v90_v61 = vpop.permute.xlu0 %89  }
  0x95   :  { %303 = vst.msk [vmem:[%s709_s1 + $0xa] sm:$0x1] %vm3_vm5, %v97_v60   ;;  %v230_v62 = vpop.permute.xlu2 %229  }
  0x96   :  { %301 = vst.msk [vmem:[%s709_s1 + $0x11] sm:$0x1] %vm3_vm5, %v90_v61  }
  0x97   :  { %338 = vst.msk [vmem:[%s709_s1 + $0x22] sm:$0x1] %vm231_vm6, %v230_v62  }
  0x98   :  { %339 = vst.msk [vmem:[%s709_s1 + $0x22] sm:$0x1] %vm234_vm7, %v230_v62  }
  0x9c   :  { %v117_v63 = vpop.permute.xlu1 %116   ;;  %v110_v0 = vpop.permute.xlu0 %109  }
  0x9d   :  { %308 = vst.msk [vmem:[%s709_s1 + $0x1f] sm:$0x1] %vm3_vm5, %v117_v63   ;;  %v271_v1 = vpop.permute.xlu2 %270  }
  0x9e   :  { %306 = vst.msk [vmem:[%s709_s1 + $0x26] sm:$0x1] %vm3_vm5, %v110_v0  }
  0x9f   :  { %349 = vst.msk [vmem:[%s709_s1 + $0x7] sm:$0x1] %vm272_vm8, %v271_v1  }
  0xa0   :  { %350 = vst.msk [vmem:[%s709_s1 + $0x7] sm:$0x1] %vm275_vm9, %v271_v1  }
  0xa4   :  { %v137_v2 = vpop.permute.xlu1 %136   ;;  %v131_v3 = vpop.permute.xlu0 %130  }
  0xa5   :  { %313 = vst.msk [vmem:[%s709_s1 + $0x4] sm:$0x1] %vm3_vm5, %v137_v2   ;;  %v171_v4 = vpop.permute.xlu2 %170  }
  0xa6   :  { %312 = vst.msk [vmem:[%s709_s1 + $0xb] sm:$0x1] %vm3_vm5, %v131_v3  }
  0xa7   :  { %322 = vst.msk [vmem:[%s709_s1 + $0x5] sm:$0x1] %vm3_vm5, %v171_v4  }
  0xac   :  { %v216_v5 = vpop.permute.xlu1 %215   ;;  %v151_v6 = vpop.permute.xlu0 %150  }
  0xad   :  { %334 = vst.msk [vmem:[%s709_s1 + $0x29] sm:$0x1] %vm217_vm10, %v216_v5   ;;  %v192_v8 = vpop.permute.xlu2 %191  }
  0xae   :  { %335 = vst.msk [vmem:[%s709_s1 + $0x29] sm:$0x1] %vm220_vm11, %v216_v5  }
  0xaf   :  { %317 = vst.msk [vmem:[%s709_s1 + $0x20] sm:$0x1] %vm3_vm5, %v151_v6  }
  0xb0   :  { %328 = vst.msk [vmem:[%s709_s1 + $0x1a] sm:$0x1] %vm3_vm5, %v192_v8  }
  0xb4   :  { %v258_v9 = vpop.permute.xlu1 %257   ;;  %v244_v10 = vpop.permute.xlu0 %243  }
  0xb5   :  { %346 = vst.msk [vmem:[%s709_s1 + $0xe] sm:$0x1] %vm259_vm12, %v258_v9  }
  0xb6   :  { %347 = vst.msk [vmem:[%s709_s1 + $0xe] sm:$0x1] %vm262_vm13, %v258_v9  }
  0xb7   :  { %342 = vst.msk [vmem:[%s709_s1 + $0x1b] sm:$0x1] %vm245_vm14, %v244_v10  }
  0xb8   :  { %343 = vst.msk [vmem:[%s709_s1 + $0x1b] sm:$0x1] %vm248_vm15, %v244_v10  }
  0xbc   :  { %v165_v11 = vpop.permute.xlu1 %164   ;;  %v158_v12 = vpop.permute.xlu0 %157  }
  0xbd   :  { %321 = vst.msk [vmem:[%s709_s1 + $0xc] sm:$0x1] %vm3_vm5, %v165_v11  }
  0xbe   :  { %319 = vst.msk [vmem:[%s709_s1 + $0x19] sm:$0x1] %vm3_vm5, %v158_v12  }
  0xc4   :  { %v185_v13 = vpop.permute.xlu1 %184   ;;  %v178_v14 = vpop.permute.xlu0 %177  }
  0xc5   :  { %326 = vst.msk [vmem:[%s709_s1 + $0x21] sm:$0x1] %vm3_vm5, %v185_v13  }
  0xc6   :  { %324 = vst.msk [vmem:[%s709_s1 + $0x28] sm:$0x1] %vm3_vm5, %v178_v14  }
  0xcc   :  { %v205_v15 = vpop.permute.xlu1 %204   ;;  %v199_v16 = vpop.permute.xlu0 %198  }
  0xcd   :  { %331 = vst.msk [vmem:[%s709_s1 + $0x6] sm:$0x1] %vm3_vm5, %v205_v15  }
  0xce   :  { %330 = vst.msk [vmem:[%s709_s1 + $0xd] sm:$0x1] %vm3_vm5, %v199_v16  }

// kernel: forward.1
= control target key start
LH: loop header
LB: loop body
LE: loop exit
PB: predicated region body
PF: predicated region fallthrough
CT: control target
= control target key end

     0   :  { %11 = vsyncpa [#allocation5], 0  ;;  %s4338_s0 = inlined_call_operand.vmem [shape: f32[8,686], index: 0, kind: input, shape index: {}]   ;;  %s4339_s1 = inlined_call_operand.vmem [shape: bf16[5,8,80], index: 1, kind: input, shape index: {}]   ;;  %s4340_s2 = inlined_call_operand.vmem [shape: bf16[324,121], index: 2, kind: input, shape index: {}]   ;;  %s4341_s3 = inlined_call_operand.hbm [shape: bf16[121,36], index: 3, kind: input, shape index: {}]   ;;  %s4342_s4 = inlined_call_operand.vmem [shape: bf16[36,100], index: 4, kind: input, shape index: {}]   ;;  %s4343_s5 = inlined_call_operand.hbm [shape: bf16[100,324], index: 5, kind: input, shape index: {}]   ;;  %s4344_s6 = inlined_call_operand.vmem [shape: f32[8,648], index: 6, kind: output, shape index: {}]  }
   0x1   :  { %s23_s23 = sshll.u32 %s4341_s3, 4  ;;  %s24_s23 = int_to_ptr.hbm [resolvable:$true] %s23_s23 }
   0x2   :  { %12 = vsyncpa [#allocation7], 0  ;;  %s3435_s24 = smov [#allocation4]   ;;  %s38_s28 = sshll.u32 %s4343_s5, 4  ;;  %s39_s28 = int_to_ptr.hbm [resolvable:$true] %s38_s28 }
   0x3   :  { %s25_s25 = sshll.u32 %s3435_s24, 4  ;;  %s3436_s29 = smov 64   ;;  %s26_s25 = int_to_ptr.vmem [resolvable:$true] %s25_s25 }
   0x4   :  { %s3437_s30 = smov 4   ;;  %s3438_s7 = smov [#allocation6]  }
   0x5   :  { %31 = dma.hbm_to_vmem [thread:$0]  %s24_s23, 1024, %s26_s25, [#allocation5], %s3436_s29, %s3436_s29, %s3437_s30  }
   0x6   :  { %s40_s8 = sshll.u32 %s3438_s7, 4  ;;  %s3439_s9 = smov 192   ;;  %s41_s8 = int_to_ptr.vmem [resolvable:$true] %s40_s8 }
   0x7   :  { %s3440_s10 = smov 12  }
   0x8   :  { %46 = dma.hbm_to_vmem [thread:$0]  %s39_s28, 2496, %s41_s8, [#allocation7], %s3439_s9, %s3439_s9, %s3440_s10  }
   0x9   :  { %3431 = dma.done.wait [#allocation5], 1024  }
   0xa   :  { %3432 = vsyncadd [#allocation5], 4294966272 }
   0xb   :  { %3433 = dma.done.wait [#allocation7], 2496  }
   0xc   :  { %3434 = vsyncadd [#allocation7], 4294964800  ;;  %v3518_v0 = vld [vmem:[%s4338_s0 + $0x10] sm:$0xff]  ;;  %v3523_v1 = vld [vmem:[%s4338_s0] sm:$0xff]  ;;  %s3441_s15 = smov 90   ;;  %s3442_s16 = smov 92   ;;  %v117_v7 = vlaneseq }
   0xd   :  { %v3528_v2 = vld [vmem:[%s4338_s0 + $0x8] sm:$0xff]  ;;  %453 = vrot.lane.b32.xlu1 %v3518_v0, %s3441_s15  ;;  %449 = vrot.lane.b32.xlu0 %v3523_v1, %s3441_s15  ;;  %s3443_s17 = smov 91   ;;  %s3444_s18 = smov 109   ;;  %v3564_v3 = vld [vmem:[%s4338_s0 + $0x20] sm:$0xff]  ;;  %v3448_v5 = vmov 0.0   ;;  %v3450_v9 = vmov 1.0  }
   0xe   :  { %138 = vst [vmem:[#allocation3 + $0x8] sm:$0xff] %v3528_v2  ;;  %367 = vrot.lane.b32.xlu2 %v3528_v2, %s3442_s16  ;;  %s3445_s19 = smov 108   ;;  %v3569_v4 = vld [vmem:[%s4338_s0 + $0x18] sm:$0xff]  ;;  %s3446_s24 = smov 126   ;;  %v3612_v6 = vld [vmem:[%s4338_s0 + $0x28] sm:$0xff]  ;;  %vm3620_vm0 = vcmp.lt.s32.totalorder %v117_v7, 648 }
   0xf   :  { %s3447_s25 = smov 110   ;;  %111 = vst [vmem:[#allocation3 + $0x1b0] sm:$0xff] %v3448_v5  ;;  %s3449_s26 = smov 127   ;;  %vm4346_vm1 = vcmask 752640   ;;  %vm461_vm2 = vcmask 736256   ;;  %vm419_vm3 = vcmask 744448  }
  0x10   :  { %112 = vst [vmem:[#allocation3 + $0x1b8] sm:$0xff] %v3448_v5  ;;  %vm4347_vm4 = vcmask 891904   ;;  %vm335_vm5 = vcmask 883712   ;;  %vm61_vm6 = vcmask 64512   ;;  %vm209_vm7 = vcmask 1031168   ;;  %s3451_s22 = smov 60  }
  0x11   :  { %113 = vst [vmem:[#allocation3 + $0x1c0] sm:$0xff] %v3448_v5  ;;  %vm4345_vm8 = vcmask 900096   ;;  %vm167_vm9 = vcmask 1039360   ;;  %vm570_vm10 = vcmask 654336   ;;  %vm851_vm11 = vcmask 1041408   ;;  %s3454_s23 = smov 5  }
  0x12   :  { %114 = vst [vmem:[#allocation3 + $0x1c8] sm:$0xff] %v3448_v5  ;;  %s3455_s27 = smov 105   ;;  %s3456_s28 = smov 116  }
  0x13   :  { %115 = vst [vmem:[#allocation3 + $0x1d0] sm:$0xff] %v3448_v5  ;;  %s3457_s0 = smov 117   ;;  %s3458_s29 = smov 115  }
  0x14   :  { %124 = vst [vmem:[#allocation2] sm:$0xff] %v3448_v5  ;;  %s3460_s8 = smov 7   ;;  %s3461_s9 = smov 43  }
  0x15   :  { %451 = vrot.lane.b32.xlu0 %v3528_v2, %s3441_s15  ;;  %365 = vrot.lane.b32.xlu1 %v3523_v1, %s3442_s16  ;;  %125 = vst [vmem:[#allocation2 + $0x8] sm:$0xff] %v3448_v5  ;;  %s3462_s3 = smov 114   ;;  %s3463_s11 = smov 121  }
  0x16   :  { %369 = vrot.lane.b32.xlu2 %v3518_v0, %s3442_s16  ;;  %126 = vst [vmem:[#allocation2 + $0x10] sm:$0xff] %v3448_v5  ;;  %s3464_s5 = smov 120   ;;  %s3465_s12 = smov 122  }
  0x17   :  { %122 = vst.msk [vmem:[#allocation3 + $0x1b0] ss:$8 sm:$0xf] %vm3620_vm0, %v3450_v9  ;;  %s3471_s13 = smov 19   ;;  %s3472_s14 = smov 87  }
  0x18   :  { %98 = vst.msk [vmem:[#allocation3 + $0x148] sm:$0xff] %vm61_vm6, %v3448_v5 }
  0x19   :  { %62 = vst.msk [vmem:[#allocation3 + $0x28] sm:$0xff] %vm61_vm6, %v3448_v5 }
  0x1a   :  { %68 = vst.msk [vmem:[#allocation3 + $0x58] sm:$0xff] %vm61_vm6, %v3448_v5 }
  0x1b   :  { %74 = vst.msk [vmem:[#allocation3 + $0x88] sm:$0xff] %vm61_vm6, %v3448_v5 }
  0x1c   :  { %80 = vst.msk [vmem:[#allocation3 + $0xb8] sm:$0xff] %vm61_vm6, %v3448_v5 }
  0x1d   :  { %407 = vrot.lane.b32.xlu0 %v3523_v1, %s3443_s17  ;;  %409 = vrot.lane.b32.xlu1 %v3528_v2, %s3443_s17  ;;  %86 = vst.msk [vmem:[#allocation3 + $0xe8] sm:$0xff] %vm61_vm6, %v3448_v5 }
  0x1e   :  { %411 = vrot.lane.b32.xlu2 %v3518_v0, %s3443_s17  ;;  %v534_v17 = vld [vmem:[#allocation3 + $0x1b0] sm:$0xff]  ;;  %v535_v18 = vld [vmem:[#allocation3 + $0x1b8] sm:$0xff]  ;;  %v536_v46 = vld [vmem:[#allocation3 + $0x1c0] sm:$0xff]  ;;  %92 = vst.msk [vmem:[#allocation3 + $0x118] sm:$0xff] %vm61_vm6, %v3448_v5 }
  0x1f   :  { %v537_v47 = vld [vmem:[#allocation3 + $0x1c8] sm:$0xff]  ;;  %104 = vst.msk [vmem:[#allocation3 + $0x178] sm:$0xff] %vm61_vm6, %v3448_v5 }
  0x20   :  { %110 = vst.msk [vmem:[#allocation3 + $0x1a8] sm:$0xff] %vm61_vm6, %v3448_v5 }
  0x21   :  { %116 = vst.msk [vmem:[#allocation3 + $0x1d8] sm:$0xff] %vm61_vm6, %v3448_v5 }
  0x22   :  { %123 = vst.msk [vmem:[#allocation3 + $0x1b0] ss:$8 sm:$0x30] %vm3620_vm0, %v3450_v9  ;;  %vm847_vm0 = vcmask 556032  }
  0x23   :  { %142 = vst.msk [vmem:[#allocation3 + $0x28] sm:$0xff] %vm61_vm6, %v3612_v6 }
  0x25   :  { %283 = vrot.lane.b32.xlu1 %v3528_v2, %s3444_s18  ;;  %281 = vrot.lane.b32.xlu0 %v3523_v1, %s3444_s18 }
  0x26   :  { %285 = vrot.lane.b32.xlu2 %v3518_v0, %s3444_s18 }
  0x2d   :  { %325 = vrot.lane.b32.xlu1 %v3528_v2, %s3445_s19  ;;  %323 = vrot.lane.b32.xlu0 %v3523_v1, %s3445_s19 }
  0x2e   :  { %327 = vrot.lane.b32.xlu2 %v3518_v0, %s3445_s19 }
  0x35   :  { %457 = vrot.lane.b32.xlu1 %v3564_v3, %s3441_s15  ;;  %455 = vrot.lane.b32.xlu0 %v3569_v4, %s3441_s15 }
  0x36   :  { %197 = vrot.lane.b32.xlu2 %v3523_v1, %s3446_s24 }
  0x3d   :  { %201 = vrot.lane.b32.xlu1 %v3518_v0, %s3446_s24  ;;  %199 = vrot.lane.b32.xlu0 %v3528_v2, %s3446_s24 }
  0x3e   :  { %239 = vrot.lane.b32.xlu2 %v3523_v1, %s3447_s25 }
  0x45   :  { %243 = vrot.lane.b32.xlu1 %v3518_v0, %s3447_s25  ;;  %241 = vrot.lane.b32.xlu0 %v3528_v2, %s3447_s25 }
  0x46   :  { %371 = vrot.lane.b32.xlu2 %v3569_v4, %s3442_s16 }
  0x4d   :  { %413 = vrot.lane.b32.xlu1 %v3569_v4, %s3443_s17  ;;  %373 = vrot.lane.b32.xlu0 %v3564_v3, %s3442_s16 }
  0x4e   :  { %415 = vrot.lane.b32.xlu2 %v3564_v3, %s3443_s17 }
  0x55   :  { %157 = vrot.lane.b32.xlu1 %v3528_v2, %s3449_s26  ;;  %155 = vrot.lane.b32.xlu0 %v3523_v1, %s3449_s26 }
  0x56   :  { %159 = vrot.lane.b32.xlu2 %v3518_v0, %s3449_s26 }
  0x5d   :  { %287 = vrot.lane.b32.xlu1 %v3569_v4, %s3444_s18  ;;  %459 = vrot.lane.b32.xlu0 %v3612_v6, %s3441_s15 }
  0x5e   :  { %289 = vrot.lane.b32.xlu2 %v3564_v3, %s3444_s18 }
  0x65   :  { %331 = vrot.lane.b32.xlu1 %v3564_v3, %s3445_s19  ;;  %329 = vrot.lane.b32.xlu0 %v3569_v4, %s3445_s19 }
  0x66   :  { %375 = vrot.lane.b32.xlu2 %v3612_v6, %s3442_s16 }
  0x68   :  { %v368_v10 = vpop.permute.xlu2 %367 }
  0x6d   :  { %203 = vrot.lane.b32.xlu1 %v3569_v4, %s3446_s24  ;;  %417 = vrot.lane.b32.xlu0 %v3612_v6, %s3443_s17 }
  0x6e   :  { %205 = vrot.lane.b32.xlu2 %v3564_v3, %s3446_s24 }
  0x70   :  { %v3639_v11 = vpop.permute.xlu2 %369 }
  0x71   :  { %v379_v12 = vsel %vm4346_vm1, %v368_v10, %v3639_v11 }
  0x72   :  { %390 = vst [vmem:[#allocation3 + $0x128] sm:$0xff] %v379_v12 }
  0x75   :  { %247 = vrot.lane.b32.xlu1 %v3564_v3, %s3447_s25  ;;  %245 = vrot.lane.b32.xlu0 %v3569_v4, %s3447_s25 }
  0x76   :  { %291 = vrot.lane.b32.xlu2 %v3612_v6, %s3444_s18 }
  0x78   :  { %v3649_v13 = vpop.permute.xlu2 %411 }
  0x7d   :  { %161 = vrot.lane.b32.xlu1 %v3569_v4, %s3449_s26  ;;  %333 = vrot.lane.b32.xlu0 %v3612_v6, %s3445_s19 }
  0x7e   :  { %163 = vrot.lane.b32.xlu2 %v3564_v3, %s3449_s26 }
  0x7f   :  { %v454_v14 = vpop.permute.xlu1 %453  ;;  %v450_v15 = vpop.permute.xlu0 %449 }
  0x80   :  { %v3657_v16 = vpop.permute.xlu2 %285 }
  0x85   :  { %249 = vrot.lane.b32.xlu1 %v3612_v6, %s3447_s25  ;;  %207 = vrot.lane.b32.xlu0 %v3612_v6, %s3446_s24 }
  0x86   :  { %165 = vrot.lane.b32.xlu2 %v3612_v6, %s3449_s26 }
  0x87   :  { %v452_v19 = vpop.permute.xlu0 %451  ;;  %v366_v20 = vpop.permute.xlu1 %365 }
  0x88   :  { %v462_v21 = vsel %vm461_vm2, %v450_v15, %v452_v19  ;;  %v463_v22 = vsel %vm461_vm2, %v452_v19, %v454_v14  ;;  %v3667_v23 = vpop.permute.xlu2 %327  ;;  %v378_v28 = vsel %vm4346_vm1, %v366_v20, %v368_v10 }
  0x89   :  { %474 = vst [vmem:[#allocation3 + $0x188] sm:$0xff] %v463_v22  ;;  %v564_v24 = vpack.c.bf16 %v534_v17, %v462_v21  ;;  %v565_v25 = vpack.c.bf16 %v535_v18, %v463_v22 }
  0x8b   :  { %577 = vmatpush.bf16.msra.mxu0 %v564_v24  ;;  %590 = vmatpush.bf16.msra.mxu1 %v565_v25 }
  0x8f   :  { %v408_v26 = vpop.permute.xlu0 %407  ;;  %v410_v27 = vpop.permute.xlu1 %409 }
  0x90   :  { %v420_v29 = vsel %vm419_vm3, %v408_v26, %v410_v27  ;;  %v421_v30 = vsel %vm419_vm3, %v410_v27, %v3649_v13  ;;  %v198_v31 = vpop.permute.xlu2 %197  ;;  %v538_v27 = vld [vmem:[#allocation3 + $0x1d0] sm:$0xff] }
  0x91   :  { %432 = vst [vmem:[#allocation3 + $0x158] sm:$0xff] %v421_v30  ;;  %v558_v32 = vpack.c.bf16 %v420_v29, %v378_v28  ;;  %v559_v33 = vpack.c.bf16 %v421_v30, %v379_v12  ;;  %v3743_v30 = vld [vmem:[%s4339_s1] sm:$0xf] }
  0x93   :  { %578 = vmatpush.bf16.msra.mxu0 %v558_v32  ;;  %591 = vmatpush.bf16.msra.mxu1 %v559_v33 }
  0x97   :  { %v284_v34 = vpop.permute.xlu1 %283  ;;  %v282_v35 = vpop.permute.xlu0 %281 }
  0x98   :  { %v295_v36 = vsel %vm4347_vm4, %v284_v34, %v3657_v16  ;;  %v240_v37 = vpop.permute.xlu2 %239  ;;  %v294_v40 = vsel %vm4347_vm4, %v282_v35, %v284_v34 }
  0x99   :  { %306 = vst [vmem:[#allocation3 + $0xc8] sm:$0xff] %v295_v36 }
  0x9f   :  { %v326_v38 = vpop.permute.xlu1 %325  ;;  %v324_v39 = vpop.permute.xlu0 %323 }
  0xa0   :  { %v337_v41 = vsel %vm335_vm5, %v326_v38, %v3667_v23  ;;  %v336_v42 = vsel %vm335_vm5, %v324_v39, %v326_v38  ;;  %v372_v43 = vpop.permute.xlu2 %371 }
  0xa1   :  { %348 = vst [vmem:[#allocation3 + $0xf8] sm:$0xff] %v337_v41  ;;  %v552_v44 = vpack.c.bf16 %v336_v42, %v294_v40  ;;  %v553_v45 = vpack.c.bf16 %v337_v41, %v295_v36  ;;  %v380_v12 = vsel %vm4346_vm1, %v3639_v11, %v372_v43 }
  0xa3   :  { %579 = vmatpush.bf16.msra.mxu0 %v552_v44  ;;  %592 = vmatpush.bf16.msra.mxu1 %v553_v45 }
  0xa7   :  { %v3689_v48 = vpop.permute.xlu1 %457  ;;  %v456_v49 = vpop.permute.xlu0 %455 }
  0xa8   :  { %v464_v50 = vsel %vm461_vm2, %v454_v14, %v456_v49  ;;  %v465_v51 = vsel %vm461_vm2, %v456_v49, %v3689_v48  ;;  %v3696_v52 = vpop.permute.xlu2 %415 }
  0xa9   :  { %v566_v53 = vpack.c.bf16 %v536_v46, %v464_v50  ;;  %v567_v54 = vpack.c.bf16 %v537_v47, %v465_v51 }
  0xab   :  { %603 = vmatpush.bf16.msra.mxu2 %v566_v53  ;;  %616 = vmatpush.bf16.msra.mxu3 %v567_v54 }
  0xaf   :  { %v3711_v55 = vpop.permute.xlu1 %201  ;;  %v200_v56 = vpop.permute.xlu0 %199 }
  0xb0   :  { %v211_v57 = vsel %vm209_vm7, %v200_v56, %v3711_v55  ;;  %v3715_v58 = vpop.permute.xlu2 %159  ;;  %v210_v61 = vsel %vm209_vm7, %v198_v31, %v200_v56 }
  0xb1   :  { %222 = vst [vmem:[#allocation3 + $0x68] sm:$0xff] %v211_v57 }
  0xb7   :  { %v3717_v59 = vpop.permute.xlu1 %243  ;;  %v242_v60 = vpop.permute.xlu0 %241 }
  0xb8   :  { %v252_v62 = vsel %vm4345_vm8, %v240_v37, %v242_v60  ;;  %v253_v63 = vsel %vm4345_vm8, %v242_v60, %v3717_v59  ;;  %v3723_v6 = vpop.permute.xlu2 %289 }
  0xb9   :  { %264 = vst [vmem:[#allocation3 + $0x98] sm:$0xff] %v253_v63  ;;  %v546_v7 = vpack.c.bf16 %v252_v62, %v210_v61  ;;  %v547_v8 = vpack.c.bf16 %v253_v63, %v211_v57 }
  0xbb   :  { %580 = vmatpush.bf16.msra.mxu0 %v546_v7  ;;  %593 = vmatpush.bf16.msra.mxu1 %v547_v8 }
  0xbf   :  { %v414_v9 = vpop.permute.xlu1 %413  ;;  %v374_v10 = vpop.permute.xlu0 %373 }
  0xc0   :  { %v422_v14 = vsel %vm419_vm3, %v3649_v13, %v414_v9  ;;  %v423_v15 = vsel %vm419_vm3, %v414_v9, %v3696_v52  ;;  %v381_v17 = vsel %vm4346_vm1, %v372_v43, %v374_v10  ;;  %v376_v18 = vpop.permute.xlu2 %375  ;;  %v3256_v9 = vld [vmem:[%s4340_s2 + $0x38] sm:$0xff] }
  0xc1   :  { %394 = vst.msk [vmem:[#allocation3 + $0x148] sm:$0xff] %vm61_vm6, %v376_v18  ;;  %v560_v19 = vpack.c.bf16 %v422_v14, %v380_v12  ;;  %v561_v20 = vpack.c.bf16 %v423_v15, %v381_v17  ;;  %v382_v45 = vsel %vm4346_vm1, %v374_v10, %v376_v18  ;;  %vm1526_vm1 = vcmask 646488  }
  0xc3   :  { %604 = vmatpush.bf16.msra.mxu2 %v560_v19  ;;  %617 = vmatpush.bf16.msra.mxu3 %v561_v20 }
  0xc7   :  { %v158_v21 = vpop.permute.xlu1 %157  ;;  %v156_v22 = vpop.permute.xlu0 %155 }
  0xc8   :  { %v169_v11 = vsel %vm167_vm9, %v158_v21, %v3715_v58  ;;  %v168_v13 = vsel %vm167_vm9, %v156_v22, %v158_v21  ;;  %v3736_v24 = vpop.permute.xlu2 %205  ;;  %v521_v51 = vld [vmem:[#allocation3 + $0x148] sm:$0xff]  ;;  %v3254_v22 = vld [vmem:[%s4340_s2 + $0x28] sm:$0xff] }
  0xc9   :  { %180 = vst [vmem:[#allocation3 + $0x38] sm:$0xff] %v169_v11  ;;  %v540_v25 = vpack.c.bf16 %v168_v13, %v3523_v1  ;;  %v541_v26 = vpack.c.bf16 %v169_v11, %v3528_v2  ;;  %v539_v2 = vld [vmem:[#allocation3 + $0x1d8] sm:$0xff] }
  0xca   :  { %v3262_v13 = vld [vmem:[%s4340_s2 + $0x68] sm:$0xff] }
  0xcb   :  { %581 = vmatpush.bf16.msra.mxu0 %v540_v25  ;;  %594 = vmatpush.bf16.msra.mxu1 %v541_v26 }
  0xce   :  { %2832 = vmatmul.msk.bf16.vlgmr.msra.gmra.mxu0 %vm570_vm10, %v3743_v30  ;;  %2833 = vmatmul.msk.bf16.vlgmr.msra.gmra.mxu1 %vm570_vm10, %v3743_v30 }
  0xcf   :  { %v288_v28 = vpop.permute.xlu1 %287  ;;  %v460_v29 = vpop.permute.xlu0 %459 }
  0xd0   :  { %v466_v31 = vsel %vm461_vm2, %v3689_v48, %v460_v29  ;;  %478 = vst.msk [vmem:[#allocation3 + $0x1a8] sm:$0xff] %vm61_vm6, %v460_v29  ;;  %v292_v32 = vpop.permute.xlu2 %291  ;;  %v296_v33 = vsel %vm4347_vm4, %v3657_v16, %v288_v28  ;;  %v297_v37 = vsel %vm4347_vm4, %v288_v28, %v3723_v6  ;;  %v485_v29 = vld [vmem:[#allocation3 + $0x28] sm:$0xff] }
  0xd1   :  { %310 = vst.msk [vmem:[#allocation3 + $0xe8] sm:$0xff] %vm61_vm6, %v292_v32  ;;  %v568_v1 = vpack.c.bf16 %v538_v27, %v466_v31  ;;  %v298_v63 = vsel %vm4347_vm4, %v3723_v6, %v292_v32  ;;  %v3255_v6 = vld [vmem:[%s4340_s2 + $0x30] sm:$0xff]  ;;  %v3261_v27 = vld [vmem:[%s4340_s2 + $0x60] sm:$0xff]  ;;  %vm1529_vm4 = vcmask 588800  }
  0xd3   :  { %629 = vmatpush.bf16.msrb.mxu0 %v568_v1  ;;  %v3252_v1 = vld [vmem:[%s4340_s2 + $0x18] sm:$0xff] }
  0xd7   :  { %v332_v34 = vpop.permute.xlu1 %331  ;;  %v330_v35 = vpop.permute.xlu0 %329  ;;  %v533_v36 = vld [vmem:[#allocation3 + $0x1a8] sm:$0xff] }
  0xd8   :  { %v338_v38 = vsel %vm335_vm5, %v3667_v23, %v330_v35  ;;  %v339_v39 = vsel %vm335_vm5, %v330_v35, %v332_v34  ;;  %v569_v40 = vpack.c.bf16 %v539_v2, %v533_v36  ;;  %v3760_v41 = vpop.permute.xlu2 %163  ;;  %v509_v17 = vld [vmem:[#allocation3 + $0xe8] sm:$0xff]  ;;  %v3259_v35 = vld [vmem:[%s4340_s2 + $0x50] sm:$0xff]  ;;  %v3250_v36 = vld [vmem:[%s4340_s2 + $0x8] sm:$0xff] }
  0xd9   :  { %v554_v42 = vpack.c.bf16 %v338_v38, %v296_v33  ;;  %v555_v43 = vpack.c.bf16 %v339_v39, %v297_v37  ;;  %v3258_v37 = vld [vmem:[%s4340_s2 + $0x48] sm:$0xff]  ;;  %v3249_v38 = vld [vmem:[%s4340_s2] sm:$0xff] }
  0xda   :  { %642 = vmatpush.bf16.msrb.mxu1 %v569_v40  ;;  %v3257_v39 = vld [vmem:[%s4340_s2 + $0x40] sm:$0xff] }
  0xdb   :  { %605 = vmatpush.bf16.msra.mxu2 %v554_v42  ;;  %618 = vmatpush.bf16.msra.mxu3 %v555_v43  ;;  %v3268_v43 = vld [vmem:[%s4340_s2 + $0x98] sm:$0xff] }
  0xdf   :  { %v204_v16 = vpop.permute.xlu1 %203  ;;  %v418_v44 = vpop.permute.xlu0 %417 }
  0xe0   :  { %v424_v46 = vsel %vm419_vm3, %v3696_v52, %v418_v44  ;;  %436 = vst.msk [vmem:[#allocation3 + $0x178] sm:$0xff] %vm61_vm6, %v418_v44  ;;  %v166_v23 = vpop.permute.xlu2 %165  ;;  %v212_v48 = vsel %vm209_vm7, %v3711_v55, %v204_v16  ;;  %v213_v54 = vsel %vm209_vm7, %v204_v16, %v3736_v24  ;;  %v3267_v16 = vld [vmem:[%s4340_s2 + $0x90] sm:$0xff] }
  0xe1   :  { %v562_v47 = vpack.c.bf16 %v424_v46, %v382_v45  ;;  %184 = vst.msk [vmem:[#allocation3 + $0x58] sm:$0xff] %vm61_vm6, %v166_v23  ;;  %v172_v25 = vsel %vm167_vm9, %v3760_v41, %v166_v23 }
  0xe2   :  { %v544_v26 = vpack.c.bf16 %v172_v25, %v3564_v3  ;;  %v3260_v3 = vld [vmem:[%s4340_s2 + $0x58] sm:$0xff] }
  0xe3   :  { %630 = vmatpush.bf16.msrb.mxu0 %v562_v47 }
  0xe7   :  { %v248_v49 = vpop.permute.xlu1 %247  ;;  %v246_v50 = vpop.permute.xlu0 %245  ;;  %v527_v53 = vld [vmem:[#allocation3 + $0x178] sm:$0xff] }
  0xe8   :  { %v254_v52 = vsel %vm4345_vm8, %v3717_v59, %v246_v50  ;;  %v255_v56 = vsel %vm4345_vm8, %v246_v50, %v248_v49  ;;  %v563_v57 = vpack.c.bf16 %v527_v53, %v521_v51  ;;  %v491_v32 = vld [vmem:[#allocation3 + $0x58] sm:$0xff] }
  0xe9   :  { %v548_v60 = vpack.c.bf16 %v254_v52, %v212_v48  ;;  %v549_v61 = vpack.c.bf16 %v255_v56, %v213_v54  ;;  %v545_v33 = vpack.c.bf16 %v491_v32, %v485_v29  ;;  %v3275_v29 = vld [vmem:[%s4340_s2 + $0x30] sm:$0xff]  ;;  %v3282_v32 = vld [vmem:[%s4340_s2 + $0x68] sm:$0xff] }
  0xea   :  { %643 = vmatpush.bf16.msrb.mxu1 %v563_v57  ;;  %v3266_v57 = vld [vmem:[%s4340_s2 + $0x88] sm:$0xff] }
  0xeb   :  { %606 = vmatpush.bf16.msra.mxu2 %v548_v60  ;;  %619 = vmatpush.bf16.msra.mxu3 %v549_v61  ;;  %v3265_v60 = vld [vmem:[%s4340_s2 + $0x80] sm:$0xff]  ;;  %v3284_v61 = vld [vmem:[%s4340_s2 + $0x78] sm:$0xff] }
  0xef   :  { %v162_v62 = vpop.permute.xlu1 %161  ;;  %v334_v55 = vpop.permute.xlu0 %333 }
  0xf0   :  { %v170_v7 = vsel %vm167_vm9, %v3715_v58, %v162_v62  ;;  %v171_v8 = vsel %vm167_vm9, %v162_v62, %v3760_v41  ;;  %v340_v59 = vsel %vm335_vm5, %v332_v34, %v334_v55  ;;  %352 = vst.msk [vmem:[#allocation3 + $0x118] sm:$0xff] %vm61_vm6, %v334_v55  ;;  %v3264_v58 = vld [vmem:[%s4340_s2 + $0x78] sm:$0xff]  ;;  %v3251_v34 = vld [vmem:[%s4340_s2 + $0x10] sm:$0xff] }
  0xf1   :  { %v542_v10 = vpack.c.bf16 %v170_v7, %v3518_v0  ;;  %v543_v12 = vpack.c.bf16 %v171_v8, %v3569_v4  ;;  %v556_v14 = vpack.c.bf16 %v340_v59, %v298_v63  ;;  %v3263_v0 = vld [vmem:[%s4340_s2 + $0x70] sm:$0xff]  ;;  %v3276_v62 = vld [vmem:[%s4340_s2 + $0x38] sm:$0xff] }
  0xf2   :  { %v3283_v55 = vld [vmem:[%s4340_s2 + $0x70] sm:$0xff] }
  0xf3   :  { %607 = vmatpush.bf16.msra.mxu2 %v542_v10  ;;  %620 = vmatpush.bf16.msra.mxu3 %v543_v12 }
  0xf4   :  { %631 = vmatpush.bf16.msrb.mxu0 %v556_v14 }
  0xf6   :  { %2834 = vmatmul.msk.bf16.vlgmr.msra.gmra.mxu2 %vm570_vm10, %v3743_v30  ;;  %2835 = vmatmul.msk.bf16.vlgmr.msra.gmra.mxu3 %vm570_vm10, %v3743_v30 }
  0xf7   :  { %855 = vmatpush.bf16.msrb.mxu2 %v3256_v9  ;;  %868 = vmatpush.bf16.msrb.mxu3 %v3264_v58  ;;  %v250_v4 = vpop.permute.xlu1 %249  ;;  %v208_v15 = vpop.permute.xlu0 %207  ;;  %v515_v18 = vld [vmem:[#allocation3 + $0x118] sm:$0xff] }
  0xf8   :  { %v256_v19 = vsel %vm4345_vm8, %v248_v49, %v250_v4  ;;  %268 = vst.msk [vmem:[#allocation3 + $0xb8] sm:$0xff] %vm61_vm6, %v250_v4  ;;  %v214_v20 = vsel %vm209_vm7, %v3736_v24, %v208_v15  ;;  %v557_v21 = vpack.c.bf16 %v515_v18, %v509_v17  ;;  %v3253_v24 = vld [vmem:[%s4340_s2 + $0x20] sm:$0xff]  ;;  %vm1191_vm8 = vcmask 949248  }
  0xf9   :  { %226 = vst.msk [vmem:[#allocation3 + $0x88] sm:$0xff] %vm61_vm6, %v208_v15  ;;  %v550_v11 = vpack.c.bf16 %v256_v19, %v214_v20 }
  0xfa   :  { %644 = vmatpush.bf16.msrb.mxu1 %v557_v21 }
  0xfb   :  { %856 = vmatpush.bf16.msrb.mxu2 %v3255_v6  ;;  %869 = vmatpush.bf16.msrb.mxu3 %v3263_v0 }
  0xfc   :  { %632 = vmatpush.bf16.msrb.mxu0 %v550_v11 }
  0xff   :  { %857 = vmatpush.bf16.msrb.mxu2 %v3254_v22  ;;  %870 = vmatpush.bf16.msrb.mxu3 %v3262_v13  ;;  %v503_v28 = vld [vmem:[#allocation3 + $0xb8] sm:$0xff] }
 0x100   :  { %633 = vmatpush.bf16.msrb.mxu0 %v544_v26  ;;  %v497_v31 = vld [vmem:[#allocation3 + $0x88] sm:$0xff] }
 0x101   :  { %v551_v2 = vpack.c.bf16 %v503_v28, %v497_v31  ;;  %v3274_v31 = vld [vmem:[%s4340_s2 + $0x28] sm:$0xff] }
 0x103   :  { %858 = vmatpush.bf16.msrb.mxu2 %v3253_v24  ;;  %871 = vmatpush.bf16.msrb.mxu3 %v3261_v27 }
 0x104   :  { %2836 = vmatmul.msk.bf16.vlgmr.msrb.gmra.mxu0 %vm570_vm10, %v3743_v30  ;;  %645 = vmatpush.bf16.msrb.mxu1 %v551_v2 }
 0x107   :  { %859 = vmatpush.bf16.msrb.mxu2 %v3252_v1  ;;  %872 = vmatpush.bf16.msrb.mxu3 %v3260_v3  ;;  %v942_v1 = vld [vmem:[%s4340_s2 + $0xa0] sm:$0x3] }
 0x108   :  { %646 = vmatpush.bf16.msrb.mxu1 %v545_v33  ;;  %v1045_v2 = vunpack.c.l.b16 %v942_v1  ;;  %v3273_v3 = vld [vmem:[%s4340_s2 + $0x20] sm:$0xff] }
 0x109   :  { %v3281_v33 = vld [vmem:[%s4340_s2 + $0x60] sm:$0xff] }
 0x10b   :  { %860 = vmatpush.bf16.msrb.mxu2 %v3251_v34  ;;  %873 = vmatpush.bf16.msrb.mxu3 %v3259_v35  ;;  %v1066_v34 = vpack.c.b16 %v1045_v2, %v1045_v2  ;;  %v3272_v35 = vld [vmem:[%s4340_s2 + $0x18] sm:$0xff] }
 0x10c   :  { %2837 = vmatmul.msk.bf16.vlgmr.msrb.gmra.mxu1 %vm570_vm10, %v3743_v30  ;;  %v713_v30 = vld [vmem:[%s4340_s2 + $0xa0] sm:$0x3] }
 0x10d   :  { %v805_v40 = vunpack.c.l.b16 %v713_v30  ;;  %1093 = vmatpush.bf16.msra.mxu1 %v3276_v62  ;;  %v3279_v30 = vld [vmem:[%s4340_s2 + $0x50] sm:$0xff] }
 0x10f   :  { %861 = vmatpush.bf16.msrb.mxu2 %v3250_v36  ;;  %874 = vmatpush.bf16.msrb.mxu3 %v3258_v37  ;;  %v826_v41 = vpack.c.b16 %v805_v40, %v805_v40  ;;  %v1091_v36 = vsel %vm851_vm11, %v1066_v34, 0  ;;  %v3280_v37 = vld [vmem:[%s4340_s2 + $0x58] sm:$0xff]  ;;  %v3287_v40 = vld [vmem:[%s4340_s2 + $0x90] sm:$0xff] }
 0x111   :  { %v853_v42 = vsel %vm851_vm11, %v826_v41, 0  ;;  %1094 = vmatpush.bf16.msra.mxu1 %v3275_v29  ;;  %v3270_v41 = vld [vmem:[%s4340_s2 + $0x8] sm:$0xff] }
 0x112   :  { %884 = vmatpush.bf16.msra.mxu0 %v853_v42  ;;  %v3278_v42 = vld [vmem:[%s4340_s2 + $0x48] sm:$0xff] }
 0x113   :  { %862 = vmatpush.bf16.msrb.mxu2 %v3249_v38  ;;  %875 = vmatpush.bf16.msrb.mxu3 %v3257_v39  ;;  %v3288_v38 = vld [vmem:[%s4340_s2 + $0x98] sm:$0xff]  ;;  %v3271_v39 = vld [vmem:[%s4340_s2 + $0x10] sm:$0xff] }
 0x115   :  { %1095 = vmatpush.bf16.msra.mxu1 %v3274_v31 }
 0x116   :  { %885 = vmatpush.bf16.msra.mxu0 %v3268_v43  ;;  %v3286_v43 = vld [vmem:[%s4340_s2 + $0x88] sm:$0xff] }
 0x117   :  { %1106 = vmatpush.bf16.msra.mxu2 %v3284_v61  ;;  %1122 = vmatpush.bf16.msra.mxu3 %v1091_v36 }
 0x119   :  { %1096 = vmatpush.bf16.msra.mxu1 %v3273_v3 }
 0x11a   :  { %886 = vmatpush.bf16.msra.mxu0 %v3267_v16 }
 0x11b   :  { %1107 = vmatpush.bf16.msra.mxu2 %v3283_v55  ;;  %1123 = vmatpush.bf16.msra.mxu3 %v3288_v38 }
 0x11d   :  { %1097 = vmatpush.bf16.msra.mxu1 %v3272_v35  ;;  %v3976_v35 = vld [vmem:[#allocation3 + $0x1b8] sm:$0xff] }
 0x11e   :  { %887 = vmatpush.bf16.msra.mxu0 %v3266_v57 }
 0x11f   :  { %1108 = vmatpush.bf16.msra.mxu2 %v3282_v32  ;;  %1124 = vmatpush.bf16.msra.mxu3 %v3287_v40 }
 0x121   :  { %1098 = vmatpush.bf16.msra.mxu1 %v3271_v39 }
 0x122   :  { %888 = vmatpush.bf16.msra.mxu0 %v3265_v60 }
 0x123   :  { %1109 = vmatpush.bf16.msra.mxu2 %v3281_v33  ;;  %1125 = vmatpush.bf16.msra.mxu3 %v3286_v43  ;;  %v3033_v43 = vld [vmem:[#allocation4 + $0x38] sm:$0xf] }
 0x125   :  { %1099 = vmatpush.bf16.msra.mxu1 %v3270_v41 }
 0x127   :  { %1110 = vmatpush.bf16.msra.mxu2 %v3280_v37 }
 0x12b   :  { %1111 = vmatpush.bf16.msra.mxu2 %v3279_v30 }
 0x12f   :  { %1112 = vmatpush.bf16.msra.mxu2 %v3278_v42 }
 0x14b   :  { %v583_v44 = vpop.f32.mrf.mxu0  ;;  %v596_v45 = vpop.f32.mrf.mxu1 }
 0x14c   :  { %vm652_vm12 = vcmp.ge.f32.partialorder %v583_v44, 0.0  ;;  %v658_v46 = vmul.f32 0.2, %v583_v44  ;;  %vm653_vm13 = vcmp.ge.f32.partialorder %v596_v45, 0.0  ;;  %v659_v23 = vmul.f32 0.2, %v596_v45 }
 0x14e   :  { %v664_v47 = vsel %vm652_vm12, %v583_v44, %v658_v46  ;;  %v665_v48 = vsel %vm653_vm13, %v596_v45, %v659_v23  ;;  %v3269_v45 = vld [vmem:[%s4340_s2] sm:$0xff] }
 0x14f   :  { %v670_v49 = vpack.c.bf16 %v665_v48, %v664_v47  ;;  %v3277_v46 = vld [vmem:[%s4340_s2 + $0x40] sm:$0xff]  ;;  %1100 = vmatpush.bf16.msra.mxu1 %v3269_v45  ;;  %v3459_v45 = vmov 65535  }
 0x150   :  { %v3285_v23 = vld [vmem:[%s4340_s2 + $0x80] sm:$0xff]  ;;  %1113 = vmatpush.bf16.msra.mxu2 %v3277_v46  ;;  %s3452_s2 = smov 104  }
 0x151   :  { %v716_v50 = vunpack.c.l.b16 %v670_v49  ;;  %v717_v51 = vunpack.c.h.b16 %v670_v49  ;;  %1126 = vmatpush.bf16.msra.mxu3 %v3285_v23 }
 0x153   :  { %v585_v53 = vpop.f32.mrf.mxu0  ;;  %v598_v54 = vpop.f32.mrf.mxu1  ;;  %v719_v52 = vpack.c.b16 %v716_v50, %v716_v50  ;;  %v720_v56 = vpack.c.b16 %v717_v51, %v717_v51 }
 0x155   :  { %863 = vmatmul.bf16.vlgmr.msrb.gmra.mxu2 %v719_v52  ;;  %876 = vmatmul.bf16.vlgmr.msrb.gmra.mxu3 %v720_v56 }
 0x179   :  { %v609_v63 = vpop.f32.mrf.mxu2  ;;  %v622_v7 = vpop.f32.mrf.mxu3 }
 0x17a   :  { %vm654_vm14 = vcmp.ge.f32.partialorder %v609_v63, 0.0  ;;  %v660_v8 = vmul.f32 0.2, %v609_v63  ;;  %vm655_vm15 = vcmp.ge.f32.partialorder %v622_v7, 0.0  ;;  %v661_v59 = vmul.f32 0.2, %v622_v7 }
 0x17c   :  { %v666_v9 = vsel %vm654_vm14, %v609_v63, %v660_v8  ;;  %v667_v10 = vsel %vm655_vm15, %v622_v7, %v661_v59  ;;  %vm958_vm14 = vcmask 490496   ;;  %vm898_vm15 = vcmask 1047648  }
 0x17d   :  { %v671_v12 = vpack.c.bf16 %v667_v10, %v666_v9 }
 0x17f   :  { %v718_v14 = vunpack.c.l.b16 %v671_v12  ;;  %v944_v6 = vunpack.c.h.b16 %v671_v12 }
 0x181   :  { %v635_v58 = vpop.f32.mrf.mxu0  ;;  %v721_v0 = vpack.c.b16 %v718_v14, %v718_v14  ;;  %v611_v4 = vpop.f32.mrf.mxu2  ;;  %v947_v17 = vpack.c.b16 %v944_v6, %v944_v6 }
 0x182   :  { %v624_v15 = vpop.f32.mrf.mxu3  ;;  %v662_v18 = vmul.f32 0.2, %v635_v58  ;;  %vm656_vm12 = vcmp.ge.f32.partialorder %v635_v58, 0.0 }
 0x183   :  { %952 = vrot.lane.b32.xlu0 %v947_v17, %s3451_s22  ;;  %2918 = vmatmul.msk.bf16.vlgmr.msra.gmra.mxu0 %vm847_vm0, %v721_v0 }
 0x184   :  { %v668_v11 = vsel %vm656_vm12, %v635_v58, %v662_v18  ;;  %vm900_vm12 = vcmask 39936  }
 0x189   :  { %v648_v19 = vpop.f32.mrf.mxu1  ;;  %v637_v20 = vpop.f32.mrf.mxu0 }
 0x18a   :  { %vm657_vm13 = vcmp.ge.f32.partialorder %v648_v19, 0.0  ;;  %v663_v21 = vmul.f32 0.2, %v648_v19 }
 0x18b   :  { %950 = vrot.lane.b32.xlu0 %v721_v0, %s3451_s22 }
 0x18c   :  { %v669_v22 = vsel %vm657_vm13, %v648_v19, %v663_v21  ;;  %vm1141_vm13 = vcmask 932864  }
 0x18d   :  { %v672_v13 = vpack.c.bf16 %v669_v22, %v668_v11 }
 0x18f   :  { %v946_v25 = vunpack.c.h.b16 %v672_v13  ;;  %v945_v24 = vunpack.c.l.b16 %v672_v13 }
 0x191   :  { %v650_v26 = vpop.f32.mrf.mxu1  ;;  %v949_v27 = vpack.c.b16 %v946_v25, %v946_v25  ;;  %v948_v28 = vpack.c.b16 %v945_v24, %v945_v24 }
 0x193   :  { %956 = vrot.lane.b32.xlu2 %v949_v27, %s3451_s22  ;;  %954 = vrot.lane.b32.xlu1 %v948_v28, %s3451_s22  ;;  %v3969_v27 = vld [vmem:[#allocation3 + $0x1b0] sm:$0xff] }
 0x1d8   :  { %v864_v16 = vpop.f32.mrf.mxu2  ;;  %v877_v44 = vpop.f32.mrf.mxu3 }
 0x1d9   :  { %v878_v50 = vadd.f32 %v877_v44, %v864_v16  ;;  %v3296_v16 = vld [vmem:[#allocation4 + $0x38] sm:$0x10] }
 0x1da   :  { %v3034_v44 = vor.u32 %v3296_v16, %v3033_v43 }
 0x1e0   :  { %v866_v47 = vpop.f32.mrf.mxu2  ;;  %v879_v48 = vpop.f32.mrf.mxu3 }
 0x1ed   :  { %v957_v56 = vpop.permute.xlu2 %956 }
 0x1f5   :  { %v953_v49 = vpop.permute.xlu0 %952 }
 0x1fd   :  { %v951_v51 = vpop.permute.xlu0 %950 }
 0x1fe   :  { %v959_v53 = vsel %vm958_vm14, %v951_v51, %v953_v49 }
 0x1ff   :  { %1101 = vmatmul.bf16.vlgmr.msra.gmra.mxu1 %v959_v53 }
 0x200   :  { %v890_v54 = vpop.f32.mrf.mxu0 }
 0x201   :  { %v891_v52 = vadd.f32 %v890_v54, %v878_v50 }
 0x203   :  { %895 = vrot.lane.b32.xlu1 %v891_v52, %s3440_s10  ;;  %s3453_s10 = smov 106  }
 0x205   :  { %v955_v57 = vpop.permute.xlu1 %954 }
 0x206   :  { %v960_v60 = vsel %vm958_vm14, %v953_v49, %v955_v57  ;;  %v961_v61 = vsel %vm958_vm14, %v955_v57, %v957_v56  ;;  %vm1205_vm14 = vcmask 941056   ;;  %v3295_v49 = vld [vmem:[#allocation4 + $0x30] sm:$0xff]  ;;  %v3294_v56 = vld [vmem:[#allocation4 + $0x28] sm:$0xff] }
 0x207   :  { %1114 = vmatmul.bf16.vlgmr.msra.gmra.mxu2 %v960_v60  ;;  %2999 = vmatmul.msk.bf16.vlgmr.msra.gmra.mxu3 %vm847_vm0, %v961_v61  ;;  %vm1136_vm0 = vcmask 1031208  }
 0x208   :  { %v892_v62 = vpop.f32.mrf.mxu0 }
 0x209   :  { %v3293_v62 = vld [vmem:[#allocation4 + $0x20] sm:$0xff] }
 0x275   :  { %v896_v55 = vpop.permute.xlu1 %895 }
 0x276   :  { %899 = vst.msk [vmem:[#allocation2] sm:$0xff] %vm898_vm15, %v896_v55  ;;  %vm1261_vm15 = vcmask 850944  }
 0x277   :  { %901 = vst.msk [vmem:[#allocation2 + $0x8] sm:$0xff] %vm900_vm12, %v896_v55  ;;  %vm1223_vm12 = vcmask 867328  }
 0x27c   :  { %v1102_v63 = vpop.f32.mrf.mxu1 }
 0x27d   :  { %v3931_v7 = vld [vmem:[#allocation2] sm:$0xff] }
 0x27e   :  { %1140 = vst [vmem:[#allocation3] sm:$0xff] %v3931_v7  ;;  %1255 = vrot.lane.b32.xlu0 %v3931_v7, %s3452_s2  ;;  %1160 = vrot.lane.b32.xlu1 %v3931_v7, %s3446_s24 }
 0x284   :  { %v1104_v8 = vpop.f32.mrf.mxu1 }
 0x286   :  { %1217 = vrot.lane.b32.xlu0 %v3931_v7, %s3453_s10 }
 0x28a   :  { %v1115_v59 = vpop.f32.mrf.mxu2  ;;  %v1128_v9 = vpop.f32.mrf.mxu3 }
 0x28b   :  { %v1116_v10 = vadd.f32 %v1115_v59, %v1102_v63  ;;  %v3292_v59 = vld [vmem:[#allocation4 + $0x18] sm:$0xff] }
 0x28d   :  { %v1129_v12 = vadd.f32 %v1128_v9, %v1116_v10 }
 0x28e   :  { %1236 = vrot.lane.b32.xlu0 %v3931_v7, %s3455_s27 }
 0x28f   :  { %1133 = vrot.lane.b32.xlu2 %v1129_v12, %s3454_s23 }
 0x292   :  { %v1117_v14 = vpop.f32.mrf.mxu2  ;;  %v1130_v58 = vpop.f32.mrf.mxu3 }
 0x293   :  { %v3000_v14 = vld [vmem:[%s4339_s1 + $0x4] sm:$0xf] }
 0x294   :  { %v3291_v58 = vld [vmem:[#allocation4 + $0x10] sm:$0xff] }
 0x296   :  { %1187 = vrot.lane.b32.xlu0 %v3931_v7, %s3456_s28 }
 0x297   :  { %1259 = vrot.lane.b32.xlu2 %v3448_v5, %s3452_s2 }
 0x29e   :  { %1173 = vrot.lane.b32.xlu0 %v3931_v7, %s3457_s0 }
 0x29f   :  { %1221 = vrot.lane.b32.xlu2 %v3448_v5, %s3453_s10 }
 0x2a7   :  { %1240 = vrot.lane.b32.xlu2 %v3448_v5, %s3455_s27 }
 0x2af   :  { %1201 = vrot.lane.b32.xlu2 %v3931_v7, %s3458_s29 }
 0x2e9   :  { %v1134_v6 = vpop.permute.xlu2 %1133 }
 0x2ea   :  { %1137 = vst.msk [vmem:[#allocation2 + $0x8] sm:$0xff] %vm1136_vm0, %v1134_v6  ;;  %vm1242_vm0 = vcmask 859136  }
 0x2f0   :  { %v1256_v17 = vpop.permute.xlu0 %1255  ;;  %v1161_v22 = vpop.permute.xlu1 %1160 }
 0x2f1   :  { %v1139_v0 = vld [vmem:[#allocation2 + $0x8] sm:$0xff]  ;;  %v1260_v4 = vpop.permute.xlu2 %1259 }
 0x2f2   :  { %1162 = vrot.lane.b32.xlu2 %v1139_v0, %s3446_s24  ;;  %1203 = vrot.lane.b32.xlu0 %v1139_v0, %s3458_s29  ;;  %1142 = vst.msk [vmem:[#allocation3 + $0x8] sm:$0xff] %vm1141_vm13, %v1139_v0 }
 0x2f3   :  { %1257 = vrot.lane.b32.xlu1 %v1139_v0, %s3452_s2 }
 0x2f8   :  { %v1218_v19 = vpop.permute.xlu0 %1217 }
 0x2f9   :  { %v1222_v15 = vpop.permute.xlu2 %1221 }
 0x2fa   :  { %1149 = vrot.lane.b32.xlu0 %v1139_v0, %s3449_s26  ;;  %1147 = vrot.lane.b32.xlu2 %v3931_v7, %s3449_s26 }
 0x2fb   :  { %1219 = vrot.lane.b32.xlu1 %v1139_v0, %s3453_s10 }
 0x300   :  { %v1237_v21 = vpop.permute.xlu0 %1236 }
 0x301   :  { %v1241_v18 = vpop.permute.xlu2 %1240 }
 0x303   :  { %1238 = vrot.lane.b32.xlu1 %v1139_v0, %s3455_s27 }
 0x308   :  { %v1188_v25 = vpop.permute.xlu0 %1187 }
 0x309   :  { %v1202_v20 = vpop.permute.xlu2 %1201 }
 0x30b   :  { %1189 = vrot.lane.b32.xlu1 %v1139_v0, %s3456_s28 }
 0x310   :  { %v3967_v24 = vpop.permute.xlu0 %1173 }
 0x313   :  { %1175 = vrot.lane.b32.xlu1 %v1139_v0, %s3457_s0 }
 0x34c   :  { %v1163_v11 = vpop.permute.xlu2 %1162 }
 0x34d   :  { %v3963_v13 = vsel %vm209_vm7, %v1161_v22, %v1163_v11  ;;  %1168 = vst.msk [vmem:[#allocation3 + $0x68] sm:$0xff] %vm1141_vm13, %v1163_v11  ;;  %v3303_v22 = vld [vmem:[#allocation4 + $0x30] sm:$0xff] }
 0x34e   :  { %1167 = vst [vmem:[#allocation3 + $0x60] sm:$0xff] %v3963_v13 }
 0x354   :  { %v1148_v2 = vpop.permute.xlu2 %1147  ;;  %v1275_v10 = vld [vmem:[#allocation3 + $0x68] sm:$0xff] }
 0x364   :  { %v1204_v26 = vpop.permute.xlu0 %1203 }
 0x365   :  { %v1206_v28 = vsel %vm1205_vm14, %v1202_v20, %v1204_v26  ;;  %1210 = vst.msk [vmem:[#allocation3 + $0xf8] sm:$0xff] %vm1141_vm13, %v1204_v26  ;;  %v1258_v29 = vpop.permute.xlu1 %1257  ;;  %vm1403_vm14 = vcmask 1043456  }
 0x366   :  { %1209 = vst [vmem:[#allocation3 + $0xf0] sm:$0xff] %v1206_v28  ;;  %v1262_v31 = vsel %vm1261_vm15, %v1256_v17, %v1258_v29  ;;  %v1263_v32 = vsel %vm1261_vm15, %v1258_v29, %v1260_v4  ;;  %vm1404_vm15 = vcmask 1044480   ;;  %v1405_v46 = vsel %vm1403_vm14, 4294967295, %v3459_v45  ;;  %v1271_v4 = vld [vmem:[#allocation3 + $0x8] sm:$0xff]  ;;  %v3289_v17 = vld [vmem:[#allocation4] sm:$0xff] }
 0x367   :  { %1266 = vst [vmem:[#allocation3 + $0x180] sm:$0xff] %v1262_v31  ;;  %v1298_v1 = vpack.c.bf16 %v3969_v27, %v1262_v31  ;;  %v1406_v23 = vsel %vm1404_vm15, %v1405_v46, 0  ;;  %vm1399_vm15 = vcmask 990208  }
 0x368   :  { %1267 = vst.msk [vmem:[#allocation3 + $0x188] sm:$0xff] %vm1141_vm13, %v1263_v32  ;;  %v1408_v47 = vand.u32 %v3034_v44, %v1406_v23 }
 0x369   :  { %1306 = vmatpush.bf16.msrb.mxu0 %v1298_v1 }
 0x36a   :  { %1410 = vmatpush.bf16.msrb.mxu3 %v1408_v47 }
 0x36c   :  { %v1150_v3 = vpop.permute.xlu0 %1149  ;;  %v1281_v61 = vld [vmem:[#allocation3 + $0xf8] sm:$0xff] }
 0x36d   :  { %v1151_v33 = vsel %vm167_vm9, %v1148_v2, %v1150_v3  ;;  %1155 = vst.msk [vmem:[#allocation3 + $0x38] sm:$0xff] %vm1141_vm13, %v1150_v3  ;;  %v1220_v34 = vpop.permute.xlu1 %1219 }
 0x36e   :  { %1154 = vst [vmem:[#allocation3 + $0x30] sm:$0xff] %v1151_v33  ;;  %v1224_v36 = vsel %vm1223_vm12, %v1218_v19, %v1220_v34  ;;  %v1225_v37 = vsel %vm1223_vm12, %v1220_v34, %v1222_v15  ;;  %1411 = vmatpush.bf16.msrb.mxu3 %v3295_v49  ;;  %v1290_v9 = vpack.c.bf16 %v1151_v33, %v3931_v7  ;;  %v3290_v7 = vld [vmem:[#allocation4 + $0x8] sm:$0xff]  ;;  %v3304_v19 = vld [vmem:[#allocation4 + $0x38] sm:$0x10] }
 0x36f   :  { %1228 = vst [vmem:[#allocation3 + $0x120] sm:$0xff] %v1224_v36  ;;  %v1287_v38 = vld [vmem:[#allocation3 + $0x188] sm:$0xff] }
 0x370   :  { %1229 = vst.msk [vmem:[#allocation3 + $0x128] sm:$0xff] %vm1141_vm13, %v1225_v37  ;;  %v1299_v39 = vpack.c.bf16 %v3976_v35, %v1287_v38  ;;  %v3302_v34 = vld [vmem:[#allocation4 + $0x28] sm:$0xff]  ;;  %v3300_v37 = vld [vmem:[#allocation4 + $0x18] sm:$0xff]  ;;  %v3299_v38 = vld [vmem:[#allocation4 + $0x10] sm:$0xff] }
 0x372   :  { %1319 = vmatpush.bf16.msrb.mxu1 %v1299_v39  ;;  %1412 = vmatpush.bf16.msrb.mxu3 %v3294_v56  ;;  %v3298_v39 = vld [vmem:[#allocation4 + $0x8] sm:$0xff] }
 0x374   :  { %v1273_v0 = vld [vmem:[#allocation3 + $0x38] sm:$0xff] }
 0x375   :  { %v1239_v30 = vpop.permute.xlu1 %1238  ;;  %v1291_v15 = vpack.c.bf16 %v1273_v0, %v1271_v4 }
 0x376   :  { %v1243_v40 = vsel %vm1242_vm0, %v1237_v21, %v1239_v30  ;;  %v1244_v41 = vsel %vm1242_vm0, %v1239_v30, %v1241_v18  ;;  %vm1177_vm0 = vcmask 957440   ;;  %1413 = vmatpush.bf16.msrb.mxu3 %v3293_v62  ;;  %v3066_v18 = vld [vmem:[#allocation4 + $0x38] sm:$0xf]  ;;  %v3297_v30 = vld [vmem:[#allocation4] sm:$0xff] }
 0x377   :  { %1247 = vst [vmem:[#allocation3 + $0x150] sm:$0xff] %v1243_v40  ;;  %v1296_v42 = vpack.c.bf16 %v1243_v40, %v1224_v36  ;;  %v1283_v51 = vld [vmem:[#allocation3 + $0x128] sm:$0xff]  ;;  %v3067_v20 = vor.u32 %v3304_v19, %v3066_v18  ;;  %v3301_v36 = vld [vmem:[#allocation4 + $0x20] sm:$0xff]  ;;  %v3306_v62 = vld [vmem:[%s4342_s4 + $0x8] sm:$0xff] }
 0x378   :  { %1248 = vst.msk [vmem:[#allocation3 + $0x158] sm:$0xff] %vm1141_vm13, %v1244_v41  ;;  %v3069_v18 = vld [vmem:[%s4339_s1 + $0x8] sm:$0xf]  ;;  %v3305_v19 = vld [vmem:[%s4342_s4] sm:$0xff] }
 0x379   :  { %1307 = vmatpush.bf16.msrb.mxu0 %v1296_v42  ;;  %v1507_v21 = vand.u32 %v3067_v20, %v1406_v23  ;;  %v1666_v20 = vld [vmem:[%s4342_s4 + $0x10] sm:$0x3] }
 0x37a   :  { %1414 = vmatpush.bf16.msrb.mxu3 %v3292_v59 }
 0x37d   :  { %v1190_v48 = vpop.permute.xlu1 %1189 }
 0x37e   :  { %v1192_v50 = vsel %vm1191_vm8, %v1188_v25, %v1190_v48  ;;  %1196 = vst.msk [vmem:[#allocation3 + $0xc8] sm:$0xff] %vm1141_vm13, %v1190_v48  ;;  %1415 = vmatpush.bf16.msrb.mxu3 %v3291_v58 }
 0x37f   :  { %1195 = vst [vmem:[#allocation3 + $0xc0] sm:$0xff] %v1192_v50  ;;  %v1285_v53 = vld [vmem:[#allocation3 + $0x158] sm:$0xff]  ;;  %v1294_v54 = vpack.c.bf16 %v1206_v28, %v1192_v50 }
 0x380   :  { %v1297_v52 = vpack.c.bf16 %v1285_v53, %v1283_v51 }
 0x381   :  { %1308 = vmatpush.bf16.msrb.mxu0 %v1294_v54  ;;  %v1620_v54 = vld [vmem:[%s4342_s4 + $0x10] sm:$0x3] }
 0x382   :  { %1320 = vmatpush.bf16.msrb.mxu1 %v1297_v52  ;;  %1416 = vmatpush.bf16.msrb.mxu3 %v3290_v7  ;;  %v1630_v56 = vunpack.c.l.b16 %v1620_v54 }
 0x385   :  { %v1176_v57 = vpop.permute.xlu1 %1175  ;;  %v1279_v60 = vld [vmem:[#allocation3 + $0xc8] sm:$0xff] }
 0x386   :  { %v1178_v55 = vsel %vm1177_vm0, %v3967_v24, %v1176_v57  ;;  %1182 = vst.msk [vmem:[#allocation3 + $0x98] sm:$0xff] %vm1141_vm13, %v1176_v57  ;;  %v1295_v63 = vpack.c.bf16 %v1281_v61, %v1279_v60  ;;  %1417 = vmatpush.bf16.msrb.mxu3 %v3289_v17  ;;  %v1633_v60 = vpack.c.b16 %v1630_v56, %v1630_v56 }
 0x387   :  { %1181 = vst [vmem:[#allocation3 + $0x90] sm:$0xff] %v1178_v55  ;;  %v1292_v8 = vpack.c.bf16 %v1178_v55, %v3963_v13 }
 0x388   :  { %1321 = vmatpush.bf16.msrb.mxu1 %v1295_v63  ;;  %v1641_v61 = vsel %vm851_vm11, %v1633_v60, 0  ;;  %v1916_v60 = vld [vmem:[#allocation6 + $0x90] sm:$0x33] }
 0x389   :  { %1309 = vmatpush.bf16.msrb.mxu0 %v1292_v8 }
 0x38d   :  { %v1277_v12 = vld [vmem:[#allocation3 + $0x98] sm:$0xff]  ;;  %1310 = vmatpush.bf16.msrb.mxu0 %v1290_v9 }
 0x38e   :  { %v1293_v6 = vpack.c.bf16 %v1277_v12, %v1275_v10 }
 0x390   :  { %1322 = vmatpush.bf16.msrb.mxu1 %v1293_v6  ;;  %3001 = vmatmul.msk.bf16.vlgmr.msrb.gmra.mxu0 %vm570_vm10, %v3000_v14 }
 0x391   :  { %1509 = vmatpush.bf16.msra.mxu0 %v1507_v21  ;;  %v1681_v21 = vunpack.c.l.b16 %v1666_v20  ;;  %v3321_v20 = vld [vmem:[#allocation6 + $0x64] sm:$0xf] }
 0x394   :  { %1323 = vmatpush.bf16.msrb.mxu1 %v1291_v15 }
 0x395   :  { %1510 = vmatpush.bf16.msra.mxu0 %v3303_v22  ;;  %v1684_v22 = vpack.c.b16 %v1681_v21, %v1681_v21  ;;  %v3144_v21 = vld [vmem:[#allocation6 + $0x6c] sm:$0xf0] }
 0x397   :  { %3002 = vmatmul.msk.bf16.vlgmr.msrb.gmra.mxu1 %vm570_vm10, %v3000_v14 }
 0x398   :  { %1648 = vmatpush.bf16.msra.mxu1 %v1641_v61  ;;  %v1980_v61 = vunpack.c.l.b16 %v1916_v60 }
 0x399   :  { %1511 = vmatpush.bf16.msra.mxu0 %v3302_v34 }
 0x39c   :  { %1649 = vmatpush.bf16.msra.mxu1 %v3306_v62  ;;  %v1981_v62 = vunpack.c.h.b16 %v1916_v60  ;;  %v3315_v60 = vld [vmem:[#allocation6 + $0x34] sm:$0xf] }
 0x39d   :  { %1512 = vmatpush.bf16.msra.mxu0 %v3301_v36 }
 0x3a0   :  { %1650 = vmatpush.bf16.msra.mxu1 %v3305_v19  ;;  %v3322_v19 = vld [vmem:[#allocation6 + $0x68] sm:$0xf0] }
 0x3a1   :  { %1513 = vmatpush.bf16.msra.mxu0 %v3300_v37 }
 0x3a5   :  { %1514 = vmatpush.bf16.msra.mxu0 %v3299_v38 }
 0x3a9   :  { %1515 = vmatpush.bf16.msra.mxu0 %v3298_v39 }
 0x3ad   :  { %1516 = vmatpush.bf16.msra.mxu0 %v3297_v30 }
 0x40d   :  { %v1312_v11 = vpop.f32.mrf.mxu0 }
 0x40e   :  { %v1331_v13 = vmul.f32 0.2, %v1312_v11  ;;  %vm1329_vm13 = vcmp.ge.f32.partialorder %v1312_v11, 0.0 }
 0x410   :  { %v1333_v29 = vsel %vm1329_vm13, %v1312_v11, %v1331_v13  ;;  %vm1454_vm13 = vcmask 56320   ;;  %v1691_v11 = vsel %vm851_vm11, %v1684_v22, 0  ;;  %v3308_v13 = vld [vmem:[%s4342_s4 + $0x8] sm:$0xff] }
 0x411   :  { %v1917_v22 = vld [vmem:[#allocation6 + $0x98] sm:$0x3] }
 0x414   :  { %v1325_v25 = vpop.f32.mrf.mxu1 }
 0x415   :  { %vm1330_vm14 = vcmp.ge.f32.partialorder %v1325_v25, 0.0  ;;  %v1332_v24 = vmul.f32 0.2, %v1325_v25  ;;  %v1314_v26 = vpop.f32.mrf.mxu0 }
 0x417   :  { %v1334_v28 = vsel %vm1330_vm14, %v1325_v25, %v1332_v24  ;;  %vm1427_vm14 = vcmask 351288   ;;  %v3307_v25 = vld [vmem:[%s4342_s4] sm:$0xff]  ;;  %s3467_s4 = smov 111  }
 0x418   :  { %v1335_v31 = vpack.c.bf16 %v1334_v28, %v1333_v29 }
 0x41a   :  { %3035 = vmatmul.msk.bf16.vlgmr.msrb.gmra.mxu3 %vm1399_vm15, %v1335_v31  ;;  %v1447_v32 = vunpack.c.h.b16 %v1335_v31  ;;  %v1446_v1 = vunpack.c.l.b16 %v1335_v31 }
 0x41c   :  { %v1327_v2 = vpop.f32.mrf.mxu1  ;;  %v1449_v3 = vpack.c.b16 %v1447_v32, %v1447_v32  ;;  %v1448_v33 = vpack.c.b16 %v1446_v1, %v1446_v1 }
 0x41e   :  { %1452 = vrot.lane.b32.xlu2 %v1449_v3, %s3460_s8  ;;  %1450 = vrot.lane.b32.xlu1 %v1448_v33, %s3460_s8 }
 0x478   :  { %v1453_v40 = vpop.permute.xlu2 %1452 }
 0x490   :  { %v1451_v41 = vpop.permute.xlu1 %1450 }
 0x491   :  { %v1455_v42 = vsel %vm1454_vm13, %v1451_v41, %v1453_v40  ;;  %vm1660_vm13 = vcmask 908376  }
 0x492   :  { %3068 = vmatmul.msk.bf16.vlgmr.msra.gmra.mxu0 %vm1399_vm15, %v1455_v42  ;;  %vm1636_vm15 = vcmask 293888  }
 0x49d   :  { %v1419_v43 = vpop.f32.mrf.mxu3 }
 0x49e   :  { %1424 = vrot.lane.b32.xlu0 %v1419_v43, %s3460_s8 }
 0x4a5   :  { %v1421_v16 = vpop.f32.mrf.mxu3 }
 0x50f   :  { %v1518_v44 = vpop.f32.mrf.mxu0 }
 0x510   :  { %v1425_v45 = vpop.permute.xlu0 %1424  ;;  %1523 = vrot.lane.b32.xlu1 %v1518_v44, %s3461_s9 }
 0x511   :  { %1428 = vst.msk [vmem:[#allocation2] sm:$0xff] %vm1427_vm14, %v1425_v45  ;;  %vm1710_vm14 = vcmask 1048440  }
 0x517   :  { %v1520_v46 = vpop.f32.mrf.mxu0 }
 0x582   :  { %v1524_v23 = vpop.permute.xlu1 %1523 }
 0x583   :  { %1527 = vst.msk [vmem:[#allocation2] sm:$0xff] %vm1526_vm1, %v1524_v23 }
 0x58a   :  { %v1528_v47 = vld [vmem:[#allocation2] sm:$0xff] }
 0x58b   :  { %1575 = vrot.lane.b32.xlu2 %v1528_v47, %s3462_s3  ;;  %1569 = vrot.lane.b32.xlu1 %v1528_v47, %s3458_s29  ;;  %1530 = vst.msk [vmem:[#allocation3] sm:$0xff] %vm1529_vm4, %v1528_v47 }
 0x58c   :  { %1563 = vrot.lane.b32.xlu0 %v1528_v47, %s3456_s28 }
 0x592   :  { %v1581_v15 = vld [vmem:[#allocation3] sm:$0xff] }
 0x593   :  { %1551 = vrot.lane.b32.xlu2 %v1528_v47, %s3463_s11  ;;  %1539 = vrot.lane.b32.xlu1 %v1528_v47, %s3446_s24  ;;  %s3466_s11 = smov 11  }
 0x594   :  { %1557 = vrot.lane.b32.xlu0 %v1528_v47, %s3464_s5  ;;  %s3468_s5 = smov 107  }
 0x59b   :  { %1545 = vrot.lane.b32.xlu2 %v1528_v47, %s3465_s12  ;;  %s3470_s12 = smov 28  }
 0x59c   :  { %1533 = vrot.lane.b32.xlu0 %v1528_v47, %s3449_s26 }
 0x5e5   :  { %v1576_v48 = vpop.permute.xlu2 %1575 }
 0x5e6   :  { %1578 = vst.msk [vmem:[#allocation3 + $0x180] sm:$0xff] %vm1529_vm4, %v1576_v48 }
 0x5ed   :  { %v1552_v49 = vpop.permute.xlu2 %1551  ;;  %v1589_v50 = vld [vmem:[#allocation3 + $0x180] sm:$0xff] }
 0x5ee   :  { %1554 = vst.msk [vmem:[#allocation3 + $0xc0] sm:$0xff] %vm1529_vm4, %v1552_v49  ;;  %v1595_v51 = vpack.c.bf16 %v3969_v27, %v1589_v50 }
 0x5f0   :  { %1602 = vmatpush.bf16.msrb.mxu2 %v1595_v51 }
 0x5f5   :  { %v1546_v53 = vpop.permute.xlu2 %1545  ;;  %v1585_v12 = vld [vmem:[#allocation3 + $0xc0] sm:$0xff] }
 0x5f6   :  { %1548 = vst.msk [vmem:[#allocation3 + $0x90] sm:$0xff] %vm1529_vm4, %v1546_v53 }
 0x5fd   :  { %v1570_v52 = vpop.permute.xlu1 %1569  ;;  %v1584_v0 = vld [vmem:[#allocation3 + $0x90] sm:$0xff] }
 0x5fe   :  { %1572 = vst.msk [vmem:[#allocation3 + $0x150] sm:$0xff] %vm1529_vm4, %v1570_v52  ;;  %v1564_v57 = vpop.permute.xlu0 %1563 }
 0x5ff   :  { %1566 = vst.msk [vmem:[#allocation3 + $0x120] sm:$0xff] %vm1529_vm4, %v1564_v57 }
 0x605   :  { %v1540_v55 = vpop.permute.xlu1 %1539  ;;  %v1588_v63 = vld [vmem:[#allocation3 + $0x150] sm:$0xff] }
 0x606   :  { %v1558_v8 = vpop.permute.xlu0 %1557  ;;  %1542 = vst.msk [vmem:[#allocation3 + $0x60] sm:$0xff] %vm1529_vm4, %v1540_v55  ;;  %v1587_v59 = vld [vmem:[#allocation3 + $0x120] sm:$0xff] }
 0x607   :  { %1560 = vst.msk [vmem:[#allocation3 + $0xf0] sm:$0xff] %vm1529_vm4, %v1558_v8  ;;  %v1594_v9 = vpack.c.bf16 %v1588_v63, %v1587_v59 }
 0x609   :  { %1603 = vmatpush.bf16.msrb.mxu2 %v1594_v9  ;;  %v2001_v9 = vpack.c.b16 %v1980_v61, %v1980_v61 }
 0x60d   :  { %v1583_v6 = vld [vmem:[#allocation3 + $0x60] sm:$0xff] }
 0x60e   :  { %v1534_v10 = vpop.permute.xlu0 %1533  ;;  %v1586_v14 = vld [vmem:[#allocation3 + $0xf0] sm:$0xff]  ;;  %v1592_v4 = vpack.c.bf16 %v1584_v0, %v1583_v6  ;;  %v3324_v6 = vld [vmem:[#allocation6 + $0x7c] sm:$0xf]  ;;  %v3156_v0 = vld [vmem:[#allocation6 + $0x84] sm:$0xf0] }
 0x60f   :  { %1536 = vst.msk [vmem:[#allocation3 + $0x30] sm:$0xff] %vm1529_vm4, %v1534_v10  ;;  %v1593_v58 = vpack.c.bf16 %v1586_v14, %v1585_v12  ;;  %v2002_v10 = vpack.c.b16 %v1981_v62, %v1981_v62  ;;  %v3154_v12 = vld [vmem:[#allocation6 + $0x78] sm:$0xf]  ;;  %v3325_v14 = vld [vmem:[#allocation6 + $0x80] sm:$0xf0] }
 0x610   :  { %v3120_v62 = vld [vmem:[#allocation6 + $0x3c] sm:$0xf0] }
 0x611   :  { %1604 = vmatpush.bf16.msrb.mxu2 %v1593_v58 }
 0x615   :  { %1605 = vmatpush.bf16.msrb.mxu2 %v1592_v4  ;;  %v2027_v4 = vsel %vm851_vm11, %v2001_v9, 0  ;;  %v3106_v9 = vld [vmem:[#allocation6 + $0x18] sm:$0xf] }
 0x616   :  { %v1582_v7 = vld [vmem:[#allocation3 + $0x30] sm:$0xff]  ;;  %2036 = vmatpush.bf16.msrb.mxu0 %v2027_v4 }
 0x617   :  { %v1591_v17 = vpack.c.bf16 %v1582_v7, %v1581_v15  ;;  %v2030_v15 = vsel %vm851_vm11, %v2002_v10, 0  ;;  %v3155_v7 = vor.u32 %v3325_v14, %v3154_v12  ;;  %v3313_v10 = vld [vmem:[#allocation6 + $0x20] sm:$0xf0]  ;;  %v3312_v12 = vld [vmem:[#allocation6 + $0x1c] sm:$0xf] }
 0x618   :  { %v3107_v14 = vor.u32 %v3313_v10, %v3106_v9  ;;  %v3207_v9 = vld [vmem:[#allocation6 + $0x54] sm:$0xf0]  ;;  %v3213_v10 = vld [vmem:[#allocation6 + $0x50] sm:$0xf] }
 0x619   :  { %1606 = vmatpush.bf16.msrb.mxu2 %v1591_v17  ;;  %v3159_v17 = vor.u32 %v3324_v6, %v3156_v0  ;;  %v3114_v6 = vld [vmem:[#allocation6 + $0x20] sm:$0xf]  ;;  %v3314_v0 = vld [vmem:[#allocation6 + $0x28] sm:$0xf0] }
 0x61a   :  { %2037 = vmatpush.bf16.msrb.mxu0 %v3155_v7  ;;  %v3094_v7 = vld [vmem:[#allocation6] sm:$0xf] }
 0x61c   :  { %3070 = vmatmul.msk.bf16.vlgmr.msrb.gmra.mxu2 %vm570_vm10, %v3069_v18  ;;  %v3142_v18 = vld [vmem:[#allocation6 + $0x60] sm:$0xf] }
 0x61d   :  { %1698 = vmatpush.bf16.msra.mxu2 %v1691_v11 }
 0x621   :  { %1699 = vmatpush.bf16.msra.mxu2 %v3308_v13 }
 0x625   :  { %1700 = vmatpush.bf16.msra.mxu2 %v3307_v25 }
 0x629   :  { %2049 = vmatpush.bf16.msrb.mxu2 %v2030_v15  ;;  %v3115_v15 = vor.u32 %v3314_v0, %v3114_v6  ;;  %v3193_v0 = vld [vmem:[#allocation6 + $0x30] sm:$0xf] }
 0x62d   :  { %2050 = vmatpush.bf16.msrb.mxu2 %v3159_v17  ;;  %v3310_v17 = vld [vmem:[#allocation6 + $0x8] sm:$0xf0] }
 0x69f   :  { %v1608_v24 = vpop.f32.mrf.mxu2 }
 0x6a0   :  { %vm1612_vm1 = vcmp.ge.f32.partialorder %v1608_v24, 0.0  ;;  %v1613_v26 = vmul.f32 0.2, %v1608_v24 }
 0x6a2   :  { %v1614_v28 = vsel %vm1612_vm1, %v1608_v24, %v1613_v26  ;;  %vm1712_vm1 = vcmask 678912  }
 0x6a3   :  { %v1615_v29 = vpack.c.bf16 %v1614_v28, %v1614_v28  ;;  %v3143_v28 = vor.u32 %v3322_v19, %v3142_v18  ;;  %v3309_v18 = vld [vmem:[#allocation6 + $0x4] sm:$0xf]  ;;  %v3095_v19 = vor.u32 %v3310_v17, %v3094_v7  ;;  %v3195_v7 = vld [vmem:[#allocation6 + $0x3c] sm:$0xf0]  ;;  %v3201_v17 = vld [vmem:[#allocation6 + $0x38] sm:$0xf] }
 0x6a5   :  { %3079 = vmatmul.msk.bf16.vlgmr.msra.gmra.mxu1 %vm1636_vm15, %v1615_v29  ;;  %v1668_v31 = vunpack.c.l.b16 %v1615_v29  ;;  %v3147_v29 = vor.u32 %v3321_v20, %v3144_v21  ;;  %2038 = vmatpush.bf16.msrb.mxu0 %v3143_v28  ;;  %v3096_v20 = vld [vmem:[#allocation6 + $0xc] sm:$0xf0]  ;;  %v3102_v21 = vld [vmem:[#allocation6 + $0x8] sm:$0xf] }
 0x6a7   :  { %v1610_v32 = vpop.f32.mrf.mxu2  ;;  %v1669_v1 = vpack.c.b16 %v1668_v31, %v1668_v31  ;;  %v3130_v31 = vld [vmem:[#allocation6 + $0x48] sm:$0xf]  ;;  %2051 = vmatpush.bf16.msrb.mxu2 %v3147_v29 }
 0x6a9   :  { %1670 = vrot.lane.b32.xlu1 %v1669_v1, %s3442_s16 }
 0x71b   :  { %v1671_v2 = vpop.permute.xlu1 %1670 }
 0x71c   :  { %3088 = vmatmul.msk.bf16.vlgmr.msra.gmra.mxu2 %vm1636_vm15, %v1671_v2  ;;  %vm1805_vm15 = vcmask 875520   ;;  %v1982_v2 = vunpack.c.l.b16 %v1917_v22  ;;  %v3311_v22 = vld [vmem:[#allocation6 + $0x10] sm:$0xf0] }
 0x722   :  { %v1652_v3 = vpop.f32.mrf.mxu1 }
 0x723   :  { %1657 = vrot.lane.b32.xlu2 %v1652_v3, %s3466_s11  ;;  %v3319_v3 = vld [vmem:[#allocation6 + $0x50] sm:$0xf0] }
 0x72a   :  { %v1654_v33 = vpop.f32.mrf.mxu1 }
 0x72b   :  { %v3318_v33 = vld [vmem:[#allocation6 + $0x4c] sm:$0xf] }
 0x77d   :  { %v1658_v34 = vpop.permute.xlu2 %1657 }
 0x77e   :  { %1661 = vst.msk [vmem:[#allocation2] sm:$0xff] %vm1660_vm13, %v1658_v34  ;;  %v3132_v34 = vld [vmem:[#allocation6 + $0x54] sm:$0xf0]  ;;  %vm2083_vm13 = vcmask 154624  }
 0x79f   :  { %v1702_v36 = vpop.f32.mrf.mxu2 }
 0x7a0   :  { %1707 = vrot.lane.b32.xlu0 %v1702_v36, %s3467_s4 }
 0x7a7   :  { %v1704_v37 = vpop.f32.mrf.mxu2 }
 0x812   :  { %v1708_v38 = vpop.permute.xlu0 %1707 }
 0x813   :  { %1711 = vst.msk [vmem:[#allocation2] sm:$0xff] %vm1710_vm14, %v1708_v38  ;;  %vm2089_vm14 = vcmask 1047704  }
 0x814   :  { %1713 = vst.msk [vmem:[#allocation2 + $0x8] sm:$0xff] %vm1712_vm1, %v1708_v38  ;;  %v3131_v38 = vor.u32 %v3319_v3, %v3130_v31  ;;  %vm2092_vm1 = vcmask 711680  }
 0x816   :  { %2039 = vmatpush.bf16.msrb.mxu0 %v3131_v38 }
 0x81a   :  { %v4036_v39 = vld [vmem:[#allocation2] sm:$0xff] }
 0x81b   :  { %v1812_v30 = vld [vmem:[#allocation2 + $0x8] sm:$0xff]  ;;  %1815 = vrot.lane.b32.xlu1 %v4036_v39, %s3453_s10  ;;  %1788 = vrot.lane.b32.xlu0 %v4036_v39, %s3445_s19 }
 0x81c   :  { %1817 = vrot.lane.b32.xlu2 %v1812_v30, %s3453_s10  ;;  %1717 = vst.msk [vmem:[#allocation3 + $0x8] sm:$0xff] %vm1529_vm4, %v1812_v30  ;;  %s3469_s10 = smov 118  }
 0x823   :  { %1790 = vrot.lane.b32.xlu1 %v1812_v30, %s3445_s19  ;;  %1803 = vrot.lane.b32.xlu0 %v1812_v30, %s3468_s5 }
 0x824   :  { %1801 = vrot.lane.b32.xlu2 %v4036_v39, %s3468_s5 }
 0x82b   :  { %1775 = vrot.lane.b32.xlu0 %v4036_v39, %s3456_s28  ;;  %1762 = vrot.lane.b32.xlu1 %v4036_v39, %s3457_s0 }
 0x82c   :  { %1764 = vrot.lane.b32.xlu2 %v1812_v30, %s3457_s0 }
 0x833   :  { %1737 = vrot.lane.b32.xlu0 %v1812_v30, %s3446_s24  ;;  %1777 = vrot.lane.b32.xlu1 %v1812_v30, %s3456_s28 }
 0x834   :  { %1735 = vrot.lane.b32.xlu2 %v4036_v39, %s3446_s24 }
 0x83b   :  { %1748 = vrot.lane.b32.xlu1 %v4036_v39, %s3469_s10  ;;  %1722 = vrot.lane.b32.xlu0 %v4036_v39, %s3449_s26 }
 0x83c   :  { %1750 = vrot.lane.b32.xlu2 %v1812_v30, %s3469_s10 }
 0x843   :  { %1724 = vrot.lane.b32.xlu1 %v1812_v30, %s3449_s26  ;;  %v3135_v30 = vor.u32 %v3318_v33, %v3132_v34 }
 0x845   :  { %2052 = vmatpush.bf16.msrb.mxu2 %v3135_v30 }
 0x876   :  { %v1818_v40 = vpop.permute.xlu2 %1817 }
 0x877   :  { %1823 = vst.msk [vmem:[#allocation3 + $0x188] sm:$0xff] %vm1529_vm4, %v1818_v40 }
 0x87e   :  { %v1802_v41 = vpop.permute.xlu2 %1801  ;;  %v1843_v42 = vld [vmem:[#allocation3 + $0x188] sm:$0xff] }
 0x87f   :  { %v1855_v43 = vpack.c.bf16 %v3976_v35, %v1843_v42 }
 0x881   :  { %1875 = vmatpush.bf16.msrb.mxu1 %v1855_v43 }
 0x886   :  { %v1765_v16 = vpop.permute.xlu2 %1764 }
 0x887   :  { %1770 = vst.msk [vmem:[#allocation3 + $0xc8] sm:$0xff] %vm1529_vm4, %v1765_v16 }
 0x88d   :  { %v1816_v44 = vpop.permute.xlu1 %1815  ;;  %v1789_v45 = vpop.permute.xlu0 %1788 }
 0x88e   :  { %v1819_v46 = vsel %vm1223_vm12, %v1816_v44, %v1818_v40  ;;  %v1736_v23 = vpop.permute.xlu2 %1735  ;;  %vm1752_vm12 = vcmask 965632   ;;  %v1835_v24 = vld [vmem:[#allocation3 + $0xc8] sm:$0xff] }
 0x88f   :  { %v1854_v47 = vpack.c.bf16 %v3969_v27, %v1819_v46  ;;  %v3162_v46 = vld [vmem:[#allocation6 + $0x80] sm:$0xf] }
 0x891   :  { %1862 = vmatpush.bf16.msra.mxu3 %v1854_v47  ;;  %v3089_v47 = vld [vmem:[%s4339_s1 + $0xc] sm:$0xf] }
 0x895   :  { %v1791_v48 = vpop.permute.xlu1 %1790  ;;  %v1804_v49 = vpop.permute.xlu0 %1803 }
 0x896   :  { %v1792_v50 = vsel %vm335_vm5, %v1789_v45, %v1791_v48  ;;  %1796 = vst.msk [vmem:[#allocation3 + $0x128] sm:$0xff] %vm1529_vm4, %v1791_v48  ;;  %v1806_v35 = vsel %vm1805_vm15, %v1802_v41, %v1804_v49  ;;  %v1751_v51 = vpop.permute.xlu2 %1750  ;;  %v2003_v41 = vpack.c.b16 %v1982_v2, %v1982_v2  ;;  %vm129_vm15 = vcmask 375808  }
 0x897   :  { %1810 = vst.msk [vmem:[#allocation3 + $0x158] sm:$0xff] %vm1529_vm4, %v1804_v49  ;;  %v1852_v53 = vpack.c.bf16 %v1806_v35, %v1792_v50  ;;  %v3150_v49 = vld [vmem:[#allocation6 + $0x68] sm:$0xf]  ;;  %v3323_v50 = vld [vmem:[#allocation6 + $0x70] sm:$0xf0] }
 0x898   :  { %1757 = vst.msk [vmem:[#allocation3 + $0x98] sm:$0xff] %vm1529_vm4, %v1751_v51  ;;  %v2033_v45 = vsel %vm851_vm11, %v2003_v41, 0  ;;  %v1827_v35 = vld [vmem:[#allocation3 + $0x8] sm:$0xff] }
 0x899   :  { %1863 = vmatpush.bf16.msra.mxu3 %v1852_v53  ;;  %130 = vst.msk [vmem:[#allocation2 + $0x28] sm:$0xff] %vm129_vm15, %v3448_v5 }
 0x89d   :  { %v1776_v54 = vpop.permute.xlu0 %1775  ;;  %v1763_v52 = vpop.permute.xlu1 %1762  ;;  %v1839_v56 = vld [vmem:[#allocation3 + $0x128] sm:$0xff] }
 0x89e   :  { %v1841_v27 = vld [vmem:[#allocation3 + $0x158] sm:$0xff]  ;;  %v1766_v8 = vsel %vm1177_vm0, %v1763_v52, %v1765_v16  ;;  %vm2022_vm0 = vcmask 818176  }
 0x89f   :  { %v1853_v57 = vpack.c.bf16 %v1841_v27, %v1839_v56  ;;  %v1833_v37 = vld [vmem:[#allocation3 + $0x98] sm:$0xff]  ;;  %v3118_v27 = vld [vmem:[#allocation6 + $0x30] sm:$0xf] }
 0x8a0   :  { %v3320_v52 = vld [vmem:[#allocation6 + $0x58] sm:$0xf0] }
 0x8a1   :  { %1876 = vmatpush.bf16.msrb.mxu1 %v1853_v57  ;;  %v3316_v57 = vld [vmem:[#allocation6 + $0x38] sm:$0xf0] }
 0x8a2   :  { %v3119_v61 = vor.u32 %v3316_v57, %v3118_v27  ;;  %v3219_v57 = vld [vmem:[#allocation6 + $0x6c] sm:$0xf0] }
 0x8a4   :  { %2040 = vmatpush.bf16.msrb.mxu0 %v3119_v61  ;;  %v3341_v61 = vld [vmem:[#allocation6 + $0x70] sm:$0xf0] }
 0x8a5   :  { %v1738_v55 = vpop.permute.xlu0 %1737  ;;  %v1778_v63 = vpop.permute.xlu1 %1777 }
 0x8a6   :  { %1743 = vst.msk [vmem:[#allocation3 + $0x68] sm:$0xff] %vm1529_vm4, %v1738_v55  ;;  %v1779_v59 = vsel %vm1191_vm8, %v1776_v54, %v1778_v63  ;;  %v1739_v13 = vsel %vm209_vm7, %v1736_v23, %v1738_v55  ;;  %v3326_v23 = vld [vmem:[#allocation6 + $0x88] sm:$0xf0]  ;;  %v3138_v54 = vld [vmem:[#allocation6 + $0x50] sm:$0xf] }
 0x8a7   :  { %1783 = vst.msk [vmem:[#allocation3 + $0xf8] sm:$0xff] %vm1529_vm4, %v1778_v63  ;;  %v1850_v58 = vpack.c.bf16 %v1779_v59, %v1766_v8  ;;  %v3163_v48 = vor.u32 %v3326_v23, %v3162_v46  ;;  %v3139_v56 = vor.u32 %v3320_v52, %v3138_v54  ;;  %v3126_v55 = vld [vmem:[#allocation6 + $0x38] sm:$0xf]  ;;  %v3317_v63 = vld [vmem:[#allocation6 + $0x40] sm:$0xf0]  ;;  %v3123_v8 = vor.u32 %v3315_v60, %v3120_v62 }
 0x8a8   :  { %v3127_v59 = vor.u32 %v3317_v63, %v3126_v55  ;;  %2041 = vmatpush.bf16.msrb.mxu0 %v3107_v14  ;;  %v3229_v23 = vld [vmem:[#allocation6 + $0x78] sm:$0xf]  ;;  %v3217_v54 = vld [vmem:[#allocation6 + $0x60] sm:$0xf]  ;;  %v3340_v52 = vld [vmem:[#allocation6 + $0x68] sm:$0xf0] }
 0x8a9   :  { %1864 = vmatpush.bf16.msra.mxu3 %v1850_v58  ;;  %2053 = vmatpush.bf16.msrb.mxu2 %v3123_v8  ;;  %v3108_v58 = vld [vmem:[#allocation6 + $0x24] sm:$0xf0]  ;;  %v3218_v27 = vor.u32 %v3340_v52, %v3217_v54  ;;  %v3337_v8 = vld [vmem:[#allocation6 + $0x50] sm:$0xf0] }
 0x8aa   :  { %v3111_v4 = vor.u32 %v3312_v12, %v3108_v58  ;;  %v3225_v60 = vld [vmem:[#allocation6 + $0x68] sm:$0xf]  ;;  %v3338_v12 = vld [vmem:[#allocation6 + $0x58] sm:$0xf0] }
 0x8ab   :  { %v3226_v55 = vor.u32 %v3341_v61, %v3225_v60  ;;  %v3205_v63 = vld [vmem:[#allocation6 + $0x48] sm:$0xf]  ;;  %v3214_v6 = vor.u32 %v3338_v12, %v3213_v10  ;;  %v2703_v12 = vld [vmem:[#allocation3 + $0x1b0] sm:$0xff] }
 0x8ac   :  { %2042 = vmatpush.bf16.msrb.mxu0 %v3095_v19  ;;  %v3206_v14 = vor.u32 %v3337_v8, %v3205_v63 }
 0x8ad   :  { %v1749_v11 = vpop.permute.xlu1 %1748  ;;  %v1831_v36 = vld [vmem:[#allocation3 + $0x68] sm:$0xff]  ;;  %v1723_v42 = vpop.permute.xlu0 %1722  ;;  %2054 = vmatpush.bf16.msrb.mxu2 %v3111_v4  ;;  %v3334_v4 = vld [vmem:[#allocation6 + $0x38] sm:$0xf0] }
 0x8ae   :  { %v1753_v25 = vsel %vm1752_vm12, %v1749_v11, %v1751_v51  ;;  %v1837_v26 = vld [vmem:[#allocation3 + $0xf8] sm:$0xff]  ;;  %v1849_v40 = vpack.c.bf16 %v1833_v37, %v1831_v36  ;;  %v3099_v11 = vor.u32 %v3309_v18, %v3096_v20  ;;  %v3335_v18 = vld [vmem:[#allocation6 + $0x40] sm:$0xf0]  ;;  %v3194_v19 = vor.u32 %v3334_v4, %v3193_v0 }
 0x8af   :  { %v1851_v32 = vpack.c.bf16 %v1837_v26, %v1835_v24  ;;  %v1848_v1 = vpack.c.bf16 %v1753_v25, %v1739_v13  ;;  %v3103_v13 = vor.u32 %v3311_v22, %v3102_v21  ;;  %v2118_v25 = vld [vmem:[#allocation6 + $0x90] sm:$0x33]  ;;  %v2119_v24 = vld [vmem:[#allocation6 + $0x98] sm:$0x3]  ;;  %v3202_v21 = vor.u32 %v3335_v18, %v3201_v17 }
 0x8b0   :  { %v2193_v26 = vunpack.c.l.b16 %v2118_v25  ;;  %v2194_v28 = vunpack.c.h.b16 %v2118_v25  ;;  %v2195_v29 = vunpack.c.l.b16 %v2119_v24  ;;  %v3181_v22 = vld [vmem:[#allocation6 + $0x18] sm:$0xf]  ;;  %v3183_v25 = vld [vmem:[#allocation6 + $0x24] sm:$0xf0]  ;;  %v3189_v24 = vld [vmem:[#allocation6 + $0x20] sm:$0xf] }
 0x8b1   :  { %1877 = vmatpush.bf16.msrb.mxu1 %v1851_v32  ;;  %1865 = vmatpush.bf16.msra.mxu3 %v1848_v1  ;;  %vm2301_vm12 = vcmask 1048248  }
 0x8b2   :  { %2055 = vmatpush.bf16.msrb.mxu2 %v3099_v11  ;;  %v2214_v31 = vpack.c.b16 %v2193_v26, %v2193_v26  ;;  %v2215_v32 = vpack.c.b16 %v2194_v28, %v2194_v28  ;;  %v2216_v1 = vpack.c.b16 %v2195_v29, %v2195_v29  ;;  %v3331_v11 = vld [vmem:[#allocation6 + $0x20] sm:$0xf0]  ;;  %v3332_v26 = vld [vmem:[#allocation6 + $0x28] sm:$0xf0] }
 0x8b3   :  { %v3182_v28 = vor.u32 %v3331_v11, %v3181_v22 }
 0x8b4   :  { %v2239_v2 = vsel %vm851_vm11, %v2214_v31, 0  ;;  %v2242_v3 = vsel %vm851_vm11, %v2215_v32, 0  ;;  %v2245_v33 = vsel %vm851_vm11, %v2216_v1, 0  ;;  %v3190_v31 = vor.u32 %v3332_v26, %v3189_v24  ;;  %v3169_v32 = vld [vmem:[#allocation6] sm:$0xf] }
 0x8b5   :  { %1878 = vmatpush.bf16.msrb.mxu1 %v1849_v40  ;;  %v1725_v43 = vpop.permute.xlu1 %1724  ;;  %2261 = vmatpush.bf16.msra.mxu0 %v2242_v3  ;;  %v3328_v1 = vld [vmem:[#allocation6 + $0x8] sm:$0xf0]  ;;  %v3171_v3 = vld [vmem:[#allocation6 + $0xc] sm:$0xf0]  ;;  %vm2129_vm11 = vcmask 228352  }
 0x8b6   :  { %v1726_v16 = vsel %vm167_vm9, %v1723_v42, %v1725_v43  ;;  %1730 = vst.msk [vmem:[#allocation3 + $0x38] sm:$0xff] %vm1529_vm4, %v1725_v43  ;;  %2274 = vmatpush.bf16.msra.mxu2 %v2245_v33  ;;  %v3177_v33 = vld [vmem:[#allocation6 + $0x8] sm:$0xf] }
 0x8b7   :  { %v1846_v44 = vpack.c.bf16 %v1726_v16, %v4036_v39  ;;  %v3151_v39 = vor.u32 %v3323_v50, %v3150_v49  ;;  %v3231_v50 = vld [vmem:[#allocation6 + $0x84] sm:$0xf0] }
 0x8b9   :  { %1866 = vmatpush.bf16.msra.mxu3 %v1846_v44 }
 0x8bc   :  { %3090 = vmatmul.msk.bf16.vlgmr.msra.gmra.mxu3 %vm570_vm10, %v3089_v47 }
 0x8bd   :  { %2062 = vmatpush.bf16.msrb.mxu3 %v2033_v45  ;;  %v1829_v51 = vld [vmem:[#allocation3 + $0x38] sm:$0xff] }
 0x8be   :  { %v1847_v53 = vpack.c.bf16 %v1829_v51, %v1827_v35  ;;  %v3237_v35 = vld [vmem:[#allocation6 + $0x80] sm:$0xf]  ;;  %v3344_v51 = vld [vmem:[#allocation6 + $0x88] sm:$0xf0] }
 0x8c0   :  { %1879 = vmatpush.bf16.msrb.mxu1 %v1847_v53 }
 0x8c1   :  { %2063 = vmatpush.bf16.msrb.mxu3 %v3163_v48  ;;  %v3342_v48 = vld [vmem:[#allocation6 + $0x7c] sm:$0xf] }
 0x8c2   :  { %v3234_v53 = vor.u32 %v3342_v48, %v3231_v50 }
 0x8c3   :  { %3091 = vmatmul.msk.bf16.vlgmr.msrb.gmra.mxu1 %vm570_vm10, %v3089_v47  ;;  %v3343_v47 = vld [vmem:[#allocation6 + $0x80] sm:$0xf0] }
 0x8c4   :  { %2248 = vmatpush.bf16.msra.mxu1 %v2239_v2  ;;  %v3230_v49 = vor.u32 %v3343_v47, %v3229_v23  ;;  %2262 = vmatpush.bf16.msra.mxu0 %v3234_v53  ;;  %v3327_v2 = vld [vmem:[#allocation6 + $0x4] sm:$0xf] }
 0x8c5   :  { %2064 = vmatpush.bf16.msrb.mxu3 %v3151_v39  ;;  %v3238_v39 = vor.u32 %v3344_v51, %v3237_v35 }
 0x8c7   :  { %2275 = vmatpush.bf16.msra.mxu2 %v3238_v39 }
 0x8c8   :  { %2249 = vmatpush.bf16.msra.mxu1 %v3230_v49 }
 0x8c9   :  { %2065 = vmatpush.bf16.msrb.mxu3 %v3139_v56  ;;  %v3339_v56 = vld [vmem:[#allocation6 + $0x64] sm:$0xf] }
 0x8ca   :  { %v3222_v62 = vor.u32 %v3339_v56, %v3219_v57 }
 0x8cb   :  { %2276 = vmatpush.bf16.msra.mxu2 %v3226_v55 }
 0x8cc   :  { %2250 = vmatpush.bf16.msra.mxu1 %v3218_v27  ;;  %2263 = vmatpush.bf16.msra.mxu0 %v3222_v62 }
 0x8cd   :  { %2066 = vmatpush.bf16.msrb.mxu3 %v3127_v59  ;;  %v3336_v59 = vld [vmem:[#allocation6 + $0x4c] sm:$0xf] }
 0x8ce   :  { %v3210_v58 = vor.u32 %v3336_v59, %v3207_v9 }
 0x8cf   :  { %2277 = vmatpush.bf16.msra.mxu2 %v3214_v6 }
 0x8d0   :  { %2251 = vmatpush.bf16.msra.mxu1 %v3206_v14  ;;  %2264 = vmatpush.bf16.msra.mxu0 %v3210_v58 }
 0x8d1   :  { %2067 = vmatpush.bf16.msrb.mxu3 %v3115_v15  ;;  %v3333_v15 = vld [vmem:[#allocation6 + $0x34] sm:$0xf] }
 0x8d2   :  { %v3198_v20 = vor.u32 %v3333_v15, %v3195_v7 }
 0x8d3   :  { %2278 = vmatpush.bf16.msra.mxu2 %v3202_v21 }
 0x8d4   :  { %2252 = vmatpush.bf16.msra.mxu1 %v3194_v19  ;;  %2265 = vmatpush.bf16.msra.mxu0 %v3198_v20 }
 0x8d5   :  { %2068 = vmatpush.bf16.msrb.mxu3 %v3103_v13  ;;  %v3330_v13 = vld [vmem:[#allocation6 + $0x1c] sm:$0xf] }
 0x8d6   :  { %v3186_v29 = vor.u32 %v3330_v13, %v3183_v25 }
 0x8d7   :  { %2279 = vmatpush.bf16.msra.mxu2 %v3190_v31 }
 0x8d8   :  { %2253 = vmatpush.bf16.msra.mxu1 %v3182_v28  ;;  %2266 = vmatpush.bf16.msra.mxu0 %v3186_v29 }
 0x93f   :  { %v1868_v34 = vpop.f32.mrf.mxu3 }
 0x940   :  { %v1881_v36 = vpop.f32.mrf.mxu1  ;;  %vm1885_vm4 = vcmp.ge.f32.partialorder %v1868_v34, 0.0  ;;  %v1887_v37 = vmul.f32 0.2, %v1868_v34 }
 0x941   :  { %vm1886_vm8 = vcmp.ge.f32.partialorder %v1881_v36, 0.0  ;;  %v1888_v38 = vmul.f32 0.2, %v1881_v36 }
 0x942   :  { %v1889_v30 = vsel %vm1885_vm4, %v1868_v34, %v1887_v37  ;;  %v3329_v34 = vld [vmem:[#allocation6 + $0x10] sm:$0xf0]  ;;  %v3174_v37 = vor.u32 %v3327_v2, %v3171_v3  ;;  %vm2305_vm4 = vcmask 220160  }
 0x943   :  { %v1890_v40 = vsel %vm1886_vm8, %v1881_v36, %v1888_v38  ;;  %v3170_v36 = vor.u32 %v3328_v1, %v3169_v32  ;;  %v3178_v38 = vor.u32 %v3329_v34, %v3177_v33  ;;  %vm4350_vm8 = vcmask 891904  }
 0x944   :  { %v1891_v41 = vpack.c.bf16 %v1890_v40, %v1889_v30  ;;  %2267 = vmatpush.bf16.msra.mxu0 %v3174_v37  ;;  %v2704_v37 = vld [vmem:[#allocation3 + $0x1b8] sm:$0xff] }
 0x945   :  { %2254 = vmatpush.bf16.msra.mxu1 %v3170_v36  ;;  %2280 = vmatpush.bf16.msra.mxu2 %v3178_v38 }
 0x946   :  { %3164 = vmatmul.msk.bf16.vlgmr.msrb.gmra.mxu0 %vm2022_vm0, %v1891_v41  ;;  %3165 = vmatmul.msk.bf16.vlgmr.msrb.gmra.mxu2 %vm2022_vm0, %v1891_v41  ;;  %v2122_v42 = vunpack.c.h.b16 %v1891_v41  ;;  %v2121_v43 = vunpack.c.l.b16 %v1891_v41 }
 0x947   :  { %3166 = vmatmul.msk.bf16.vlgmr.msrb.gmra.mxu3 %vm2022_vm0, %v1891_v41  ;;  %v1870_v16 = vpop.f32.mrf.mxu3 }
 0x948   :  { %v1883_v44 = vpop.f32.mrf.mxu1  ;;  %v2124_v45 = vpack.c.b16 %v2122_v42, %v2122_v42  ;;  %v2123_v46 = vpack.c.b16 %v2121_v43, %v2121_v43 }
 0x94a   :  { %2127 = vrot.lane.b32.xlu0 %v2124_v45, %s3470_s12  ;;  %2125 = vrot.lane.b32.xlu2 %v2123_v46, %s3470_s12 }
 0x9a4   :  { %v2126_v30 = vpop.permute.xlu2 %2125 }
 0x9bc   :  { %v2128_v40 = vpop.permute.xlu0 %2127 }
 0x9bd   :  { %v2130_v41 = vsel %vm2129_vm11, %v2126_v30, %v2128_v40  ;;  %vm4352_vm11 = vcmask 900096  }
 0x9be   :  { %3239 = vmatmul.msk.bf16.vlgmr.msra.gmra.mxu1 %vm2022_vm0, %v2130_v41  ;;  %3240 = vmatmul.msk.bf16.vlgmr.msra.gmra.mxu0 %vm2022_vm0, %v2130_v41 }
 0x9bf   :  { %3241 = vmatmul.msk.bf16.vlgmr.msra.gmra.mxu2 %vm2022_vm0, %v2130_v41  ;;  %vm4351_vm0 = vcmask 752640  }
 0x9c0   :  { %vm4356_vm15 = vmmov %vm4351_vm0 }
 0x9c3   :  { %v2044_v42 = vpop.f32.mrf.mxu0 }
 0x9c4   :  { %2077 = vrot.lane.b32.xlu1 %v2044_v42, %s3471_s13 }
 0x9c9   :  { %v2057_v43 = vpop.f32.mrf.mxu2 }
 0x9ca   :  { %v2070_v16 = vpop.f32.mrf.mxu3  ;;  %2079 = vrot.lane.b32.xlu2 %v2057_v43, %s3471_s13 }
 0x9cb   :  { %2081 = vrot.lane.b32.xlu0 %v2070_v16, %s3471_s13  ;;  %v2046_v44 = vpop.f32.mrf.mxu0 }
 0x9d1   :  { %v2059_v45 = vpop.f32.mrf.mxu2 }
 0x9d2   :  { %v2072_v46 = vpop.f32.mrf.mxu3 }
 0xa24   :  { %v2080_v23 = vpop.permute.xlu2 %2079 }
 0xa36   :  { %v2078_v47 = vpop.permute.xlu1 %2077 }
 0xa37   :  { %v4093_v48 = vsel %vm2083_vm13, %v2078_v47, %v2080_v23  ;;  %2090 = vst.msk [vmem:[#allocation2] sm:$0xff] %vm2089_vm14, %v2078_v47  ;;  %vm4354_vm14 = vmmov %vm4351_vm0 }
 0xa38   :  { %2091 = vst [vmem:[#allocation2 + $0x8] sm:$0xff] %v4093_v48 }
 0xa39   :  { %2314 = vst [vmem:[#allocation3 + $0x8] sm:$0xff] %v4093_v48 }
 0xa3b   :  { %v2256_v49 = vpop.f32.mrf.mxu1  ;;  %v2269_v50 = vpop.f32.mrf.mxu0 }
 0xa3c   :  { %2289 = vrot.lane.b32.xlu1 %v2256_v49, %s3472_s14  ;;  %2291 = vrot.lane.b32.xlu2 %v2269_v50, %s3472_s14 }
 0xa3d   :  { %v2082_v35 = vpop.permute.xlu0 %2081 }
 0xa3e   :  { %v2085_v51 = vsel %vm2083_vm13, %v2080_v23, %v2082_v35  ;;  %v4097_v53 = vld [vmem:[#allocation2] sm:$0xff]  ;;  %vm4353_vm13 = vmmov %vm4352_vm11 }
 0xa3f   :  { %2536 = vrot.lane.b32.xlu0 %v4097_v53, %s3442_s16  ;;  %2093 = vst.msk [vmem:[#allocation2 + $0x10] sm:$0xff] %vm2092_vm1, %v2085_v51 }
 0xa40   :  { %2313 = vst [vmem:[#allocation3] sm:$0xff] %v4097_v53 }
 0xa42   :  { %v2282_v39 = vpop.f32.mrf.mxu2 }
 0xa43   :  { %v2258_v54 = vpop.f32.mrf.mxu1  ;;  %v2271_v52 = vpop.f32.mrf.mxu0 }
 0xa44   :  { %2618 = vrot.lane.b32.xlu1 %v4097_v53, %s3441_s15  ;;  %2577 = vrot.lane.b32.xlu2 %v4097_v53, %s3443_s17 }
 0xa47   :  { %2293 = vrot.lane.b32.xlu0 %v2282_v39, %s3472_s14 }
 0xa4a   :  { %v2284_v56 = vpop.f32.mrf.mxu2 }
 0xa4c   :  { %2495 = vrot.lane.b32.xlu1 %v4097_v53, %s3445_s19  ;;  %2454 = vrot.lane.b32.xlu2 %v4097_v53, %s3444_s18 }
 0xa4f   :  { %2579 = vrot.lane.b32.xlu0 %v4093_v48, %s3443_s17 }
 0xa54   :  { %2413 = vrot.lane.b32.xlu1 %v4097_v53, %s3447_s25  ;;  %2372 = vrot.lane.b32.xlu2 %v4097_v53, %s3446_s24 }
 0xa57   :  { %2456 = vrot.lane.b32.xlu0 %v4093_v48, %s3444_s18 }
 0xa5c   :  { %2538 = vrot.lane.b32.xlu1 %v4093_v48, %s3442_s16  ;;  %2331 = vrot.lane.b32.xlu2 %v4097_v53, %s3449_s26 }
 0xa5f   :  { %2374 = vrot.lane.b32.xlu0 %v4093_v48, %s3446_s24 }
 0xa64   :  { %2620 = vrot.lane.b32.xlu2 %v4093_v48, %s3441_s15 }
 0xa67   :  { %2333 = vrot.lane.b32.xlu0 %v4093_v48, %s3449_s26 }
 0xa6c   :  { %2497 = vrot.lane.b32.xlu2 %v4093_v48, %s3445_s19 }
 0xa74   :  { %2415 = vrot.lane.b32.xlu2 %v4093_v48, %s3447_s25 }
 0xa96   :  { %v2292_v27 = vpop.permute.xlu2 %2291 }
 0xa9e   :  { %v2578_v57 = vpop.permute.xlu2 %2577 }
 0xaa6   :  { %v2455_v60 = vpop.permute.xlu2 %2454 }
 0xaae   :  { %v2290_v61 = vpop.permute.xlu1 %2289  ;;  %v2373_v62 = vpop.permute.xlu2 %2372 }
 0xaaf   :  { %v4135_v55 = vsel %vm2092_vm1, %v2290_v61, %v2292_v27  ;;  %2302 = vst.msk [vmem:[#allocation2 + $0x10] sm:$0xff] %vm2301_vm12, %v2290_v61 }
 0xab1   :  { %v2537_v63 = vpop.permute.xlu0 %2536 }
 0xab6   :  { %v4137_v8 = vld [vmem:[#allocation2 + $0x10] sm:$0xff]  ;;  %v2619_v59 = vpop.permute.xlu1 %2618  ;;  %v2332_v9 = vpop.permute.xlu2 %2331 }
 0xab7   :  { %2622 = vrot.lane.b32.xlu1 %v4137_v8, %s3441_s15  ;;  %2540 = vrot.lane.b32.xlu0 %v4137_v8, %s3442_s16 }
 0xab8   :  { %2417 = vrot.lane.b32.xlu2 %v4137_v8, %s3447_s25 }
 0xab9   :  { %v2294_v5 = vpop.permute.xlu0 %2293 }
 0xaba   :  { %v4146_v10 = vsel %vm2092_vm1, %v2292_v27, %v2294_v5  ;;  %2306 = vst.msk [vmem:[#allocation2 + $0x28] sm:$0xff] %vm2305_vm4, %v2294_v5  ;;  %vm4355_vm1 = vmmov %vm4350_vm8 }
 0xabb   :  { %vm4357_vm12 = vmmov %vm4355_vm1 }
 0xabc   :  { %vm4358_vm4 = vmmov %vm4355_vm1 }
 0xabe   :  { %v2496_v14 = vpop.permute.xlu1 %2495  ;;  %v4148_v58 = vpop.permute.xlu2 %2620 }
 0xabf   :  { %v2630_v6 = vsel %vm461_vm2, %v2619_v59, %v4148_v58  ;;  %2581 = vrot.lane.b32.xlu1 %v4137_v8, %s3443_s17  ;;  %2458 = vrot.lane.b32.xlu0 %v4137_v8, %s3444_s18  ;;  %v2705_v59 = vld [vmem:[#allocation3 + $0x1c0] sm:$0xff] }
 0xac0   :  { %2641 = vst [vmem:[#allocation3 + $0x180] sm:$0xff] %v2630_v6  ;;  %2583 = vrot.lane.b32.xlu2 %v4135_v55, %s3443_s17  ;;  %v2733_v0 = vpack.c.bf16 %v2703_v12, %v2630_v6 }
 0xac1   :  { %v2312_v4 = vld [vmem:[#allocation2 + $0x28] sm:$0xff]  ;;  %v4158_v15 = vpop.permute.xlu0 %2579 }
 0xac2   :  { %2318 = vst.msk [vmem:[#allocation3 + $0x28] sm:$0xff] %vm61_vm6, %v2312_v4  ;;  %v2589_v7 = vsel %vm419_vm3, %v2578_v57, %v4158_v15  ;;  %2745 = vmatpush.bf16.msra.mxu3 %v2733_v0 }
 0xac3   :  { %2600 = vst [vmem:[#allocation3 + $0x150] sm:$0xff] %v2589_v7 }
 0xac6   :  { %v2414_v17 = vpop.permute.xlu1 %2413  ;;  %v4163_v18 = vpop.permute.xlu2 %2497 }
 0xac7   :  { %v2507_v19 = vsel %vm335_vm5, %v2496_v14, %v4163_v18  ;;  %2499 = vrot.lane.b32.xlu1 %v4137_v8, %s3445_s19  ;;  %2335 = vrot.lane.b32.xlu0 %v4137_v8, %s3449_s26 }
 0xac8   :  { %2518 = vst [vmem:[#allocation3 + $0xf0] sm:$0xff] %v2507_v19  ;;  %2587 = vrot.lane.b32.xlu2 %v2312_v4, %s3443_s17 }
 0xac9   :  { %v4172_v20 = vpop.permute.xlu0 %2456 }
 0xaca   :  { %v2466_v21 = vsel %vm4350_vm8, %v2455_v60, %v4172_v20  ;;  %vm4359_vm8 = vmmov %vm4355_vm1 }
 0xacb   :  { %2477 = vst [vmem:[#allocation3 + $0xc0] sm:$0xff] %v2466_v21  ;;  %v2721_v29 = vpack.c.bf16 %v2507_v19, %v2466_v21 }
 0xace   :  { %v2539_v22 = vpop.permute.xlu1 %2538  ;;  %v2416_v11 = vpop.permute.xlu2 %2415 }
 0xacf   :  { %v2548_v13 = vsel %vm4351_vm0, %v2537_v63, %v2539_v22  ;;  %v2425_v25 = vsel %vm4352_vm11, %v2414_v17, %v2416_v11  ;;  %2376 = vrot.lane.b32.xlu1 %v4137_v8, %s3446_s24  ;;  %2542 = vrot.lane.b32.xlu0 %v4135_v55, %s3442_s16  ;;  %vm4360_vm0 = vmmov %vm4352_vm11 }
 0xad0   :  { %2559 = vst [vmem:[#allocation3 + $0x120] sm:$0xff] %v2548_v13  ;;  %2464 = vrot.lane.b32.xlu2 %v2312_v4, %s3444_s18  ;;  %v2727_v24 = vpack.c.bf16 %v2589_v7, %v2548_v13  ;;  %v2707_v13 = vld [vmem:[#allocation3 + $0x1d0] sm:$0xff]  ;;  %vm4364_vm11 = vmmov %vm4360_vm0 }
 0xad1   :  { %2436 = vst [vmem:[#allocation3 + $0x90] sm:$0xff] %v2425_v25  ;;  %v4183_v26 = vpop.permute.xlu0 %2374 }
 0xad2   :  { %v2384_v28 = vsel %vm209_vm7, %v2373_v62, %v4183_v26  ;;  %2746 = vmatpush.bf16.msra.mxu3 %v2727_v24 }
 0xad3   :  { %2395 = vst [vmem:[#allocation3 + $0x60] sm:$0xff] %v2384_v28  ;;  %v2715_v31 = vpack.c.bf16 %v2425_v25, %v2384_v28 }
 0xad6   :  { %2747 = vmatpush.bf16.msra.mxu3 %v2721_v29 }
 0xad7   :  { %2624 = vrot.lane.b32.xlu1 %v4135_v55, %s3441_s15  ;;  %2501 = vrot.lane.b32.xlu0 %v4135_v55, %s3445_s19 }
 0xad8   :  { %2382 = vrot.lane.b32.xlu2 %v2312_v4, %s3446_s24 }
 0xad9   :  { %v2334_v32 = vpop.permute.xlu0 %2333 }
 0xada   :  { %v2343_v1 = vsel %vm167_vm9, %v2332_v9, %v2334_v32  ;;  %2748 = vmatpush.bf16.msra.mxu3 %v2715_v31  ;;  %v2706_v9 = vld [vmem:[#allocation3 + $0x1c8] sm:$0xff] }
 0xadb   :  { %2354 = vst [vmem:[#allocation3 + $0x30] sm:$0xff] %v2343_v1  ;;  %v2709_v2 = vpack.c.bf16 %v2343_v1, %v4097_v53  ;;  %v2708_v1 = vld [vmem:[#allocation3 + $0x1d8] sm:$0xff] }
 0xade   :  { %2749 = vmatpush.bf16.msra.mxu3 %v2709_v2 }
 0xadf   :  { %2460 = vrot.lane.b32.xlu1 %v4135_v55, %s3444_s18  ;;  %2419 = vrot.lane.b32.xlu0 %v4135_v55, %s3447_s25 }
 0xae0   :  { %2626 = vrot.lane.b32.xlu2 %v4146_v10, %s3441_s15 }
 0xae7   :  { %2628 = vrot.lane.b32.xlu0 %v2312_v4, %s3441_s15  ;;  %2378 = vrot.lane.b32.xlu1 %v4135_v55, %s3446_s24 }
 0xae8   :  { %2462 = vrot.lane.b32.xlu2 %v4146_v10, %s3444_s18 }
 0xaef   :  { %2505 = vrot.lane.b32.xlu0 %v2312_v4, %s3445_s19  ;;  %2546 = vrot.lane.b32.xlu1 %v2312_v4, %s3442_s16 }
 0xaf0   :  { %2380 = vrot.lane.b32.xlu2 %v4146_v10, %s3446_s24 }
 0xaf7   :  { %2585 = vrot.lane.b32.xlu0 %v4146_v10, %s3443_s17  ;;  %2544 = vrot.lane.b32.xlu1 %v4146_v10, %s3442_s16 }
 0xaf8   :  { %2339 = vrot.lane.b32.xlu2 %v4146_v10, %s3449_s26 }
 0xaff   :  { %2423 = vrot.lane.b32.xlu0 %v2312_v4, %s3447_s25  ;;  %2503 = vrot.lane.b32.xlu1 %v4146_v10, %s3445_s19 }
 0xb07   :  { %2341 = vrot.lane.b32.xlu0 %v2312_v4, %s3449_s26  ;;  %2421 = vrot.lane.b32.xlu1 %v4146_v10, %s3447_s25 }
 0xb0f   :  { %2337 = vrot.lane.b32.xlu1 %v4135_v55, %s3449_s26 }
 0xb12   :  { %v4223_v3 = vpop.permute.xlu2 %2417 }
 0xb13   :  { %v2426_v33 = vsel %vm4353_vm13, %v2416_v11, %v4223_v3  ;;  %v4276_v11 = vld [vmem:[%s4339_s1 + $0x10] sm:$0xf] }
 0xb14   :  { %2437 = vst [vmem:[#allocation3 + $0x98] sm:$0xff] %v2426_v33  ;;  %3243 = vmatmul.msk.bf16.vlgmr.msra.gmra.mxu3 %vm570_vm10, %v4276_v11 }
 0xb1a   :  { %v4227_v34 = vpop.permute.xlu2 %2583 }
 0xb22   :  { %v4229_v36 = vpop.permute.xlu2 %2587 }
 0xb23   :  { %2605 = vst.msk [vmem:[#allocation3 + $0x178] sm:$0xff] %vm61_vm6, %v4229_v36 }
 0xb29   :  { %v2541_v38 = vpop.permute.xlu0 %2540  ;;  %v2623_v30 = vpop.permute.xlu1 %2622 }
 0xb2a   :  { %v2549_v40 = vsel %vm4354_vm14, %v2539_v22, %v2541_v38  ;;  %v2631_v41 = vsel %vm461_vm2, %v4148_v58, %v2623_v30  ;;  %v2465_v42 = vpop.permute.xlu2 %2464 }
 0xb2b   :  { %2560 = vst [vmem:[#allocation3 + $0x128] sm:$0xff] %v2549_v40  ;;  %v2734_v43 = vpack.c.bf16 %v2704_v37, %v2631_v41 }
 0xb2c   :  { %2642 = vst [vmem:[#allocation3 + $0x188] sm:$0xff] %v2631_v41 }
 0xb2d   :  { %2482 = vst.msk [vmem:[#allocation3 + $0xe8] sm:$0xff] %vm61_vm6, %v2465_v42  ;;  %2758 = vmatpush.bf16.msrb.mxu1 %v2734_v43 }
 0xb31   :  { %v2459_v16 = vpop.permute.xlu0 %2458  ;;  %v2582_v44 = vpop.permute.xlu1 %2581 }
 0xb32   :  { %v2467_v45 = vsel %vm4355_vm1, %v4172_v20, %v2459_v16  ;;  %v2590_v46 = vsel %vm419_vm3, %v4158_v15, %v2582_v44  ;;  %v2591_v23 = vsel %vm419_vm3, %v2582_v44, %v4227_v34  ;;  %v2383_v47 = vpop.permute.xlu2 %2382  ;;  %v2696_v44 = vld [vmem:[#allocation3 + $0x178] sm:$0xff] }
 0xb33   :  { %2478 = vst [vmem:[#allocation3 + $0xc8] sm:$0xff] %v2467_v45  ;;  %v2728_v49 = vpack.c.bf16 %v2590_v46, %v2549_v40 }
 0xb34   :  { %2601 = vst [vmem:[#allocation3 + $0x158] sm:$0xff] %v2590_v46 }
 0xb35   :  { %2759 = vmatpush.bf16.msrb.mxu1 %v2728_v49  ;;  %2400 = vst.msk [vmem:[#allocation3 + $0x88] sm:$0xff] %vm61_vm6, %v2383_v47  ;;  %v2678_v49 = vld [vmem:[#allocation3 + $0xe8] sm:$0xff] }
 0xb39   :  { %v4244_v50 = vpop.permute.xlu0 %2335  ;;  %v2500_v35 = vpop.permute.xlu1 %2499 }
 0xb3a   :  { %v2344_v51 = vsel %vm167_vm9, %v2334_v32, %v4244_v50  ;;  %v2508_v53 = vsel %vm335_vm5, %v4163_v18, %v2500_v35  ;;  %v2627_v39 = vpop.permute.xlu2 %2626 }
 0xb3b   :  { %2355 = vst [vmem:[#allocation3 + $0x38] sm:$0xff] %v2344_v51  ;;  %v2722_v54 = vpack.c.bf16 %v2508_v53, %v2467_v45  ;;  %v2710_v63 = vpack.c.bf16 %v2344_v51, %v4093_v48 }
 0xb3c   :  { %2519 = vst [vmem:[#allocation3 + $0xf8] sm:$0xff] %v2508_v53 }
 0xb3d   :  { %2760 = vmatpush.bf16.msrb.mxu1 %v2722_v54 }
 0xb41   :  { %v2377_v52 = vpop.permute.xlu1 %2376  ;;  %v2543_v56 = vpop.permute.xlu0 %2542 }
 0xb42   :  { %v2385_v27 = vsel %vm209_vm7, %v4183_v26, %v2377_v52  ;;  %v2550_v57 = vsel %vm4356_vm15, %v2541_v38, %v2543_v56  ;;  %v2463_v60 = vpop.permute.xlu2 %2462 }
 0xb43   :  { %2396 = vst [vmem:[#allocation3 + $0x68] sm:$0xff] %v2385_v27  ;;  %v4254_v61 = vsel %vm4357_vm12, %v2463_v60, %v2465_v42  ;;  %v2716_v62 = vpack.c.bf16 %v2426_v33, %v2385_v27  ;;  %v2729_v48 = vpack.c.bf16 %v2591_v23, %v2550_v57  ;;  %v2666_v57 = vld [vmem:[#allocation3 + $0x88] sm:$0xff] }
 0xb45   :  { %2761 = vmatpush.bf16.msrb.mxu1 %v2716_v62 }
 0xb49   :  { %v2625_v5 = vpop.permute.xlu1 %2624  ;;  %v4257_v12 = vpop.permute.xlu0 %2501  ;;  %2762 = vmatpush.bf16.msrb.mxu1 %v2710_v63 }
 0xb4a   :  { %v2632_v14 = vsel %vm461_vm2, %v2623_v30, %v2625_v5  ;;  %v2633_v58 = vsel %vm461_vm2, %v2625_v5, %v2627_v39  ;;  %v2509_v6 = vsel %vm335_vm5, %v2500_v35, %v4257_v12  ;;  %v2381_v0 = vpop.permute.xlu2 %2380 }
 0xb4b   :  { %v4264_v4 = vsel %vm209_vm7, %v2381_v0, %v2383_v47  ;;  %v2735_v15 = vpack.c.bf16 %v2705_v59, %v2632_v14  ;;  %v2736_v7 = vpack.c.bf16 %v2706_v9, %v2633_v58  ;;  %v2654_v58 = vld [vmem:[#allocation3 + $0x28] sm:$0xff] }
 0xb4c   :  { %3244 = vmatmul.msk.bf16.vlgmr.msrb.gmra.mxu1 %vm570_vm10, %v4276_v11 }
 0xb4d   :  { %2771 = vmatpush.bf16.msrb.mxu0 %v2735_v15  ;;  %2784 = vmatpush.bf16.msrb.mxu3 %v2736_v7 }
 0xb51   :  { %v2461_v17 = vpop.permute.xlu1 %2460  ;;  %v4266_v18 = vpop.permute.xlu0 %2419  ;;  %2772 = vmatpush.bf16.msrb.mxu0 %v2729_v48 }
 0xb52   :  { %v2468_v19 = vsel %vm4358_vm4, %v2459_v16, %v2461_v17  ;;  %v2469_v20 = vsel %vm4359_vm8, %v2461_v17, %v2463_v60  ;;  %v2427_v21 = vsel %vm4360_vm0, %v4223_v3, %v4266_v18 }
 0xb53   :  { %v2723_v22 = vpack.c.bf16 %v2509_v6, %v2468_v19 }
 0xb55   :  { %2773 = vmatpush.bf16.msrb.mxu0 %v2723_v22 }
 0xb59   :  { %v2629_v25 = vpop.permute.xlu0 %2628  ;;  %v2379_v24 = vpop.permute.xlu1 %2378 }
 0xb5a   :  { %v2634_v26 = vsel %vm461_vm2, %v2627_v39, %v2629_v25  ;;  %2646 = vst.msk [vmem:[#allocation3 + $0x1a8] sm:$0xff] %vm61_vm6, %v2629_v25  ;;  %v2386_v28 = vsel %vm209_vm7, %v2377_v52, %v2379_v24  ;;  %v2387_v29 = vsel %vm209_vm7, %v2379_v24, %v2381_v0  ;;  %vm4361_vm2 = vmmov %vm4354_vm14  ;;  %v2340_v52 = vpop.permute.xlu2 %2339 }
 0xb5b   :  { %v2717_v31 = vpack.c.bf16 %v2427_v21, %v2386_v28  ;;  %v2737_v32 = vpack.c.bf16 %v2707_v13, %v2634_v26  ;;  %vm4362_vm7 = vmmov %vm4361_vm2 }
 0xb5d   :  { %2774 = vmatpush.bf16.msrb.mxu0 %v2717_v31  ;;  %2797 = vmatpush.bf16.msra.mxu1 %v2737_v32 }
 0xb61   :  { %v2506_v2 = vpop.permute.xlu0 %2505  ;;  %v2547_v3 = vpop.permute.xlu1 %2546  ;;  %v2702_v33 = vld [vmem:[#allocation3 + $0x1a8] sm:$0xff] }
 0xb62   :  { %2523 = vst.msk [vmem:[#allocation3 + $0x118] sm:$0xff] %vm61_vm6, %v2506_v2  ;;  %v2738_v37 = vpack.c.bf16 %v2708_v1, %v2702_v33 }
 0xb63   :  { %2564 = vst.msk [vmem:[#allocation3 + $0x148] sm:$0xff] %vm61_vm6, %v2547_v3 }
 0xb64   :  { %2810 = vmatpush.bf16.msrb.mxu2 %v2738_v37 }
 0xb69   :  { %v2586_v38 = vpop.permute.xlu0 %2585  ;;  %v2545_v30 = vpop.permute.xlu1 %2544  ;;  %v2684_v47 = vld [vmem:[#allocation3 + $0x118] sm:$0xff] }
 0xb6a   :  { %v2592_v40 = vsel %vm419_vm3, %v4227_v34, %v2586_v38  ;;  %v2593_v41 = vsel %vm419_vm3, %v2586_v38, %v4229_v36  ;;  %v2551_v42 = vsel %vm4361_vm2, %v2543_v56, %v2545_v30  ;;  %v2552_v43 = vsel %vm4362_vm7, %v2545_v30, %v2547_v3  ;;  %v2690_v16 = vld [vmem:[#allocation3 + $0x148] sm:$0xff]  ;;  %vm4363_vm3 = vmmov %vm4360_vm0 }
 0xb6b   :  { %v2732_v45 = vpack.c.bf16 %v2696_v44, %v2690_v16  ;;  %v2730_v46 = vpack.c.bf16 %v2592_v40, %v2551_v42  ;;  %v2731_v23 = vpack.c.bf16 %v2593_v41, %v2552_v43  ;;  %v2726_v35 = vpack.c.bf16 %v2684_v47, %v2678_v49 }
 0xb6d   :  { %2811 = vmatpush.bf16.msrb.mxu2 %v2732_v45  ;;  %2785 = vmatpush.bf16.msrb.mxu3 %v2730_v46 }
 0xb6e   :  { %2798 = vmatpush.bf16.msra.mxu1 %v2731_v23 }
 0xb71   :  { %2812 = vmatpush.bf16.msrb.mxu2 %v2726_v35  ;;  %v2424_v34 = vpop.permute.xlu0 %2423  ;;  %v2504_v51 = vpop.permute.xlu1 %2503 }
 0xb72   :  { %2441 = vst.msk [vmem:[#allocation3 + $0xb8] sm:$0xff] %vm61_vm6, %v2424_v34  ;;  %v2510_v36 = vsel %vm335_vm5, %v4257_v12, %v2504_v51  ;;  %v2511_v53 = vsel %vm335_vm5, %v2504_v51, %v2506_v2 }
 0xb73   :  { %v2724_v39 = vpack.c.bf16 %v2510_v36, %v2469_v20  ;;  %v2725_v54 = vpack.c.bf16 %v2511_v53, %v4254_v61 }
 0xb75   :  { %2786 = vmatpush.bf16.msrb.mxu3 %v2724_v39  ;;  %2799 = vmatpush.bf16.msra.mxu1 %v2725_v54 }
 0xb79   :  { %v2342_v56 = vpop.permute.xlu0 %2341  ;;  %v2422_v27 = vpop.permute.xlu1 %2421  ;;  %v2672_v60 = vld [vmem:[#allocation3 + $0xb8] sm:$0xff] }
 0xb7a   :  { %v2347_v62 = vsel %vm167_vm9, %v2340_v52, %v2342_v56  ;;  %2359 = vst.msk [vmem:[#allocation3 + $0x58] sm:$0xff] %vm61_vm6, %v2342_v56  ;;  %v2428_v63 = vsel %vm4363_vm3, %v4266_v18, %v2422_v27  ;;  %v2429_v59 = vsel %vm4364_vm11, %v2422_v27, %v2424_v34  ;;  %v2720_v9 = vpack.c.bf16 %v2672_v60, %v2666_v57 }
 0xb7b   :  { %v2718_v5 = vpack.c.bf16 %v2428_v63, %v2387_v29  ;;  %v2719_v61 = vpack.c.bf16 %v2429_v59, %v4264_v4  ;;  %v2713_v12 = vpack.c.bf16 %v2347_v62, %v4146_v10 }
 0xb7c   :  { %2813 = vmatpush.bf16.msrb.mxu2 %v2720_v9 }
 0xb7d   :  { %2787 = vmatpush.bf16.msrb.mxu3 %v2718_v5  ;;  %2800 = vmatpush.bf16.msra.mxu1 %v2719_v61 }
 0xb81   :  { %v2338_v14 = vpop.permute.xlu1 %2337  ;;  %v2660_v6 = vld [vmem:[#allocation3 + $0x58] sm:$0xff]  ;;  %2801 = vmatpush.bf16.msra.mxu1 %v2713_v12 }
 0xb82   :  { %v2345_v0 = vsel %vm167_vm9, %v4244_v50, %v2338_v14  ;;  %v2346_v15 = vsel %vm167_vm9, %v2338_v14, %v2340_v52  ;;  %v2714_v7 = vpack.c.bf16 %v2660_v6, %v2654_v58 }
 0xb83   :  { %v2711_v48 = vpack.c.bf16 %v2345_v0, %v4137_v8  ;;  %v2712_v17 = vpack.c.bf16 %v2346_v15, %v4135_v55 }
 0xb84   :  { %2814 = vmatpush.bf16.msrb.mxu2 %v2714_v7  ;;  %3247 = vmatmul.msk.bf16.vlgmr.msra.gmra.mxu1 %vm570_vm10, %v4276_v11 }
 0xb85   :  { %2775 = vmatpush.bf16.msrb.mxu0 %v2711_v48  ;;  %2788 = vmatpush.bf16.msrb.mxu3 %v2712_v17 }
 0xb87   :  { %3248 = vmatmul.msk.bf16.vlgmr.msrb.gmra.mxu2 %vm570_vm10, %v4276_v11 }
 0xb88   :  { %3245 = vmatmul.msk.bf16.vlgmr.msrb.gmra.mxu0 %vm570_vm10, %v4276_v11  ;;  %3246 = vmatmul.msk.bf16.vlgmr.msrb.gmra.mxu3 %vm570_vm10, %v4276_v11 }
 0xb97   :  { %v2751_v55 = vpop.f32.mrf.mxu3 }
 0xb98   :  { %2820 = vst [vmem:[%s4344_s6] sm:$0xff] %v2751_v55 }
 0xb9f   :  { %v2753_v50 = vpop.f32.mrf.mxu3 }
 0xbc9   :  { %v2764_v10 = vpop.f32.mrf.mxu1 }
 0xbca   :  { %2821 = vst [vmem:[%s4344_s6 + $0x8] sm:$0xff] %v2764_v10 }
 0xbd1   :  { %v2766_v8 = vpop.f32.mrf.mxu1 }
 0xc01   :  { %v2803_v4 = vpop.f32.mrf.mxu1 }
 0xc02   :  { %2824 = vst [vmem:[%s4344_s6 + $0x20] sm:$0xff] %v2803_v4 }
 0xc05   :  { %v2777_v18 = vpop.f32.mrf.mxu0 }
 0xc06   :  { %2822 = vst [vmem:[%s4344_s6 + $0x10] sm:$0xff] %v2777_v18 }
 0xc09   :  { %v2805_v19 = vpop.f32.mrf.mxu1 }
 0xc0a   :  { %v2816_v20 = vpop.f32.mrf.mxu2 }
 0xc0b   :  { %2825 = vst.msk [vmem:[%s4344_s6 + $0x28] sm:$0xff] %vm61_vm6, %v2816_v20  ;;  %v2790_v21 = vpop.f32.mrf.mxu3 }
 0xc0c   :  { %2823 = vst [vmem:[%s4344_s6 + $0x18] sm:$0xff] %v2790_v21 }
 0xc0d   :  { %v2779_v22 = vpop.f32.mrf.mxu0 }
 0xc12   :  { %v2818_v11 = vpop.f32.mrf.mxu2 }
 0xc13   :  { %v2792_v13 = vpop.f32.mrf.mxu3 }
 0xc14   :  { %2830 = vsyncpa [#allocation5], 1 }
 0xc15   :  { %2831 = vsyncpa [#allocation7], 1 }

</bundles_post_ra>
